<compile_context>
chip_gen: v7x
topology: tpu7x:2x2x1
jax: 0.10.0
libtpu: 0.0.40
codegen_flags: <defaults>
</compile_context>

<pallas_src>
import jax
import jax.numpy as jnp
from jax.experimental import pallas as pl
from jax.experimental.pallas import tpu as pltpu

TIME_INTERVAL = 16
HIDDEN = 64
HID_PAD = 128           # hidden padded to one full 128-lane block per gate
FEAT = 496              # conv feature width (31 * 16)
FEAT_PAD = 512          # padded to 4 full 128-lane vregs
DIV_PAD = 8             # div features padded 7 -> 8 sublanes

_VMEM_SPEC = pl.BlockSpec(memory_space=pltpu.MemorySpace.VMEM)


# ------------------------------ fused kernel --------------------------------

def _fused_kernel(x_ref, div_ref,
                  w1_ref, b1_ref, w2_ref, b2_ref,
                  wih_ref, whh_ref, bg_ref,
                  f1h_ref, f1d_ref, f1b_ref,
                  f2_ref, f2b_ref, f3_ref, f3b_ref,
                  out_ref):
    # conv1 as a Toeplitz matmul (output layout: feature = h*16 + oc), bf16
    # operands, f32 accumulation.
    xb = x_ref[...].astype(jnp.bfloat16)                       # (N, 448)
    h1 = jnp.dot(xb, w1_ref[...], preferred_element_type=jnp.float32) + b1_ref[...]
    h1 = jnp.maximum(h1, 0.0)                                  # pool1 is identity
    # conv2 (1x1) as a block-diagonal matmul.
    h2 = jnp.dot(h1.astype(jnp.bfloat16), w2_ref[...],
                 preferred_element_type=jnp.float32) + b2_ref[...]
    h2 = jnp.maximum(h2, 0.0)                                  # pool2 is identity, (N, 512)

    # LSTM: the same input is fed at every time step, so the input projection
    # (all 4 gates fused, 128-lane padded per gate) is hoisted out of the loop.
    xw = (jnp.dot(h2.astype(jnp.bfloat16), wih_ref[...],
                  preferred_element_type=jnp.float32) + bg_ref[...])   # (N, 512)

    # Step 0 peeled: h0 = c0 = 0  =>  gates == xw, no recurrent matmul needed.
    i0 = jax.nn.sigmoid(xw[:, 0:HID_PAD])
    g0 = jnp.tanh(xw[:, 2 * HID_PAD:3 * HID_PAD])
    o0 = jax.nn.sigmoid(xw[:, 3 * HID_PAD:4 * HID_PAD])
    c = i0 * g0                                                # padded lanes stay 0
    h = o0 * jnp.tanh(c)

    # Recurrent path kept f32 (review's accuracy fallback for the serial path).
    # TODO(synk): hold whh in MXU weight regs via pltpu.matmul_push_rhs /
    # matmul_acc_lhs across the 15 steps instead of re-pushing it each jnp.dot.
    whh = whh_ref[...]

    def step(_, carry):
        h, c = carry                                           # (N, 128) each, f32
        gates = xw + jnp.dot(h, whh, preferred_element_type=jnp.float32)
        # Each gate sits in its own 128-lane block -> vreg-aligned slices.
        i = jax.nn.sigmoid(gates[:, 0:HID_PAD])
        f = jax.nn.sigmoid(gates[:, HID_PAD:2 * HID_PAD])
        g = jnp.tanh(gates[:, 2 * HID_PAD:3 * HID_PAD])
        o = jax.nn.sigmoid(gates[:, 3 * HID_PAD:4 * HID_PAD])
        c = f * c + i * g                                      # padded lanes stay 0
        h = o * jnp.tanh(c)
        return h, c

    h, _ = jax.lax.fori_loop(1, TIME_INTERVAL, step, (h, c), unroll=True)

    # concat([h, div]) @ fc1_w  ==  h @ fc1_wh + div @ fc1_wd  (padded to 128 lanes)
    y = (jnp.dot(h.astype(jnp.bfloat16), f1h_ref[...],
                 preferred_element_type=jnp.float32)
         + jnp.dot(div_ref[...].astype(jnp.bfloat16), f1d_ref[...],
                   preferred_element_type=jnp.float32)
         + f1b_ref[...])
    y = jnp.dot(y.astype(jnp.bfloat16), f2_ref[...],
                preferred_element_type=jnp.float32) + f2b_ref[...]
    y = jnp.dot(y.astype(jnp.bfloat16), f3_ref[...],
                preferred_element_type=jnp.float32) + f3b_ref[...]
    out_ref[...] = y


# ------------------------------ weight prep ---------------------------------

def init_params(key, in_ch=7, div_dim=7, label_dim=16):
    ks = jax.random.split(key, 14)

    def u(k, shape, fan_in):
        bound = 1.0 / jnp.sqrt(jnp.float32(fan_in))
        return jax.random.uniform(k, shape, jnp.float32, -bound, bound)

    return dict(
        conv1_w=u(ks[0], (16, in_ch, 2, 2), in_ch * 4),
        conv1_b=u(ks[1], (16,), in_ch * 4),
        conv2_w=u(ks[2], (16, 16, 1, 1), 16),
        conv2_b=u(ks[3], (16,), 16),
        w_ih=u(ks[4], (256, 496), 64),        # PyTorch LSTM gate order: i, f, g, o
        w_hh=u(ks[5], (256, 64), 64),
        b_ih=u(ks[6], (256,), 64),
        b_hh=u(ks[7], (256,), 64),
        fc1_w=u(ks[8], (71, 71), 71),
        fc1_b=u(ks[9], (71,), 71),
        fc2_w=u(ks[10], (71, 71), 71),
        fc2_b=u(ks[11], (71,), 71),
        fc3_w=u(ks[12], (label_dim, 71), 71),
        fc3_b=u(ks[13], (label_dim,), 71),
    )


def _conv1_as_matrix(w, b, hgt, wid):
    """2x2 valid conv on an NCHW (C,hgt,wid=2) map as a dense
    (C*hgt*wid, (hgt-1)*OC) matrix. Input feature order: (c, h, w) (= contiguous
    reshape of NCHW); output feature order: (h, oc)."""
    oc_n, c_n = w.shape[0], w.shape[1]
    h_out = hgt - 1
    shape = (c_n, 2, 2, h_out, oc_n)
    cc = jnp.arange(c_n).reshape(c_n, 1, 1, 1, 1)
    kh = jnp.arange(2).reshape(1, 2, 1, 1, 1)
    kw = jnp.arange(2).reshape(1, 1, 2, 1, 1)
    hh = jnp.arange(h_out).reshape(1, 1, 1, h_out, 1)
    oc = jnp.arange(oc_n).reshape(1, 1, 1, 1, oc_n)
    fin = jnp.broadcast_to(cc * (hgt * wid) + (hh + kh) * wid + kw, shape).reshape(-1)
    fout = jnp.broadcast_to(hh * oc_n + oc, shape).reshape(-1)
    vals = jnp.broadcast_to(w.transpose(1, 2, 3, 0)[:, :, :, None, :], shape).reshape(-1)
    mat = jnp.zeros((c_n * hgt * wid, h_out * oc_n), jnp.float32).at[fin, fout].set(vals)
    bias = jnp.tile(b, h_out).reshape(1, h_out * oc_n)
    return mat, bias


def prepare_params(params, hgt=32, wid=2):
    """One-time conversion of PyTorch-layout parameters into kernel-ready,
    lane-aligned (and bf16 where safe) matrices. Runs outside forward()."""
    assert wid == 2, "maxpool-identity / width-spanning conv1 assumes input width 2"
    h_out = hgt - 1
    oc_n = params["conv1_w"].shape[0]          # 16
    feat = h_out * oc_n                        # 496
    assert params["w_ih"].shape[1] == feat and feat == FEAT

    # conv1 -> Toeplitz matmul; conv2 (1x1) -> block-diagonal matmul.
    # Feature dim padded 496 -> 512 so h1/h2/xw are lane-dense.
    w1, b1 = _conv1_as_matrix(params["conv1_w"], params["conv1_b"], hgt, wid)
    w1p = jnp.zeros((w1.shape[0], FEAT_PAD), jnp.float32).at[:, :feat].set(w1)
    b1p = jnp.zeros((1, FEAT_PAD), jnp.float32).at[:, :feat].set(b1)

    w2 = jnp.kron(jnp.eye(h_out, dtype=jnp.float32),
                  params["conv2_w"].reshape(oc_n, oc_n).T)                  # (496, 496)
    w2p = jnp.zeros((FEAT_PAD, FEAT_PAD), jnp.float32).at[:feat, :feat].set(w2)
    b2p = jnp.zeros((1, FEAT_PAD), jnp.float32).at[0, :feat].set(
        jnp.tile(params["conv2_b"], h_out))

    # Permute w_ih columns so conv output in (h, ch) order feeds the LSTM
    # directly (PyTorch flatten order is ch*31 + h).
    perm = (jnp.arange(oc_n)[None, :] * h_out + jnp.arange(h_out)[:, None]).reshape(-1)
    wih_p = params["w_ih"][:, perm]                                          # (256, 496)

    # Fuse the 4 gates into single matrices; pad each gate to its own 128-lane
    # block (hidden 64 -> 128) so gate extraction is vreg-aligned.
    wih_all = jnp.zeros((FEAT_PAD, 4 * HID_PAD), jnp.float32)
    whh_all = jnp.zeros((HID_PAD, 4 * HID_PAD), jnp.float32)
    bg_all = jnp.zeros((1, 4 * HID_PAD), jnp.float32)
    b_sum = params["b_ih"] + params["b_hh"]
    for k in range(4):                                         # gate order: i, f, g, o
        wih_all = wih_all.at[:feat, k * HID_PAD:k * HID_PAD + HIDDEN].set(
            wih_p[k * HIDDEN:(k + 1) * HIDDEN, :].T)
        whh_all = whh_all.at[:HIDDEN, k * HID_PAD:k * HID_PAD + HIDDEN].set(
            params["w_hh"][k * HIDDEN:(k + 1) * HIDDEN, :].T)
        bg_all = bg_all.at[0, k * HID_PAD:k * HID_PAD + HIDDEN].set(
            b_sum[k * HIDDEN:(k + 1) * HIDDEN])

    # FC tail: split fc1 into the hidden part and the div part; zero-pad all
    # 71-wide dimensions to 128 lanes so intermediate FC outputs are lane-dense.
    fc1_t = params["fc1_w"].T                   # (71 in, 71 out)
    div_dim = fc1_t.shape[0] - HIDDEN
    fcw = fc1_t.shape[1]                        # 71
    label_dim = params["fc3_w"].shape[0]
    f1h = jnp.zeros((HID_PAD, 128), jnp.float32).at[:HIDDEN, :fcw].set(fc1_t[:HIDDEN])
    f1d = jnp.zeros((DIV_PAD, 128), jnp.float32).at[:div_dim, :fcw].set(fc1_t[HIDDEN:])
    f1b = jnp.zeros((1, 128), jnp.float32).at[0, :fcw].set(params["fc1_b"])
    f2 = jnp.zeros((128, 128), jnp.float32).at[:fcw, :fcw].set(params["fc2_w"].T)
    f2b = jnp.zeros((1, 128), jnp.float32).at[0, :fcw].set(params["fc2_b"])
    f3 = jnp.zeros((128, label_dim), jnp.float32).at[:fcw, :].set(params["fc3_w"].T)
    f3b = params["fc3_b"].reshape(1, label_dim)

    # Feed-forward weights stored bf16 (f32 accumulation in-kernel); recurrent
    # weights (whh) and all biases kept f32.
    bf = jnp.bfloat16
    return dict(
        w1=w1p.astype(bf), b1=b1p,
        w2=w2p.astype(bf), b2=b2p,
        wih=wih_all.astype(bf), whh=whh_all, bg=bg_all,
        f1h=f1h.astype(bf), f1d=f1d.astype(bf), f1b=f1b,
        f2=f2.astype(bf), f2b=f2b, f3=f3.astype(bf), f3b=f3b)


# -------------------------------- forward ------------------------------------

def _forward(prep, wav_data, div_data):
    n = wav_data.shape[0]
    x = wav_data.reshape(n, -1).astype(jnp.float32)            # (N, C*H*W) contiguous
    div_flat = div_data.reshape(n, -1).astype(jnp.float32)     # (N, 7)
    div_pad = jnp.zeros((n, prep["f1d"].shape[0]), jnp.float32).at[
        :, :div_flat.shape[1]].set(div_flat)                   # (N, 8)
    label_dim = prep["f3"].shape[1]

    # Single grid point: weights ~1.9 MiB total fit VMEM with huge margin on
    # v5e/v6e/v7x.  For large production batches, add a batch grid with a
    # "parallel" axis (v7x megacore) and constant index_maps for the weights.
    return pl.pallas_call(
        _fused_kernel,
        out_shape=jax.ShapeDtypeStruct((n, label_dim), jnp.float32),
        in_specs=[_VMEM_SPEC] * 16,
        out_specs=_VMEM_SPEC,
    )(x, div_pad,
      prep["w1"], prep["b1"], prep["w2"], prep["b2"],
      prep["wih"], prep["whh"], prep["bg"],
      prep["f1h"], prep["f1d"], prep["f1b"],
      prep["f2"], prep["f2b"], prep["f3"], prep["f3b"])


forward = jax.jit(_forward)


# --------------------------- pure-JAX reference -------------------------------

def reference(params, wav_data, div_data):
    x = jax.lax.conv_general_dilated(
        wav_data.astype(jnp.float32), params["conv1_w"], (1, 1), "VALID",
        dimension_numbers=("NCHW", "OIHW", "NCHW"))
    x = x + params["conv1_b"][None, :, None, None]
    x = jax.lax.reduce_window(x, -jnp.inf, jax.lax.max, (1, 1, 1, 2), (1, 1, 1, 2),
                              [(0, 0), (0, 0), (0, 0), (1, 1)])
    x = jnp.maximum(x, 0.0)
    x = jax.lax.conv_general_dilated(
        x, params["conv2_w"], (1, 1), "VALID",
        dimension_numbers=("NCHW", "OIHW", "NCHW"))
    x = x + params["conv2_b"][None, :, None, None]
    x = jax.lax.reduce_window(x, -jnp.inf, jax.lax.max, (1, 1, 1, 2), (1, 1, 1, 2),
                              [(0, 0), (0, 0), (0, 0), (1, 1)])
    x = jnp.maximum(x, 0.0)
    n = x.shape[0]
    xf = x.reshape(n, -1)                              # (N, 496), PyTorch flatten order

    wih, whh = params["w_ih"], params["w_hh"]
    bb = params["b_ih"] + params["b_hh"]
    h = jnp.zeros((n, 64), jnp.float32)
    c = jnp.zeros((n, 64), jnp.float32)
    for _ in range(TIME_INTERVAL):
        gates = xf @ wih.T + h @ whh.T + bb
        i = jax.nn.sigmoid(gates[:, 0:64])
        f = jax.nn.sigmoid(gates[:, 64:128])
        g = jnp.tanh(gates[:, 128:192])
        o = jax.nn.sigmoid(gates[:, 192:256])
        c = f * c + i * g
        h = o * jnp.tanh(c)

    z = jnp.concatenate([h, div_data.reshape(n, -1).astype(jnp.float32)], axis=1)
    y = z @ params["fc1_w"].T + params["fc1_b"]
    y = y @ params["fc2_w"].T + params["fc2_b"]
    y = y @ params["fc3_w"].T + params["fc3_b"]
    return y


# ---------------------------------- main --------------------------------------

if __name__ == "__main__":
    key = jax.random.PRNGKey(0)
    kp, kw, kd = jax.random.split(key, 3)

    N, LABEL = 2, 16
    params = init_params(kp, in_ch=7, div_dim=7, label_dim=LABEL)
    wav_data = jax.random.normal(kw, (N, 7, 32, 2), jnp.float32)   # NCHW
    div_data = jax.random.normal(kd, (N, 7), jnp.float32)

    prep = prepare_params(params)

    out = jax.block_until_ready(forward(prep, wav_data, div_data))

    ref = reference(params, wav_data, div_data)
    assert out.shape == (N, LABEL)
    # Feed-forward matmuls use bf16 operands (f32 accumulation), so the check
    # against the all-f32 reference is loosened accordingly; the recurrent
    # LSTM path is kept f32 to bound the accumulated error over 16 steps.
    assert jnp.allclose(out, ref, atol=2e-2, rtol=2e-2), (out, ref)

    print("KERNEL_OK")
</pallas_src>

<mosaic_0001>
module attributes {stable_mosaic.version = 11 : i64} {
  func.func @_fused_kernel(%arg0: memref<2x448xf32, #tpu.memory_space<vmem>>, %arg1: memref<2x8xf32, #tpu.memory_space<vmem>>, %arg2: memref<448x512xbf16, #tpu.memory_space<vmem>>, %arg3: memref<1x512xf32, #tpu.memory_space<vmem>>, %arg4: memref<512x512xbf16, #tpu.memory_space<vmem>>, %arg5: memref<1x512xf32, #tpu.memory_space<vmem>>, %arg6: memref<512x512xbf16, #tpu.memory_space<vmem>>, %arg7: memref<128x512xf32, #tpu.memory_space<vmem>>, %arg8: memref<1x512xf32, #tpu.memory_space<vmem>>, %arg9: memref<128x128xbf16, #tpu.memory_space<vmem>>, %arg10: memref<8x128xbf16, #tpu.memory_space<vmem>>, %arg11: memref<1x128xf32, #tpu.memory_space<vmem>>, %arg12: memref<128x128xbf16, #tpu.memory_space<vmem>>, %arg13: memref<1x128xf32, #tpu.memory_space<vmem>>, %arg14: memref<128x16xbf16, #tpu.memory_space<vmem>>, %arg15: memref<1x16xf32, #tpu.memory_space<vmem>>, %arg16: memref<2x16xf32, #tpu.memory_space<vmem>>) attributes {dimension_semantics = [], scalar_prefetch = 0 : i64, scratch_operands = 0 : i64, tpu.core_type = #tpu.core_type<tc>} {
    %c0 = arith.constant 0 : index
    %c0_0 = arith.constant 0 : index
    %0 = vector.load %arg0[%c0, %c0_0] : memref<2x448xf32, #tpu.memory_space<vmem>>, vector<2x448xf32>
    %1 = arith.truncf %0 : vector<2x448xf32> to vector<2x448xbf16>
    %c0_1 = arith.constant 0 : index
    %c0_2 = arith.constant 0 : index
    %2 = vector.load %arg2[%c0_1, %c0_2] : memref<448x512xbf16, #tpu.memory_space<vmem>>, vector<448x512xbf16>
    %cst = arith.constant dense<0.000000e+00> : vector<2x512xf32>
    %3 = tpu.matmul %1, %2, %cst {dimension_numbers = #tpu.dot_dimension_numbers<[1], [0], [0], [1], [0, 0, 1, 1], [], []>} : vector<2x448xbf16>, vector<448x512xbf16>, vector<2x512xf32> -> vector<2x512xf32>
    %c0_3 = arith.constant 0 : index
    %c0_4 = arith.constant 0 : index
    %4 = vector.load %arg3[%c0_3, %c0_4] : memref<1x512xf32, #tpu.memory_space<vmem>>, vector<1x512xf32>
    %5 = vector.broadcast %4 : vector<1x512xf32> to vector<2x512xf32>
    %6 = arith.addf %3, %5 : vector<2x512xf32>
    %cst_5 = arith.constant 0.000000e+00 : f32
    %7 = vector.broadcast %cst_5 : f32 to vector<2x512xf32>
    %8 = arith.maximumf %6, %7 : vector<2x512xf32>
    %9 = arith.truncf %8 : vector<2x512xf32> to vector<2x512xbf16>
    %c0_6 = arith.constant 0 : index
    %c0_7 = arith.constant 0 : index
    %10 = vector.load %arg4[%c0_6, %c0_7] : memref<512x512xbf16, #tpu.memory_space<vmem>>, vector<512x512xbf16>
    %cst_8 = arith.constant dense<0.000000e+00> : vector<2x512xf32>
    %11 = tpu.matmul %9, %10, %cst_8 {dimension_numbers = #tpu.dot_dimension_numbers<[1], [0], [0], [1], [0, 0, 1, 1], [], []>} : vector<2x512xbf16>, vector<512x512xbf16>, vector<2x512xf32> -> vector<2x512xf32>
    %c0_9 = arith.constant 0 : index
    %c0_10 = arith.constant 0 : index
    %12 = vector.load %arg5[%c0_9, %c0_10] : memref<1x512xf32, #tpu.memory_space<vmem>>, vector<1x512xf32>
    %13 = vector.broadcast %12 : vector<1x512xf32> to vector<2x512xf32>
    %14 = arith.addf %11, %13 : vector<2x512xf32>
    %cst_11 = arith.constant 0.000000e+00 : f32
    %15 = vector.broadcast %cst_11 : f32 to vector<2x512xf32>
    %16 = arith.maximumf %14, %15 : vector<2x512xf32>
    %17 = arith.truncf %16 : vector<2x512xf32> to vector<2x512xbf16>
    %c0_12 = arith.constant 0 : index
    %c0_13 = arith.constant 0 : index
    %18 = vector.load %arg6[%c0_12, %c0_13] : memref<512x512xbf16, #tpu.memory_space<vmem>>, vector<512x512xbf16>
    %cst_14 = arith.constant dense<0.000000e+00> : vector<2x512xf32>
    %19 = tpu.matmul %17, %18, %cst_14 {dimension_numbers = #tpu.dot_dimension_numbers<[1], [0], [0], [1], [0, 0, 1, 1], [], []>} : vector<2x512xbf16>, vector<512x512xbf16>, vector<2x512xf32> -> vector<2x512xf32>
    %c0_15 = arith.constant 0 : index
    %c0_16 = arith.constant 0 : index
    %20 = vector.load %arg8[%c0_15, %c0_16] : memref<1x512xf32, #tpu.memory_space<vmem>>, vector<1x512xf32>
    %21 = vector.broadcast %20 : vector<1x512xf32> to vector<2x512xf32>
    %22 = arith.addf %19, %21 : vector<2x512xf32>
    %23 = vector.extract_strided_slice %22 {offsets = [0, 0], sizes = [2, 128], strides = [1, 1]} : vector<2x512xf32> to vector<2x128xf32>
    %24 = arith.negf %23 : vector<2x128xf32>
    %25 = math.exp %24 : vector<2x128xf32>
    %cst_17 = arith.constant 1.000000e+00 : f32
    %26 = vector.broadcast %cst_17 : f32 to vector<2x128xf32>
    %27 = arith.addf %26, %25 : vector<2x128xf32>
    %28 = arith.divf %26, %27 : vector<2x128xf32>
    %29 = vector.extract_strided_slice %22 {offsets = [0, 256], sizes = [2, 128], strides = [1, 1]} : vector<2x512xf32> to vector<2x128xf32>
    %30 = math.tanh %29 : vector<2x128xf32>
    %31 = vector.extract_strided_slice %22 {offsets = [0, 384], sizes = [2, 128], strides = [1, 1]} : vector<2x512xf32> to vector<2x128xf32>
    %32 = arith.negf %31 : vector<2x128xf32>
    %33 = math.exp %32 : vector<2x128xf32>
    %cst_18 = arith.constant 1.000000e+00 : f32
    %34 = vector.broadcast %cst_18 : f32 to vector<2x128xf32>
    %35 = arith.addf %34, %33 : vector<2x128xf32>
    %36 = arith.divf %34, %35 : vector<2x128xf32>
    %37 = arith.mulf %28, %30 : vector<2x128xf32>
    %38 = math.tanh %37 : vector<2x128xf32>
    %39 = arith.mulf %36, %38 : vector<2x128xf32>
    %c0_19 = arith.constant 0 : index
    %c0_20 = arith.constant 0 : index
    %40 = vector.load %arg7[%c0_19, %c0_20] : memref<128x512xf32, #tpu.memory_space<vmem>>, vector<128x512xf32>
    %c0_i32 = arith.constant 0 : i32
    %cst_21 = arith.constant dense<0.000000e+00> : vector<2x512xf32>
    %41 = tpu.matmul %39, %40, %cst_21 {dimension_numbers = #tpu.dot_dimension_numbers<[1], [0], [0], [1], [0, 0, 1, 1], [], []>} : vector<2x128xf32>, vector<128x512xf32>, vector<2x512xf32> -> vector<2x512xf32>
    %42 = arith.addf %22, %41 : vector<2x512xf32>
    %43 = vector.extract_strided_slice %42 {offsets = [0, 0], sizes = [2, 128], strides = [1, 1]} : vector<2x512xf32> to vector<2x128xf32>
    %44 = arith.negf %43 : vector<2x128xf32>
    %45 = math.exp %44 : vector<2x128xf32>
    %cst_22 = arith.constant 1.000000e+00 : f32
    %46 = vector.broadcast %cst_22 : f32 to vector<2x128xf32>
    %47 = arith.addf %46, %45 : vector<2x128xf32>
    %48 = arith.divf %46, %47 : vector<2x128xf32>
    %49 = vector.extract_strided_slice %42 {offsets = [0, 128], sizes = [2, 128], strides = [1, 1]} : vector<2x512xf32> to vector<2x128xf32>
    %50 = arith.negf %49 : vector<2x128xf32>
    %51 = math.exp %50 : vector<2x128xf32>
    %cst_23 = arith.constant 1.000000e+00 : f32
    %52 = vector.broadcast %cst_23 : f32 to vector<2x128xf32>
    %53 = arith.addf %52, %51 : vector<2x128xf32>
    %54 = arith.divf %52, %53 : vector<2x128xf32>
    %55 = vector.extract_strided_slice %42 {offsets = [0, 256], sizes = [2, 128], strides = [1, 1]} : vector<2x512xf32> to vector<2x128xf32>
    %56 = math.tanh %55 : vector<2x128xf32>
    %57 = vector.extract_strided_slice %42 {offsets = [0, 384], sizes = [2, 128], strides = [1, 1]} : vector<2x512xf32> to vector<2x128xf32>
    %58 = arith.negf %57 : vector<2x128xf32>
    %59 = math.exp %58 : vector<2x128xf32>
    %cst_24 = arith.constant 1.000000e+00 : f32
    %60 = vector.broadcast %cst_24 : f32 to vector<2x128xf32>
    %61 = arith.addf %60, %59 : vector<2x128xf32>
    %62 = arith.divf %60, %61 : vector<2x128xf32>
    %63 = arith.mulf %54, %37 : vector<2x128xf32>
    %64 = arith.mulf %48, %56 : vector<2x128xf32>
    %65 = arith.addf %63, %64 : vector<2x128xf32>
    %66 = math.tanh %65 : vector<2x128xf32>
    %67 = arith.mulf %62, %66 : vector<2x128xf32>
    %c1_i32 = arith.constant 1 : i32
    %cst_25 = arith.constant dense<0.000000e+00> : vector<2x512xf32>
    %68 = tpu.matmul %67, %40, %cst_25 {dimension_numbers = #tpu.dot_dimension_numbers<[1], [0], [0], [1], [0, 0, 1, 1], [], []>} : vector<2x128xf32>, vector<128x512xf32>, vector<2x512xf32> -> vector<2x512xf32>
    %69 = arith.addf %22, %68 : vector<2x512xf32>
    %70 = vector.extract_strided_slice %69 {offsets = [0, 0], sizes = [2, 128], strides = [1, 1]} : vector<2x512xf32> to vector<2x128xf32>
    %71 = arith.negf %70 : vector<2x128xf32>
    %72 = math.exp %71 : vector<2x128xf32>
    %cst_26 = arith.constant 1.000000e+00 : f32
    %73 = vector.broadcast %cst_26 : f32 to vector<2x128xf32>
    %74 = arith.addf %73, %72 : vector<2x128xf32>
    %75 = arith.divf %73, %74 : vector<2x128xf32>
    %76 = vector.extract_strided_slice %69 {offsets = [0, 128], sizes = [2, 128], strides = [1, 1]} : vector<2x512xf32> to vector<2x128xf32>
    %77 = arith.negf %76 : vector<2x128xf32>
    %78 = math.exp %77 : vector<2x128xf32>
    %cst_27 = arith.constant 1.000000e+00 : f32
    %79 = vector.broadcast %cst_27 : f32 to vector<2x128xf32>
    %80 = arith.addf %79, %78 : vector<2x128xf32>
    %81 = arith.divf %79, %80 : vector<2x128xf32>
    %82 = vector.extract_strided_slice %69 {offsets = [0, 256], sizes = [2, 128], strides = [1, 1]} : vector<2x512xf32> to vector<2x128xf32>
    %83 = math.tanh %82 : vector<2x128xf32>
    %84 = vector.extract_strided_slice %69 {offsets = [0, 384], sizes = [2, 128], strides = [1, 1]} : vector<2x512xf32> to vector<2x128xf32>
    %85 = arith.negf %84 : vector<2x128xf32>
    %86 = math.exp %85 : vector<2x128xf32>
    %cst_28 = arith.constant 1.000000e+00 : f32
    %87 = vector.broadcast %cst_28 : f32 to vector<2x128xf32>
    %88 = arith.addf %87, %86 : vector<2x128xf32>
    %89 = arith.divf %87, %88 : vector<2x128xf32>
    %90 = arith.mulf %81, %65 : vector<2x128xf32>
    %91 = arith.mulf %75, %83 : vector<2x128xf32>
    %92 = arith.addf %90, %91 : vector<2x128xf32>
    %93 = math.tanh %92 : vector<2x128xf32>
    %94 = arith.mulf %89, %93 : vector<2x128xf32>
    %c2_i32 = arith.constant 2 : i32
    %cst_29 = arith.constant dense<0.000000e+00> : vector<2x512xf32>
    %95 = tpu.matmul %94, %40, %cst_29 {dimension_numbers = #tpu.dot_dimension_numbers<[1], [0], [0], [1], [0, 0, 1, 1], [], []>} : vector<2x128xf32>, vector<128x512xf32>, vector<2x512xf32> -> vector<2x512xf32>
    %96 = arith.addf %22, %95 : vector<2x512xf32>
    %97 = vector.extract_strided_slice %96 {offsets = [0, 0], sizes = [2, 128], strides = [1, 1]} : vector<2x512xf32> to vector<2x128xf32>
    %98 = arith.negf %97 : vector<2x128xf32>
    %99 = math.exp %98 : vector<2x128xf32>
    %cst_30 = arith.constant 1.000000e+00 : f32
    %100 = vector.broadcast %cst_30 : f32 to vector<2x128xf32>
    %101 = arith.addf %100, %99 : vector<2x128xf32>
    %102 = arith.divf %100, %101 : vector<2x128xf32>
    %103 = vector.extract_strided_slice %96 {offsets = [0, 128], sizes = [2, 128], strides = [1, 1]} : vector<2x512xf32> to vector<2x128xf32>
    %104 = arith.negf %103 : vector<2x128xf32>
    %105 = math.exp %104 : vector<2x128xf32>
    %cst_31 = arith.constant 1.000000e+00 : f32
    %106 = vector.broadcast %cst_31 : f32 to vector<2x128xf32>
    %107 = arith.addf %106, %105 : vector<2x128xf32>
    %108 = arith.divf %106, %107 : vector<2x128xf32>
    %109 = vector.extract_strided_slice %96 {offsets = [0, 256], sizes = [2, 128], strides = [1, 1]} : vector<2x512xf32> to vector<2x128xf32>
    %110 = math.tanh %109 : vector<2x128xf32>
    %111 = vector.extract_strided_slice %96 {offsets = [0, 384], sizes = [2, 128], strides = [1, 1]} : vector<2x512xf32> to vector<2x128xf32>
    %112 = arith.negf %111 : vector<2x128xf32>
    %113 = math.exp %112 : vector<2x128xf32>
    %cst_32 = arith.constant 1.000000e+00 : f32
    %114 = vector.broadcast %cst_32 : f32 to vector<2x128xf32>
    %115 = arith.addf %114, %113 : vector<2x128xf32>
    %116 = arith.divf %114, %115 : vector<2x128xf32>
    %117 = arith.mulf %108, %92 : vector<2x128xf32>
    %118 = arith.mulf %102, %110 : vector<2x128xf32>
    %119 = arith.addf %117, %118 : vector<2x128xf32>
    %120 = math.tanh %119 : vector<2x128xf32>
    %121 = arith.mulf %116, %120 : vector<2x128xf32>
    %c3_i32 = arith.constant 3 : i32
    %cst_33 = arith.constant dense<0.000000e+00> : vector<2x512xf32>
    %122 = tpu.matmul %121, %40, %cst_33 {dimension_numbers = #tpu.dot_dimension_numbers<[1], [0], [0], [1], [0, 0, 1, 1], [], []>} : vector<2x128xf32>, vector<128x512xf32>, vector<2x512xf32> -> vector<2x512xf32>
    %123 = arith.addf %22, %122 : vector<2x512xf32>
    %124 = vector.extract_strided_slice %123 {offsets = [0, 0], sizes = [2, 128], strides = [1, 1]} : vector<2x512xf32> to vector<2x128xf32>
    %125 = arith.negf %124 : vector<2x128xf32>
    %126 = math.exp %125 : vector<2x128xf32>
    %cst_34 = arith.constant 1.000000e+00 : f32
    %127 = vector.broadcast %cst_34 : f32 to vector<2x128xf32>
    %128 = arith.addf %127, %126 : vector<2x128xf32>
    %129 = arith.divf %127, %128 : vector<2x128xf32>
    %130 = vector.extract_strided_slice %123 {offsets = [0, 128], sizes = [2, 128], strides = [1, 1]} : vector<2x512xf32> to vector<2x128xf32>
    %131 = arith.negf %130 : vector<2x128xf32>
    %132 = math.exp %131 : vector<2x128xf32>
    %cst_35 = arith.constant 1.000000e+00 : f32
    %133 = vector.broadcast %cst_35 : f32 to vector<2x128xf32>
    %134 = arith.addf %133, %132 : vector<2x128xf32>
    %135 = arith.divf %133, %134 : vector<2x128xf32>
    %136 = vector.extract_strided_slice %123 {offsets = [0, 256], sizes = [2, 128], strides = [1, 1]} : vector<2x512xf32> to vector<2x128xf32>
    %137 = math.tanh %136 : vector<2x128xf32>
    %138 = vector.extract_strided_slice %123 {offsets = [0, 384], sizes = [2, 128], strides = [1, 1]} : vector<2x512xf32> to vector<2x128xf32>
    %139 = arith.negf %138 : vector<2x128xf32>
    %140 = math.exp %139 : vector<2x128xf32>
    %cst_36 = arith.constant 1.000000e+00 : f32
    %141 = vector.broadcast %cst_36 : f32 to vector<2x128xf32>
    %142 = arith.addf %141, %140 : vector<2x128xf32>
    %143 = arith.divf %141, %142 : vector<2x128xf32>
    %144 = arith.mulf %135, %119 : vector<2x128xf32>
    %145 = arith.mulf %129, %137 : vector<2x128xf32>
    %146 = arith.addf %144, %145 : vector<2x128xf32>
    %147 = math.tanh %146 : vector<2x128xf32>
    %148 = arith.mulf %143, %147 : vector<2x128xf32>
    %c4_i32 = arith.constant 4 : i32
    %cst_37 = arith.constant dense<0.000000e+00> : vector<2x512xf32>
    %149 = tpu.matmul %148, %40, %cst_37 {dimension_numbers = #tpu.dot_dimension_numbers<[1], [0], [0], [1], [0, 0, 1, 1], [], []>} : vector<2x128xf32>, vector<128x512xf32>, vector<2x512xf32> -> vector<2x512xf32>
    %150 = arith.addf %22, %149 : vector<2x512xf32>
    %151 = vector.extract_strided_slice %150 {offsets = [0, 0], sizes = [2, 128], strides = [1, 1]} : vector<2x512xf32> to vector<2x128xf32>
    %152 = arith.negf %151 : vector<2x128xf32>
    %153 = math.exp %152 : vector<2x128xf32>
    %cst_38 = arith.constant 1.000000e+00 : f32
    %154 = vector.broadcast %cst_38 : f32 to vector<2x128xf32>
    %155 = arith.addf %154, %153 : vector<2x128xf32>
    %156 = arith.divf %154, %155 : vector<2x128xf32>
    %157 = vector.extract_strided_slice %150 {offsets = [0, 128], sizes = [2, 128], strides = [1, 1]} : vector<2x512xf32> to vector<2x128xf32>
    %158 = arith.negf %157 : vector<2x128xf32>
    %159 = math.exp %158 : vector<2x128xf32>
    %cst_39 = arith.constant 1.000000e+00 : f32
    %160 = vector.broadcast %cst_39 : f32 to vector<2x128xf32>
    %161 = arith.addf %160, %159 : vector<2x128xf32>
    %162 = arith.divf %160, %161 : vector<2x128xf32>
    %163 = vector.extract_strided_slice %150 {offsets = [0, 256], sizes = [2, 128], strides = [1, 1]} : vector<2x512xf32> to vector<2x128xf32>
    %164 = math.tanh %163 : vector<2x128xf32>
    %165 = vector.extract_strided_slice %150 {offsets = [0, 384], sizes = [2, 128], strides = [1, 1]} : vector<2x512xf32> to vector<2x128xf32>
    %166 = arith.negf %165 : vector<2x128xf32>
    %167 = math.exp %166 : vector<2x128xf32>
    %cst_40 = arith.constant 1.000000e+00 : f32
    %168 = vector.broadcast %cst_40 : f32 to vector<2x128xf32>
    %169 = arith.addf %168, %167 : vector<2x128xf32>
    %170 = arith.divf %168, %169 : vector<2x128xf32>
    %171 = arith.mulf %162, %146 : vector<2x128xf32>
    %172 = arith.mulf %156, %164 : vector<2x128xf32>
    %173 = arith.addf %171, %172 : vector<2x128xf32>
    %174 = math.tanh %173 : vector<2x128xf32>
    %175 = arith.mulf %170, %174 : vector<2x128xf32>
    %c5_i32 = arith.constant 5 : i32
    %cst_41 = arith.constant dense<0.000000e+00> : vector<2x512xf32>
    %176 = tpu.matmul %175, %40, %cst_41 {dimension_numbers = #tpu.dot_dimension_numbers<[1], [0], [0], [1], [0, 0, 1, 1], [], []>} : vector<2x128xf32>, vector<128x512xf32>, vector<2x512xf32> -> vector<2x512xf32>
    %177 = arith.addf %22, %176 : vector<2x512xf32>
    %178 = vector.extract_strided_slice %177 {offsets = [0, 0], sizes = [2, 128], strides = [1, 1]} : vector<2x512xf32> to vector<2x128xf32>
    %179 = arith.negf %178 : vector<2x128xf32>
    %180 = math.exp %179 : vector<2x128xf32>
    %cst_42 = arith.constant 1.000000e+00 : f32
    %181 = vector.broadcast %cst_42 : f32 to vector<2x128xf32>
    %182 = arith.addf %181, %180 : vector<2x128xf32>
    %183 = arith.divf %181, %182 : vector<2x128xf32>
    %184 = vector.extract_strided_slice %177 {offsets = [0, 128], sizes = [2, 128], strides = [1, 1]} : vector<2x512xf32> to vector<2x128xf32>
    %185 = arith.negf %184 : vector<2x128xf32>
    %186 = math.exp %185 : vector<2x128xf32>
    %cst_43 = arith.constant 1.000000e+00 : f32
    %187 = vector.broadcast %cst_43 : f32 to vector<2x128xf32>
    %188 = arith.addf %187, %186 : vector<2x128xf32>
    %189 = arith.divf %187, %188 : vector<2x128xf32>
    %190 = vector.extract_strided_slice %177 {offsets = [0, 256], sizes = [2, 128], strides = [1, 1]} : vector<2x512xf32> to vector<2x128xf32>
    %191 = math.tanh %190 : vector<2x128xf32>
    %192 = vector.extract_strided_slice %177 {offsets = [0, 384], sizes = [2, 128], strides = [1, 1]} : vector<2x512xf32> to vector<2x128xf32>
    %193 = arith.negf %192 : vector<2x128xf32>
    %194 = math.exp %193 : vector<2x128xf32>
    %cst_44 = arith.constant 1.000000e+00 : f32
    %195 = vector.broadcast %cst_44 : f32 to vector<2x128xf32>
    %196 = arith.addf %195, %194 : vector<2x128xf32>
    %197 = arith.divf %195, %196 : vector<2x128xf32>
    %198 = arith.mulf %189, %173 : vector<2x128xf32>
    %199 = arith.mulf %183, %191 : vector<2x128xf32>
    %200 = arith.addf %198, %199 : vector<2x128xf32>
    %201 = math.tanh %200 : vector<2x128xf32>
    %202 = arith.mulf %197, %201 : vector<2x128xf32>
    %c6_i32 = arith.constant 6 : i32
    %cst_45 = arith.constant dense<0.000000e+00> : vector<2x512xf32>
    %203 = tpu.matmul %202, %40, %cst_45 {dimension_numbers = #tpu.dot_dimension_numbers<[1], [0], [0], [1], [0, 0, 1, 1], [], []>} : vector<2x128xf32>, vector<128x512xf32>, vector<2x512xf32> -> vector<2x512xf32>
    %204 = arith.addf %22, %203 : vector<2x512xf32>
    %205 = vector.extract_strided_slice %204 {offsets = [0, 0], sizes = [2, 128], strides = [1, 1]} : vector<2x512xf32> to vector<2x128xf32>
    %206 = arith.negf %205 : vector<2x128xf32>
    %207 = math.exp %206 : vector<2x128xf32>
    %cst_46 = arith.constant 1.000000e+00 : f32
    %208 = vector.broadcast %cst_46 : f32 to vector<2x128xf32>
    %209 = arith.addf %208, %207 : vector<2x128xf32>
    %210 = arith.divf %208, %209 : vector<2x128xf32>
    %211 = vector.extract_strided_slice %204 {offsets = [0, 128], sizes = [2, 128], strides = [1, 1]} : vector<2x512xf32> to vector<2x128xf32>
    %212 = arith.negf %211 : vector<2x128xf32>
    %213 = math.exp %212 : vector<2x128xf32>
    %cst_47 = arith.constant 1.000000e+00 : f32
    %214 = vector.broadcast %cst_47 : f32 to vector<2x128xf32>
    %215 = arith.addf %214, %213 : vector<2x128xf32>
    %216 = arith.divf %214, %215 : vector<2x128xf32>
    %217 = vector.extract_strided_slice %204 {offsets = [0, 256], sizes = [2, 128], strides = [1, 1]} : vector<2x512xf32> to vector<2x128xf32>
    %218 = math.tanh %217 : vector<2x128xf32>
    %219 = vector.extract_strided_slice %204 {offsets = [0, 384], sizes = [2, 128], strides = [1, 1]} : vector<2x512xf32> to vector<2x128xf32>
    %220 = arith.negf %219 : vector<2x128xf32>
    %221 = math.exp %220 : vector<2x128xf32>
    %cst_48 = arith.constant 1.000000e+00 : f32
    %222 = vector.broadcast %cst_48 : f32 to vector<2x128xf32>
    %223 = arith.addf %222, %221 : vector<2x128xf32>
    %224 = arith.divf %222, %223 : vector<2x128xf32>
    %225 = arith.mulf %216, %200 : vector<2x128xf32>
    %226 = arith.mulf %210, %218 : vector<2x128xf32>
    %227 = arith.addf %225, %226 : vector<2x128xf32>
    %228 = math.tanh %227 : vector<2x128xf32>
    %229 = arith.mulf %224, %228 : vector<2x128xf32>
    %c7_i32 = arith.constant 7 : i32
    %cst_49 = arith.constant dense<0.000000e+00> : vector<2x512xf32>
    %230 = tpu.matmul %229, %40, %cst_49 {dimension_numbers = #tpu.dot_dimension_numbers<[1], [0], [0], [1], [0, 0, 1, 1], [], []>} : vector<2x128xf32>, vector<128x512xf32>, vector<2x512xf32> -> vector<2x512xf32>
    %231 = arith.addf %22, %230 : vector<2x512xf32>
    %232 = vector.extract_strided_slice %231 {offsets = [0, 0], sizes = [2, 128], strides = [1, 1]} : vector<2x512xf32> to vector<2x128xf32>
    %233 = arith.negf %232 : vector<2x128xf32>
    %234 = math.exp %233 : vector<2x128xf32>
    %cst_50 = arith.constant 1.000000e+00 : f32
    %235 = vector.broadcast %cst_50 : f32 to vector<2x128xf32>
    %236 = arith.addf %235, %234 : vector<2x128xf32>
    %237 = arith.divf %235, %236 : vector<2x128xf32>
    %238 = vector.extract_strided_slice %231 {offsets = [0, 128], sizes = [2, 128], strides = [1, 1]} : vector<2x512xf32> to vector<2x128xf32>
    %239 = arith.negf %238 : vector<2x128xf32>
    %240 = math.exp %239 : vector<2x128xf32>
    %cst_51 = arith.constant 1.000000e+00 : f32
    %241 = vector.broadcast %cst_51 : f32 to vector<2x128xf32>
    %242 = arith.addf %241, %240 : vector<2x128xf32>
    %243 = arith.divf %241, %242 : vector<2x128xf32>
    %244 = vector.extract_strided_slice %231 {offsets = [0, 256], sizes = [2, 128], strides = [1, 1]} : vector<2x512xf32> to vector<2x128xf32>
    %245 = math.tanh %244 : vector<2x128xf32>
    %246 = vector.extract_strided_slice %231 {offsets = [0, 384], sizes = [2, 128], strides = [1, 1]} : vector<2x512xf32> to vector<2x128xf32>
    %247 = arith.negf %246 : vector<2x128xf32>
    %248 = math.exp %247 : vector<2x128xf32>
    %cst_52 = arith.constant 1.000000e+00 : f32
    %249 = vector.broadcast %cst_52 : f32 to vector<2x128xf32>
    %250 = arith.addf %249, %248 : vector<2x128xf32>
    %251 = arith.divf %249, %250 : vector<2x128xf32>
    %252 = arith.mulf %243, %227 : vector<2x128xf32>
    %253 = arith.mulf %237, %245 : vector<2x128xf32>
    %254 = arith.addf %252, %253 : vector<2x128xf32>
    %255 = math.tanh %254 : vector<2x128xf32>
    %256 = arith.mulf %251, %255 : vector<2x128xf32>
    %c8_i32 = arith.constant 8 : i32
    %cst_53 = arith.constant dense<0.000000e+00> : vector<2x512xf32>
    %257 = tpu.matmul %256, %40, %cst_53 {dimension_numbers = #tpu.dot_dimension_numbers<[1], [0], [0], [1], [0, 0, 1, 1], [], []>} : vector<2x128xf32>, vector<128x512xf32>, vector<2x512xf32> -> vector<2x512xf32>
    %258 = arith.addf %22, %257 : vector<2x512xf32>
    %259 = vector.extract_strided_slice %258 {offsets = [0, 0], sizes = [2, 128], strides = [1, 1]} : vector<2x512xf32> to vector<2x128xf32>
    %260 = arith.negf %259 : vector<2x128xf32>
    %261 = math.exp %260 : vector<2x128xf32>
    %cst_54 = arith.constant 1.000000e+00 : f32
    %262 = vector.broadcast %cst_54 : f32 to vector<2x128xf32>
    %263 = arith.addf %262, %261 : vector<2x128xf32>
    %264 = arith.divf %262, %263 : vector<2x128xf32>
    %265 = vector.extract_strided_slice %258 {offsets = [0, 128], sizes = [2, 128], strides = [1, 1]} : vector<2x512xf32> to vector<2x128xf32>
    %266 = arith.negf %265 : vector<2x128xf32>
    %267 = math.exp %266 : vector<2x128xf32>
    %cst_55 = arith.constant 1.000000e+00 : f32
    %268 = vector.broadcast %cst_55 : f32 to vector<2x128xf32>
    %269 = arith.addf %268, %267 : vector<2x128xf32>
    %270 = arith.divf %268, %269 : vector<2x128xf32>
    %271 = vector.extract_strided_slice %258 {offsets = [0, 256], sizes = [2, 128], strides = [1, 1]} : vector<2x512xf32> to vector<2x128xf32>
    %272 = math.tanh %271 : vector<2x128xf32>
    %273 = vector.extract_strided_slice %258 {offsets = [0, 384], sizes = [2, 128], strides = [1, 1]} : vector<2x512xf32> to vector<2x128xf32>
    %274 = arith.negf %273 : vector<2x128xf32>
    %275 = math.exp %274 : vector<2x128xf32>
    %cst_56 = arith.constant 1.000000e+00 : f32
    %276 = vector.broadcast %cst_56 : f32 to vector<2x128xf32>
    %277 = arith.addf %276, %275 : vector<2x128xf32>
    %278 = arith.divf %276, %277 : vector<2x128xf32>
    %279 = arith.mulf %270, %254 : vector<2x128xf32>
    %280 = arith.mulf %264, %272 : vector<2x128xf32>
    %281 = arith.addf %279, %280 : vector<2x128xf32>
    %282 = math.tanh %281 : vector<2x128xf32>
    %283 = arith.mulf %278, %282 : vector<2x128xf32>
    %c9_i32 = arith.constant 9 : i32
    %cst_57 = arith.constant dense<0.000000e+00> : vector<2x512xf32>
    %284 = tpu.matmul %283, %40, %cst_57 {dimension_numbers = #tpu.dot_dimension_numbers<[1], [0], [0], [1], [0, 0, 1, 1], [], []>} : vector<2x128xf32>, vector<128x512xf32>, vector<2x512xf32> -> vector<2x512xf32>
    %285 = arith.addf %22, %284 : vector<2x512xf32>
    %286 = vector.extract_strided_slice %285 {offsets = [0, 0], sizes = [2, 128], strides = [1, 1]} : vector<2x512xf32> to vector<2x128xf32>
    %287 = arith.negf %286 : vector<2x128xf32>
    %288 = math.exp %287 : vector<2x128xf32>
    %cst_58 = arith.constant 1.000000e+00 : f32
    %289 = vector.broadcast %cst_58 : f32 to vector<2x128xf32>
    %290 = arith.addf %289, %288 : vector<2x128xf32>
    %291 = arith.divf %289, %290 : vector<2x128xf32>
    %292 = vector.extract_strided_slice %285 {offsets = [0, 128], sizes = [2, 128], strides = [1, 1]} : vector<2x512xf32> to vector<2x128xf32>
    %293 = arith.negf %292 : vector<2x128xf32>
    %294 = math.exp %293 : vector<2x128xf32>
    %cst_59 = arith.constant 1.000000e+00 : f32
    %295 = vector.broadcast %cst_59 : f32 to vector<2x128xf32>
    %296 = arith.addf %295, %294 : vector<2x128xf32>
    %297 = arith.divf %295, %296 : vector<2x128xf32>
    %298 = vector.extract_strided_slice %285 {offsets = [0, 256], sizes = [2, 128], strides = [1, 1]} : vector<2x512xf32> to vector<2x128xf32>
    %299 = math.tanh %298 : vector<2x128xf32>
    %300 = vector.extract_strided_slice %285 {offsets = [0, 384], sizes = [2, 128], strides = [1, 1]} : vector<2x512xf32> to vector<2x128xf32>
    %301 = arith.negf %300 : vector<2x128xf32>
    %302 = math.exp %301 : vector<2x128xf32>
    %cst_60 = arith.constant 1.000000e+00 : f32
    %303 = vector.broadcast %cst_60 : f32 to vector<2x128xf32>
    %304 = arith.addf %303, %302 : vector<2x128xf32>
    %305 = arith.divf %303, %304 : vector<2x128xf32>
    %306 = arith.mulf %297, %281 : vector<2x128xf32>
    %307 = arith.mulf %291, %299 : vector<2x128xf32>
    %308 = arith.addf %306, %307 : vector<2x128xf32>
    %309 = math.tanh %308 : vector<2x128xf32>
    %310 = arith.mulf %305, %309 : vector<2x128xf32>
    %c10_i32 = arith.constant 10 : i32
    %cst_61 = arith.constant dense<0.000000e+00> : vector<2x512xf32>
    %311 = tpu.matmul %310, %40, %cst_61 {dimension_numbers = #tpu.dot_dimension_numbers<[1], [0], [0], [1], [0, 0, 1, 1], [], []>} : vector<2x128xf32>, vector<128x512xf32>, vector<2x512xf32> -> vector<2x512xf32>
    %312 = arith.addf %22, %311 : vector<2x512xf32>
    %313 = vector.extract_strided_slice %312 {offsets = [0, 0], sizes = [2, 128], strides = [1, 1]} : vector<2x512xf32> to vector<2x128xf32>
    %314 = arith.negf %313 : vector<2x128xf32>
    %315 = math.exp %314 : vector<2x128xf32>
    %cst_62 = arith.constant 1.000000e+00 : f32
    %316 = vector.broadcast %cst_62 : f32 to vector<2x128xf32>
    %317 = arith.addf %316, %315 : vector<2x128xf32>
    %318 = arith.divf %316, %317 : vector<2x128xf32>
    %319 = vector.extract_strided_slice %312 {offsets = [0, 128], sizes = [2, 128], strides = [1, 1]} : vector<2x512xf32> to vector<2x128xf32>
    %320 = arith.negf %319 : vector<2x128xf32>
    %321 = math.exp %320 : vector<2x128xf32>
    %cst_63 = arith.constant 1.000000e+00 : f32
    %322 = vector.broadcast %cst_63 : f32 to vector<2x128xf32>
    %323 = arith.addf %322, %321 : vector<2x128xf32>
    %324 = arith.divf %322, %323 : vector<2x128xf32>
    %325 = vector.extract_strided_slice %312 {offsets = [0, 256], sizes = [2, 128], strides = [1, 1]} : vector<2x512xf32> to vector<2x128xf32>
    %326 = math.tanh %325 : vector<2x128xf32>
    %327 = vector.extract_strided_slice %312 {offsets = [0, 384], sizes = [2, 128], strides = [1, 1]} : vector<2x512xf32> to vector<2x128xf32>
    %328 = arith.negf %327 : vector<2x128xf32>
    %329 = math.exp %328 : vector<2x128xf32>
    %cst_64 = arith.constant 1.000000e+00 : f32
    %330 = vector.broadcast %cst_64 : f32 to vector<2x128xf32>
    %331 = arith.addf %330, %329 : vector<2x128xf32>
    %332 = arith.divf %330, %331 : vector<2x128xf32>
    %333 = arith.mulf %324, %308 : vector<2x128xf32>
    %334 = arith.mulf %318, %326 : vector<2x128xf32>
    %335 = arith.addf %333, %334 : vector<2x128xf32>
    %336 = math.tanh %335 : vector<2x128xf32>
    %337 = arith.mulf %332, %336 : vector<2x128xf32>
    %c11_i32 = arith.constant 11 : i32
    %cst_65 = arith.constant dense<0.000000e+00> : vector<2x512xf32>
    %338 = tpu.matmul %337, %40, %cst_65 {dimension_numbers = #tpu.dot_dimension_numbers<[1], [0], [0], [1], [0, 0, 1, 1], [], []>} : vector<2x128xf32>, vector<128x512xf32>, vector<2x512xf32> -> vector<2x512xf32>
    %339 = arith.addf %22, %338 : vector<2x512xf32>
    %340 = vector.extract_strided_slice %339 {offsets = [0, 0], sizes = [2, 128], strides = [1, 1]} : vector<2x512xf32> to vector<2x128xf32>
    %341 = arith.negf %340 : vector<2x128xf32>
    %342 = math.exp %341 : vector<2x128xf32>
    %cst_66 = arith.constant 1.000000e+00 : f32
    %343 = vector.broadcast %cst_66 : f32 to vector<2x128xf32>
    %344 = arith.addf %343, %342 : vector<2x128xf32>
    %345 = arith.divf %343, %344 : vector<2x128xf32>
    %346 = vector.extract_strided_slice %339 {offsets = [0, 128], sizes = [2, 128], strides = [1, 1]} : vector<2x512xf32> to vector<2x128xf32>
    %347 = arith.negf %346 : vector<2x128xf32>
    %348 = math.exp %347 : vector<2x128xf32>
    %cst_67 = arith.constant 1.000000e+00 : f32
    %349 = vector.broadcast %cst_67 : f32 to vector<2x128xf32>
    %350 = arith.addf %349, %348 : vector<2x128xf32>
    %351 = arith.divf %349, %350 : vector<2x128xf32>
    %352 = vector.extract_strided_slice %339 {offsets = [0, 256], sizes = [2, 128], strides = [1, 1]} : vector<2x512xf32> to vector<2x128xf32>
    %353 = math.tanh %352 : vector<2x128xf32>
    %354 = vector.extract_strided_slice %339 {offsets = [0, 384], sizes = [2, 128], strides = [1, 1]} : vector<2x512xf32> to vector<2x128xf32>
    %355 = arith.negf %354 : vector<2x128xf32>
    %356 = math.exp %355 : vector<2x128xf32>
    %cst_68 = arith.constant 1.000000e+00 : f32
    %357 = vector.broadcast %cst_68 : f32 to vector<2x128xf32>
    %358 = arith.addf %357, %356 : vector<2x128xf32>
    %359 = arith.divf %357, %358 : vector<2x128xf32>
    %360 = arith.mulf %351, %335 : vector<2x128xf32>
    %361 = arith.mulf %345, %353 : vector<2x128xf32>
    %362 = arith.addf %360, %361 : vector<2x128xf32>
    %363 = math.tanh %362 : vector<2x128xf32>
    %364 = arith.mulf %359, %363 : vector<2x128xf32>
    %c12_i32 = arith.constant 12 : i32
    %cst_69 = arith.constant dense<0.000000e+00> : vector<2x512xf32>
    %365 = tpu.matmul %364, %40, %cst_69 {dimension_numbers = #tpu.dot_dimension_numbers<[1], [0], [0], [1], [0, 0, 1, 1], [], []>} : vector<2x128xf32>, vector<128x512xf32>, vector<2x512xf32> -> vector<2x512xf32>
    %366 = arith.addf %22, %365 : vector<2x512xf32>
    %367 = vector.extract_strided_slice %366 {offsets = [0, 0], sizes = [2, 128], strides = [1, 1]} : vector<2x512xf32> to vector<2x128xf32>
    %368 = arith.negf %367 : vector<2x128xf32>
    %369 = math.exp %368 : vector<2x128xf32>
    %cst_70 = arith.constant 1.000000e+00 : f32
    %370 = vector.broadcast %cst_70 : f32 to vector<2x128xf32>
    %371 = arith.addf %370, %369 : vector<2x128xf32>
    %372 = arith.divf %370, %371 : vector<2x128xf32>
    %373 = vector.extract_strided_slice %366 {offsets = [0, 128], sizes = [2, 128], strides = [1, 1]} : vector<2x512xf32> to vector<2x128xf32>
    %374 = arith.negf %373 : vector<2x128xf32>
    %375 = math.exp %374 : vector<2x128xf32>
    %cst_71 = arith.constant 1.000000e+00 : f32
    %376 = vector.broadcast %cst_71 : f32 to vector<2x128xf32>
    %377 = arith.addf %376, %375 : vector<2x128xf32>
    %378 = arith.divf %376, %377 : vector<2x128xf32>
    %379 = vector.extract_strided_slice %366 {offsets = [0, 256], sizes = [2, 128], strides = [1, 1]} : vector<2x512xf32> to vector<2x128xf32>
    %380 = math.tanh %379 : vector<2x128xf32>
    %381 = vector.extract_strided_slice %366 {offsets = [0, 384], sizes = [2, 128], strides = [1, 1]} : vector<2x512xf32> to vector<2x128xf32>
    %382 = arith.negf %381 : vector<2x128xf32>
    %383 = math.exp %382 : vector<2x128xf32>
    %cst_72 = arith.constant 1.000000e+00 : f32
    %384 = vector.broadcast %cst_72 : f32 to vector<2x128xf32>
    %385 = arith.addf %384, %383 : vector<2x128xf32>
    %386 = arith.divf %384, %385 : vector<2x128xf32>
    %387 = arith.mulf %378, %362 : vector<2x128xf32>
    %388 = arith.mulf %372, %380 : vector<2x128xf32>
    %389 = arith.addf %387, %388 : vector<2x128xf32>
    %390 = math.tanh %389 : vector<2x128xf32>
    %391 = arith.mulf %386, %390 : vector<2x128xf32>
    %c13_i32 = arith.constant 13 : i32
    %cst_73 = arith.constant dense<0.000000e+00> : vector<2x512xf32>
    %392 = tpu.matmul %391, %40, %cst_73 {dimension_numbers = #tpu.dot_dimension_numbers<[1], [0], [0], [1], [0, 0, 1, 1], [], []>} : vector<2x128xf32>, vector<128x512xf32>, vector<2x512xf32> -> vector<2x512xf32>
    %393 = arith.addf %22, %392 : vector<2x512xf32>
    %394 = vector.extract_strided_slice %393 {offsets = [0, 0], sizes = [2, 128], strides = [1, 1]} : vector<2x512xf32> to vector<2x128xf32>
    %395 = arith.negf %394 : vector<2x128xf32>
    %396 = math.exp %395 : vector<2x128xf32>
    %cst_74 = arith.constant 1.000000e+00 : f32
    %397 = vector.broadcast %cst_74 : f32 to vector<2x128xf32>
    %398 = arith.addf %397, %396 : vector<2x128xf32>
    %399 = arith.divf %397, %398 : vector<2x128xf32>
    %400 = vector.extract_strided_slice %393 {offsets = [0, 128], sizes = [2, 128], strides = [1, 1]} : vector<2x512xf32> to vector<2x128xf32>
    %401 = arith.negf %400 : vector<2x128xf32>
    %402 = math.exp %401 : vector<2x128xf32>
    %cst_75 = arith.constant 1.000000e+00 : f32
    %403 = vector.broadcast %cst_75 : f32 to vector<2x128xf32>
    %404 = arith.addf %403, %402 : vector<2x128xf32>
    %405 = arith.divf %403, %404 : vector<2x128xf32>
    %406 = vector.extract_strided_slice %393 {offsets = [0, 256], sizes = [2, 128], strides = [1, 1]} : vector<2x512xf32> to vector<2x128xf32>
    %407 = math.tanh %406 : vector<2x128xf32>
    %408 = vector.extract_strided_slice %393 {offsets = [0, 384], sizes = [2, 128], strides = [1, 1]} : vector<2x512xf32> to vector<2x128xf32>
    %409 = arith.negf %408 : vector<2x128xf32>
    %410 = math.exp %409 : vector<2x128xf32>
    %cst_76 = arith.constant 1.000000e+00 : f32
    %411 = vector.broadcast %cst_76 : f32 to vector<2x128xf32>
    %412 = arith.addf %411, %410 : vector<2x128xf32>
    %413 = arith.divf %411, %412 : vector<2x128xf32>
    %414 = arith.mulf %405, %389 : vector<2x128xf32>
    %415 = arith.mulf %399, %407 : vector<2x128xf32>
    %416 = arith.addf %414, %415 : vector<2x128xf32>
    %417 = math.tanh %416 : vector<2x128xf32>
    %418 = arith.mulf %413, %417 : vector<2x128xf32>
    %c14_i32 = arith.constant 14 : i32
    %cst_77 = arith.constant dense<0.000000e+00> : vector<2x512xf32>
    %419 = tpu.matmul %418, %40, %cst_77 {dimension_numbers = #tpu.dot_dimension_numbers<[1], [0], [0], [1], [0, 0, 1, 1], [], []>} : vector<2x128xf32>, vector<128x512xf32>, vector<2x512xf32> -> vector<2x512xf32>
    %420 = arith.addf %22, %419 : vector<2x512xf32>
    %421 = vector.extract_strided_slice %420 {offsets = [0, 0], sizes = [2, 128], strides = [1, 1]} : vector<2x512xf32> to vector<2x128xf32>
    %422 = arith.negf %421 : vector<2x128xf32>
    %423 = math.exp %422 : vector<2x128xf32>
    %cst_78 = arith.constant 1.000000e+00 : f32
    %424 = vector.broadcast %cst_78 : f32 to vector<2x128xf32>
    %425 = arith.addf %424, %423 : vector<2x128xf32>
    %426 = arith.divf %424, %425 : vector<2x128xf32>
    %427 = vector.extract_strided_slice %420 {offsets = [0, 128], sizes = [2, 128], strides = [1, 1]} : vector<2x512xf32> to vector<2x128xf32>
    %428 = arith.negf %427 : vector<2x128xf32>
    %429 = math.exp %428 : vector<2x128xf32>
    %cst_79 = arith.constant 1.000000e+00 : f32
    %430 = vector.broadcast %cst_79 : f32 to vector<2x128xf32>
    %431 = arith.addf %430, %429 : vector<2x128xf32>
    %432 = arith.divf %430, %431 : vector<2x128xf32>
    %433 = vector.extract_strided_slice %420 {offsets = [0, 256], sizes = [2, 128], strides = [1, 1]} : vector<2x512xf32> to vector<2x128xf32>
    %434 = math.tanh %433 : vector<2x128xf32>
    %435 = vector.extract_strided_slice %420 {offsets = [0, 384], sizes = [2, 128], strides = [1, 1]} : vector<2x512xf32> to vector<2x128xf32>
    %436 = arith.negf %435 : vector<2x128xf32>
    %437 = math.exp %436 : vector<2x128xf32>
    %cst_80 = arith.constant 1.000000e+00 : f32
    %438 = vector.broadcast %cst_80 : f32 to vector<2x128xf32>
    %439 = arith.addf %438, %437 : vector<2x128xf32>
    %440 = arith.divf %438, %439 : vector<2x128xf32>
    %441 = arith.mulf %432, %416 : vector<2x128xf32>
    %442 = arith.mulf %426, %434 : vector<2x128xf32>
    %443 = arith.addf %441, %442 : vector<2x128xf32>
    %444 = math.tanh %443 : vector<2x128xf32>
    %445 = arith.mulf %440, %444 : vector<2x128xf32>
    %446 = arith.truncf %445 : vector<2x128xf32> to vector<2x128xbf16>
    %c0_81 = arith.constant 0 : index
    %c0_82 = arith.constant 0 : index
    %447 = vector.load %arg9[%c0_81, %c0_82] : memref<128x128xbf16, #tpu.memory_space<vmem>>, vector<128x128xbf16>
    %cst_83 = arith.constant dense<0.000000e+00> : vector<2x128xf32>
    %448 = tpu.matmul %446, %447, %cst_83 {dimension_numbers = #tpu.dot_dimension_numbers<[1], [0], [0], [1], [0, 0, 1, 1], [], []>} : vector<2x128xbf16>, vector<128x128xbf16>, vector<2x128xf32> -> vector<2x128xf32>
    %c0_84 = arith.constant 0 : index
    %c0_85 = arith.constant 0 : index
    %449 = vector.load %arg1[%c0_84, %c0_85] : memref<2x8xf32, #tpu.memory_space<vmem>>, vector<2x8xf32>
    %450 = arith.truncf %449 : vector<2x8xf32> to vector<2x8xbf16>
    %c0_86 = arith.constant 0 : index
    %c0_87 = arith.constant 0 : index
    %451 = vector.load %arg10[%c0_86, %c0_87] : memref<8x128xbf16, #tpu.memory_space<vmem>>, vector<8x128xbf16>
    %cst_88 = arith.constant dense<0.000000e+00> : vector<2x128xf32>
    %452 = tpu.matmul %450, %451, %cst_88 {dimension_numbers = #tpu.dot_dimension_numbers<[1], [0], [0], [1], [0, 0, 1, 1], [], []>} : vector<2x8xbf16>, vector<8x128xbf16>, vector<2x128xf32> -> vector<2x128xf32>
    %453 = arith.addf %448, %452 : vector<2x128xf32>
    %c0_89 = arith.constant 0 : index
    %c0_90 = arith.constant 0 : index
    %454 = vector.load %arg11[%c0_89, %c0_90] : memref<1x128xf32, #tpu.memory_space<vmem>>, vector<1x128xf32>
    %455 = vector.broadcast %454 : vector<1x128xf32> to vector<2x128xf32>
    %456 = arith.addf %453, %455 : vector<2x128xf32>
    %457 = arith.truncf %456 : vector<2x128xf32> to vector<2x128xbf16>
    %c0_91 = arith.constant 0 : index
    %c0_92 = arith.constant 0 : index
    %458 = vector.load %arg12[%c0_91, %c0_92] : memref<128x128xbf16, #tpu.memory_space<vmem>>, vector<128x128xbf16>
    %cst_93 = arith.constant dense<0.000000e+00> : vector<2x128xf32>
    %459 = tpu.matmul %457, %458, %cst_93 {dimension_numbers = #tpu.dot_dimension_numbers<[1], [0], [0], [1], [0, 0, 1, 1], [], []>} : vector<2x128xbf16>, vector<128x128xbf16>, vector<2x128xf32> -> vector<2x128xf32>
    %c0_94 = arith.constant 0 : index
    %c0_95 = arith.constant 0 : index
    %460 = vector.load %arg13[%c0_94, %c0_95] : memref<1x128xf32, #tpu.memory_space<vmem>>, vector<1x128xf32>
    %461 = vector.broadcast %460 : vector<1x128xf32> to vector<2x128xf32>
    %462 = arith.addf %459, %461 : vector<2x128xf32>
    %463 = arith.truncf %462 : vector<2x128xf32> to vector<2x128xbf16>
    %c0_96 = arith.constant 0 : index
    %c0_97 = arith.constant 0 : index
    %464 = vector.load %arg14[%c0_96, %c0_97] : memref<128x16xbf16, #tpu.memory_space<vmem>>, vector<128x16xbf16>
    %cst_98 = arith.constant dense<0.000000e+00> : vector<2x16xf32>
    %465 = tpu.matmul %463, %464, %cst_98 {dimension_numbers = #tpu.dot_dimension_numbers<[1], [0], [0], [1], [0, 0, 1, 1], [], []>} : vector<2x128xbf16>, vector<128x16xbf16>, vector<2x16xf32> -> vector<2x16xf32>
    %c0_99 = arith.constant 0 : index
    %c0_100 = arith.constant 0 : index
    %466 = vector.load %arg15[%c0_99, %c0_100] : memref<1x16xf32, #tpu.memory_space<vmem>>, vector<1x16xf32>
    %467 = vector.broadcast %466 : vector<1x16xf32> to vector<2x16xf32>
    %468 = arith.addf %465, %467 : vector<2x16xf32>
    %c0_101 = arith.constant 0 : index
    %c0_102 = arith.constant 0 : index
    %469 = vector.load %arg16[%c0_101, %c0_102] : memref<2x16xf32, #tpu.memory_space<vmem>>, vector<2x16xf32>
    tpu.vector_store %arg16[%c0_101, %c0_102], %468 {strides = array<i32>} : memref<2x16xf32, #tpu.memory_space<vmem>>, vector<2x16xf32>,
    return
  }
}

</mosaic_0001>

<bundles_post_ra>
// kernel: _forward.1
= control target key start
LH: loop header
LB: loop body
LE: loop exit
PB: predicated region body
PF: predicated region fallthrough
CT: control target
= control target key end

     0   :  { %s10031_s0 = inlined_call_operand.vmem [shape: f32[2,448], index: 0, kind: input, shape index: {}]   ;;  %s10032_s1 = inlined_call_operand.vmem [shape: f32[2,8], index: 1, kind: input, shape index: {}]   ;;  %s10033_s2 = inlined_call_operand.vmem [shape: bf16[448,512], index: 2, kind: input, shape index: {}]   ;;  %s10034_s3 = inlined_call_operand.vmem [shape: f32[1,512], index: 3, kind: input, shape index: {}]   ;;  %s10035_s4 = inlined_call_operand.hbm [shape: bf16[512,512], index: 4, kind: input, shape index: {}]   ;;  %s10036_s5 = inlined_call_operand.hbm [shape: f32[1,512], index: 5, kind: input, shape index: {}]   ;;  %s10037_s6 = inlined_call_operand.hbm [shape: bf16[512,512], index: 6, kind: input, shape index: {}]   ;;  %s10038_s7 = inlined_call_operand.hbm [shape: f32[128,512], index: 7, kind: input, shape index: {}]   ;;  %s10039_s8 = inlined_call_operand.hbm [shape: f32[1,512], index: 8, kind: input, shape index: {}]   ;;  %s10040_s9 = inlined_call_operand.vmem [shape: bf16[128,128], index: 9, kind: input, shape index: {}]   ;;  %s10041_s10 = inlined_call_operand.hbm [shape: bf16[8,128], index: 10, kind: input, shape index: {}]   ;;  %s10042_s11 = inlined_call_operand.vmem [shape: f32[1,128], index: 11, kind: input, shape index: {}]   ;;  %s10043_s12 = inlined_call_operand.vmem [shape: bf16[128,128], index: 12, kind: input, shape index: {}]   ;;  %s10044_s13 = inlined_call_operand.hbm [shape: f32[1,128], index: 13, kind: input, shape index: {}]   ;;  %s10045_s14 = inlined_call_operand.vmem [shape: bf16[128,16], index: 14, kind: input, shape index: {}]   ;;  %s10046_s15 = inlined_call_operand.hbm [shape: f32[1,16], index: 15, kind: input, shape index: {}]   ;;  %s10047_s16 = inlined_call_operand.hbm [shape: f32[2,16], index: 16, kind: output, shape index: {}]  }
   0x1   :  { %10048 = sst [smem:[#allocation23_spill]] %s10031_s0 }
   0x2   :  { %21 = vsyncpa [#allocation3], 0 }
   0x3   :  { %22 = vsyncpa [#allocation6], 0 }
   0x4   :  { %23 = vsyncpa [#allocation9], 0 }
   0x5   :  { %24 = vsyncpa [#allocation12], 0 }
   0x6   :  { %25 = vsyncpa [#allocation15], 0 }
   0x7   :  { %26 = vsyncpa [#allocation4], 0  ;;  %s8597_s21 = smov [#allocation5]   ;;  %s8598_s23 = smov [#allocation8]  }
   0x8   :  { %s53_s22 = sshll.u32 %s8597_s21, 4  ;;  %s74_s24 = sshll.u32 %s8598_s23, 4  ;;  %s54_s22 = int_to_ptr.vmem [resolvable:$true] %s53_s22  ;;  %s8698_s24 = int_to_ptr.vmem [resolvable:$true] %s74_s24 }
   0x9   :  { %s8387_s27 = scalar_lea.hbm %s10036_s5, 64 }
   0xa   :  { %p8388_p0 = scmp.ne.s32.totalorder %s10036_s5, %s8387_s27  ;;  %p8391_p1 = scmp.lt.u32.totalorder %s8387_s27, %s10036_s5 }
   0xc   :  { %p8393_p2 = pnand %p8391_p1, %p8388_p0 }
   0xe   :  { %8396 = shalt.err (!%p8393_p2)
}
   0xf   :  { %s8397_s17 = scalar_lea.vmem %s54_s22, 64  ;;  %p8402_p4 = scmp.lt.s32.totalorder %s54_s22, %s54_s22 }
  0x10   :  { %p8398_p3 = scmp.ne.s32.totalorder %s54_s22, %s8397_s17  ;;  %p8403_p5 = scmp.lt.s32.totalorder %s8397_s17, %s8397_s17 }
  0x12   :  { %p8404_p6 = por %p8403_p5, %p8402_p4 }
  0x14   :  { %p8405_p7 = pnand %p8404_p6, %p8398_p3 }
  0x16   :  { %8408 = shalt.err (!%p8405_p7)
}
  0x17   :  { %56 = dma.hbm_to_vmem [thread:$0]  %s10036_s5, 64, %s54_s22, [#allocation6]  }
  0x18   :  { %s8409_s23 = scalar_lea.hbm %s10038_s7, 8192 }
  0x19   :  { %p8410_p8 = scmp.ne.s32.totalorder %s10038_s7, %s8409_s23  ;;  %p8413_p9 = scmp.lt.u32.totalorder %s8409_s23, %s10038_s7 }
  0x1b   :  { %p8415_p10 = pnand %p8413_p9, %p8410_p8 }
  0x1d   :  { %8418 = shalt.err (!%p8415_p10)
}
  0x1e   :  { %s8419_s29 = scalar_lea.vmem %s8698_s24, 8192  ;;  %p8424_p12 = scmp.lt.s32.totalorder %s8698_s24, %s8698_s24 }
  0x1f   :  { %p8420_p11 = scmp.ne.s32.totalorder %s8698_s24, %s8419_s29  ;;  %p8425_p13 = scmp.lt.s32.totalorder %s8419_s29, %s8419_s29 }
  0x21   :  { %p8426_p0 = por %p8425_p13, %p8424_p12 }
  0x23   :  { %p8427_p1 = pnand %p8426_p0, %p8420_p11 }
  0x25   :  { %8430 = shalt.err (!%p8427_p1)
}
  0x26   :  { %s8599_s5 = smov 512   ;;  %s8600_s22 = smov 32  }
  0x27   :  { %80 = dma.hbm_to_vmem [thread:$0]  %s10038_s7, 8192, %s8698_s24, [#allocation9], %s8599_s5, %s8599_s5, %s8600_s22  }
  0x28   :  { %s8601_s17 = smov [#allocation11]   ;;  %s8602_s19 = smov [#allocation2]  }
  0x29   :  { %s99_s18 = sshll.u32 %s8601_s17, 4  ;;  %s40_s20 = sshll.u32 %s8602_s19, 4  ;;  %s100_s18 = int_to_ptr.vmem [resolvable:$true] %s99_s18  ;;  %s8729_s20 = int_to_ptr.vmem [resolvable:$true] %s40_s20 }
  0x2a   :  { %s8431_s25 = scalar_lea.hbm %s10041_s10, 64 }
  0x2b   :  { %p8432_p2 = scmp.ne.s32.totalorder %s10041_s10, %s8431_s25  ;;  %p8435_p3 = scmp.lt.u32.totalorder %s8431_s25, %s10041_s10 }
  0x2d   :  { %p8437_p4 = pnand %p8435_p3, %p8432_p2 }
  0x2f   :  { %8440 = shalt.err (!%p8437_p4)
}
  0x30   :  { %s8441_s7 = scalar_lea.vmem %s100_s18, 64  ;;  %p8446_p6 = scmp.lt.s32.totalorder %s100_s18, %s100_s18 }
  0x31   :  { %p8442_p5 = scmp.ne.s32.totalorder %s100_s18, %s8441_s7  ;;  %p8447_p7 = scmp.lt.s32.totalorder %s8441_s7, %s8441_s7 }
  0x33   :  { %p8448_p8 = por %p8447_p7, %p8446_p6 }
  0x35   :  { %p8449_p9 = pnand %p8448_p8, %p8442_p5 }
  0x37   :  { %8452 = shalt.err (!%p8449_p9)
}
  0x38   :  { %102 = dma.hbm_to_vmem [thread:$0]  %s10041_s10, 64, %s100_s18, [#allocation12]  }
  0x39   :  { %s8453_s0 = scalar_lea.hbm %s10035_s4, 16384 }
  0x3a   :  { %p8454_p10 = scmp.ne.s32.totalorder %s10035_s4, %s8453_s0  ;;  %p8457_p11 = scmp.lt.u32.totalorder %s8453_s0, %s10035_s4 }
  0x3c   :  { %p8459_p12 = pnand %p8457_p11, %p8454_p10 }
  0x3e   :  { %8462 = shalt.err (!%p8459_p12)
}
  0x3f   :  { %s8463_s25 = scalar_lea.vmem %s8729_s20, 16384  ;;  %p8468_p0 = scmp.lt.s32.totalorder %s8729_s20, %s8729_s20 }
  0x40   :  { %p8464_p13 = scmp.ne.s32.totalorder %s8729_s20, %s8463_s25  ;;  %p8469_p1 = scmp.lt.s32.totalorder %s8463_s25, %s8463_s25 }
  0x42   :  { %p8470_p2 = por %p8469_p1, %p8468_p0 }
  0x44   :  { %p8471_p3 = pnand %p8470_p2, %p8464_p13 }
  0x46   :  { %8474 = shalt.err (!%p8471_p3)
}
  0x47   :  { %s8603_s10 = smov 256   ;;  %s8604_s18 = smov 16  }
  0x48   :  { %46 = dma.hbm_to_vmem [thread:$0]  %s10035_s4, 16384, %s8729_s20, [#allocation3], %s8603_s10, %s8603_s10, %s8604_s18  }
  0x49   :  { %s8605_s28 = smov [#allocation7]   ;;  %s8606_s7 = smov [#allocation10]  }
  0x4a   :  { %s62_s29 = sshll.u32 %s8605_s28, 4  ;;  %s87_s24 = sshll.u32 %s8606_s7, 4  ;;  %s63_s29 = int_to_ptr.vmem [resolvable:$true] %s62_s29  ;;  %s88_s24 = int_to_ptr.vmem [resolvable:$true] %s87_s24 }
  0x4b   :  { %s8475_s30 = scalar_lea.hbm %s10037_s6, 16384 }
  0x4c   :  { %p8476_p4 = scmp.ne.s32.totalorder %s10037_s6, %s8475_s30  ;;  %p8479_p5 = scmp.lt.u32.totalorder %s8475_s30, %s10037_s6 }
  0x4e   :  { %p8481_p6 = pnand %p8479_p5, %p8476_p4 }
  0x50   :  { %8484 = shalt.err (!%p8481_p6)
}
  0x51   :  { %s8485_s4 = scalar_lea.vmem %s63_s29, 16384  ;;  %p8490_p8 = scmp.lt.s32.totalorder %s63_s29, %s63_s29 }
  0x52   :  { %p8486_p7 = scmp.ne.s32.totalorder %s63_s29, %s8485_s4  ;;  %p8491_p9 = scmp.lt.s32.totalorder %s8485_s4, %s8485_s4 }
  0x54   :  { %p8492_p10 = por %p8491_p9, %p8490_p8 }
  0x56   :  { %p8493_p11 = pnand %p8492_p10, %p8486_p7 }
  0x58   :  { %8496 = shalt.err (!%p8493_p11)
}
  0x59   :  { %68 = dma.hbm_to_vmem [thread:$0]  %s10037_s6, 16384, %s63_s29, [#allocation6], %s8603_s10, %s8603_s10, %s8604_s18  }
  0x5a   :  { %s8497_s27 = scalar_lea.hbm %s10039_s8, 64 }
  0x5b   :  { %p8498_p12 = scmp.ne.s32.totalorder %s10039_s8, %s8497_s27  ;;  %p8501_p13 = scmp.lt.u32.totalorder %s8497_s27, %s10039_s8 }
  0x5d   :  { %p8503_p0 = pnand %p8501_p13, %p8498_p12 }
  0x5f   :  { %8506 = shalt.err (!%p8503_p0)
}
  0x60   :  { %s8507_s30 = scalar_lea.vmem %s88_s24, 64  ;;  %p8512_p2 = scmp.lt.s32.totalorder %s88_s24, %s88_s24 }
  0x61   :  { %p8508_p1 = scmp.ne.s32.totalorder %s88_s24, %s8507_s30  ;;  %p8513_p3 = scmp.lt.s32.totalorder %s8507_s30, %s8507_s30 }
  0x63   :  { %p8514_p4 = por %p8513_p3, %p8512_p2 }
  0x65   :  { %p8515_p5 = pnand %p8514_p4, %p8508_p1 }
  0x67   :  { %8518 = shalt.err (!%p8515_p5)
}
  0x68   :  { %90 = dma.hbm_to_vmem [thread:$0]  %s10039_s8, 64, %s88_s24, [#allocation9]  }
  0x69   :  { %s8607_s18 = smov [#allocation13]   ;;  %s8608_s0 = smov [#allocation14]  }
  0x6a   :  { %s113_s29 = sshll.u32 %s8607_s18, 4  ;;  %s125_s17 = sshll.u32 %s8608_s0, 4  ;;  %s114_s29 = int_to_ptr.vmem [resolvable:$true] %s113_s29  ;;  %s126_s17 = int_to_ptr.vmem [resolvable:$true] %s125_s17 }
  0x6b   :  { %s8519_s4 = scalar_lea.hbm %s10044_s13, 16 }
  0x6c   :  { %p8520_p6 = scmp.ne.s32.totalorder %s10044_s13, %s8519_s4  ;;  %p8523_p7 = scmp.lt.u32.totalorder %s8519_s4, %s10044_s13 }
  0x6e   :  { %p8525_p8 = pnand %p8523_p7, %p8520_p6 }
  0x70   :  { %8528 = shalt.err (!%p8525_p8)
}
  0x71   :  { %s8529_s8 = scalar_lea.vmem %s114_s29, 16  ;;  %s8533_s24 = scalar_lea.vmem %s114_s29, 32 }
  0x72   :  { %p8530_p9 = scmp.ne.s32.totalorder %s114_s29, %s8529_s8  ;;  %p8534_p10 = scmp.lt.s32.totalorder %s114_s29, %s114_s29 }
  0x73   :  { %p8535_p11 = scmp.lt.s32.totalorder %s8533_s24, %s8529_s8 }
  0x75   :  { %p8536_p12 = por %p8535_p11, %p8534_p10 }
  0x77   :  { %p8537_p13 = pnand %p8536_p12, %p8530_p9 }
  0x79   :  { %8540 = shalt.err (!%p8537_p13)
}
  0x7a   :  { %116 = dma.hbm_to_vmem [thread:$0]  %s10044_s13, 16, %s114_s29, [#allocation12]  }
  0x7b   :  { %s8541_s22 = scalar_lea.hbm %s10046_s15, 16 }
  0x7c   :  { %p8542_p0 = scmp.ne.s32.totalorder %s10046_s15, %s8541_s22  ;;  %p8545_p1 = scmp.lt.u32.totalorder %s8541_s22, %s10046_s15 }
  0x7e   :  { %p8547_p2 = pnand %p8545_p1, %p8542_p0 }
  0x80   :  { %8550 = shalt.err (!%p8547_p2)
}
  0x81   :  { %s8551_s0 = scalar_lea.vmem %s126_s17, 16  ;;  %s8555_s19 = scalar_lea.vmem %s126_s17, 32 }
  0x82   :  { %p8552_p3 = scmp.ne.s32.totalorder %s126_s17, %s8551_s0  ;;  %p8556_p4 = scmp.lt.s32.totalorder %s126_s17, %s126_s17 }
  0x83   :  { %p8557_p5 = scmp.lt.s32.totalorder %s8555_s19, %s8551_s0 }
  0x85   :  { %p8558_p6 = por %p8557_p5, %p8556_p4 }
  0x87   :  { %p8559_p7 = pnand %p8558_p6, %p8552_p3 }
  0x89   :  { %8562 = shalt.err (!%p8559_p7)
}
  0x8a   :  { %128 = dma.hbm_to_vmem [thread:$0]  %s10046_s15, 16, %s126_s17, [#allocation15]  }
  0x8b   :  { %8585 = dma.done.wait [#allocation3], 16384  }
  0x8c   :  { %8586 = vsyncadd [#allocation3], 4294950912 }
  0x8d   :  { %8587 = dma.done.wait [#allocation6], 16448  }
  0x8e   :  { %8588 = vsyncadd [#allocation6], 4294950848 }
  0x8f   :  { %8589 = dma.done.wait [#allocation9], 8256  }
  0x90   :  { %8590 = vsyncadd [#allocation9], 4294959040 }
  0x91   :  { %8591 = dma.done.wait [#allocation12], 80  }
  0x92   :  { %8592 = vsyncadd [#allocation12], 4294967216 }
  0x93   :  { %8593 = dma.done.wait [#allocation15], 16  }
  0x94   :  { %8594 = vsyncadd [#allocation15], 4294967280  ;;  %v7558_v0 = vld [vmem:[%s10033_s2 + $0x4] ss:$16 sps:$4 sm:$0xff]   ;;  %v7560_v1 = vld [vmem:[%s10033_s2] ss:$16 sps:$4 sm:$0xff]   ;;  %v160_v31 = vlaneseq }
  0x95   :  { %879 = vmatprep.subr.bf16.mxu0 %v7558_v0  ;;  %v7561_v2 = vld [vmem:[%s10033_s2 + $0x24] ss:$16 sps:$4 sm:$0xff]   ;;  %v7563_v3 = vld [vmem:[%s10033_s2 + $0x20] ss:$16 sps:$4 sm:$0xff]   ;;  %v7570_v5 = vld [vmem:[%s10033_s2 + $0xc] ss:$16 sps:$4 sm:$0xff]  }
  0x96   :  { %880 = vmatpush1.bf16.msra.mxu0 %v7560_v1  ;;  %v7564_v4 = vld [vmem:[%s10033_s2 + $0x44] ss:$16 sps:$4 sm:$0xff]   ;;  %v7572_v6 = vld [vmem:[%s10033_s2 + $0x8] ss:$16 sps:$4 sm:$0xff]   ;;  %v7566_v7 = vld [vmem:[%s10033_s2 + $0x40] ss:$16 sps:$4 sm:$0xff]   ;;  %961 = vmatprep.subr.bf16.mxu1 %v7570_v5 }
  0x97   :  { %881 = vmatprep.subr.bf16.mxu0 %v7561_v2  ;;  %v7567_v8 = vld [vmem:[%s10033_s2 + $0x64] ss:$16 sps:$4 sm:$0xff]   ;;  %v7576_v9 = vld [vmem:[%s10033_s2 + $0x2c] ss:$16 sps:$4 sm:$0xff]   ;;  %962 = vmatpush1.bf16.msra.mxu1 %v7572_v6  ;;  %v7578_v10 = vld [vmem:[%s10033_s2 + $0x28] ss:$16 sps:$4 sm:$0xff]  }
  0x98   :  { %963 = vmatprep.subr.bf16.mxu1 %v7576_v9  ;;  %v7569_v11 = vld [vmem:[%s10033_s2 + $0x60] ss:$16 sps:$4 sm:$0xff]   ;;  %v7582_v12 = vld [vmem:[%s10033_s2 + $0x4c] ss:$16 sps:$4 sm:$0xff]   ;;  %v7573_v13 = vld [vmem:[%s10033_s2 + $0x84] ss:$16 sps:$4 sm:$0xff]  }
  0x99   :  { %v7584_v14 = vld [vmem:[%s10033_s2 + $0x48] ss:$16 sps:$4 sm:$0xff]   ;;  %v7588_v15 = vld [vmem:[%s10033_s2 + $0x6c] ss:$16 sps:$4 sm:$0xff]   ;;  %v7575_v16 = vld [vmem:[%s10033_s2 + $0x80] ss:$16 sps:$4 sm:$0xff]  }
  0x9a   :  { %882 = vmatpush1.bf16.msra.mxu0 %v7563_v3  ;;  %v7579_v17 = vld [vmem:[%s10033_s2 + $0xa4] ss:$16 sps:$4 sm:$0xff]   ;;  %v7590_v18 = vld [vmem:[%s10033_s2 + $0x68] ss:$16 sps:$4 sm:$0xff]   ;;  %v7594_v19 = vld [vmem:[%s10033_s2 + $0x8c] ss:$16 sps:$4 sm:$0xff]  }
  0x9b   :  { %883 = vmatprep.subr.bf16.mxu0 %v7564_v4  ;;  %964 = vmatpush1.bf16.msra.mxu1 %v7578_v10  ;;  %v7581_v20 = vld [vmem:[%s10033_s2 + $0xa0] ss:$16 sps:$4 sm:$0xff]   ;;  %v7585_v21 = vld [vmem:[%s10033_s2 + $0xc4] ss:$16 sps:$4 sm:$0xff]   ;;  %v7596_v22 = vld [vmem:[%s10033_s2 + $0x88] ss:$16 sps:$4 sm:$0xff]  }
  0x9c   :  { %965 = vmatprep.subr.bf16.mxu1 %v7582_v12  ;;  %v7600_v23 = vld [vmem:[%s10033_s2 + $0xac] ss:$16 sps:$4 sm:$0xff]   ;;  %v7587_v24 = vld [vmem:[%s10033_s2 + $0xc0] ss:$16 sps:$4 sm:$0xff]   ;;  %v7591_v25 = vld [vmem:[%s10033_s2 + $0xe4] ss:$16 sps:$4 sm:$0xff]  }
  0x9d   :  { %v7602_v26 = vld [vmem:[%s10033_s2 + $0xa8] ss:$16 sps:$4 sm:$0xff]   ;;  %v7606_v27 = vld [vmem:[%s10033_s2 + $0xcc] ss:$16 sps:$4 sm:$0xff]   ;;  %v7593_v28 = vld [vmem:[%s10033_s2 + $0xe0] ss:$16 sps:$4 sm:$0xff]  }
  0x9e   :  { %884 = vmatpush1.bf16.msra.mxu0 %v7566_v7  ;;  %v8609_v29 = vmov 1983009808   ;;  %v7597_v32 = vld [vmem:[%s10033_s2 + $0x104] ss:$16 sps:$4 sm:$0xff]   ;;  %v7608_v33 = vld [vmem:[%s10033_s2 + $0xc8] ss:$16 sps:$4 sm:$0xff]  }
  0x9f   :  { %885 = vmatprep.subr.bf16.mxu0 %v7567_v8  ;;  %966 = vmatpush1.bf16.msra.mxu1 %v7584_v14  ;;  %v158_v30 = vunpack.c.l.s4 %v8609_v29  ;;  %v7612_v34 = vld [vmem:[%s10033_s2 + $0xec] ss:$16 sps:$4 sm:$0xff]   ;;  %v7599_v35 = vld [vmem:[%s10033_s2 + $0x100] ss:$16 sps:$4 sm:$0xff]   ;;  %v8907_v37 = vshrl.u32 %v160_v31, 7  ;;  %s10049_s5 = sld [smem:[#allocation23_spill]] }
  0xa0   :  { %967 = vmatprep.subr.bf16.mxu1 %v7588_v15  ;;  %v7603_v38 = vld [vmem:[%s10033_s2 + $0x124] ss:$16 sps:$4 sm:$0xff]   ;;  %v7614_v39 = vld [vmem:[%s10033_s2 + $0xe8] ss:$16 sps:$4 sm:$0xff]   ;;  %v7618_v40 = vld [vmem:[%s10033_s2 + $0x10c] ss:$16 sps:$4 sm:$0xff]  }
  0xa1   :  { %v159_v36 = vunpack.c.0.s8 %v158_v30  ;;  %v7605_v41 = vld [vmem:[%s10033_s2 + $0x120] ss:$16 sps:$4 sm:$0xff]   ;;  %v7609_v43 = vld [vmem:[%s10033_s2 + $0x144] ss:$16 sps:$4 sm:$0xff]   ;;  %v7620_v44 = vld [vmem:[%s10033_s2 + $0x108] ss:$16 sps:$4 sm:$0xff]  }
  0xa2   :  { %886 = vmatpush1.bf16.msra.mxu0 %v7569_v11  ;;  %v7624_v45 = vld [vmem:[%s10033_s2 + $0x12c] ss:$16 sps:$4 sm:$0xff]   ;;  %v7611_v47 = vld [vmem:[%s10033_s2 + $0x140] ss:$16 sps:$4 sm:$0xff]   ;;  %v7615_v49 = vld [vmem:[%s10033_s2 + $0x164] ss:$16 sps:$4 sm:$0xff]  }
  0xa3   :  { %887 = vmatprep.subr.bf16.mxu0 %v7573_v13  ;;  %968 = vmatpush1.bf16.msra.mxu1 %v7590_v18  ;;  %v162_v42 = vsub.s32 %v159_v36, %v8907_v37  ;;  %v7626_v50 = vld [vmem:[%s10033_s2 + $0x128] ss:$16 sps:$4 sm:$0xff]   ;;  %v7630_v52 = vld [vmem:[%s10033_s2 + $0x14c] ss:$16 sps:$4 sm:$0xff]   ;;  %v7617_v53 = vld [vmem:[%s10033_s2 + $0x160] ss:$16 sps:$4 sm:$0xff]  }
  0xa4   :  { %969 = vmatprep.subr.bf16.mxu1 %v7594_v19  ;;  %v7621_v55 = vld [vmem:[%s10033_s2 + $0x184] ss:$16 sps:$4 sm:$0xff]   ;;  %v7632_v56 = vld [vmem:[%s10033_s2 + $0x148] ss:$16 sps:$4 sm:$0xff]   ;;  %v7636_v57 = vld [vmem:[%s10033_s2 + $0x16c] ss:$16 sps:$4 sm:$0xff]  }
  0xa5   :  { %v154_v46 = vld [vmem:[%s10049_s5] sm:$0xff]  ;;  %v7638_v60 = vld [vmem:[%s10033_s2 + $0x168] ss:$16 sps:$4 sm:$0xff]   ;;  %v7642_v61 = vld [vmem:[%s10033_s2 + $0x18c] ss:$16 sps:$4 sm:$0xff]   ;;  %vm875_vm0 = vcmask 523264  }
  0xa6   :  { %888 = vmatpush1.bf16.msra.mxu0 %v7575_v16  ;;  %v163_v48 = vrot.slane %v154_v46, %v162_v42  ;;  %v7623_v58 = vld [vmem:[%s10033_s2 + $0x180] ss:$16 sps:$4 sm:$0xff]   ;;  %v7627_v59 = vld [vmem:[%s10033_s2 + $0x1a4] ss:$16 sps:$4 sm:$0xff]   ;;  %v156_v63 = vcombine.high %v154_v46, %v154_v46  ;;  %v7644_v1 = vld [vmem:[%s10033_s2 + $0x188] ss:$16 sps:$4 sm:$0xff]  }
  0xa7   :  { %889 = vmatprep.subr.bf16.mxu0 %v7579_v17  ;;  %970 = vmatpush1.bf16.msra.mxu1 %v7596_v22  ;;  %v7629_v62 = vld [vmem:[%s10033_s2 + $0x1a0] ss:$16 sps:$4 sm:$0xff]   ;;  %v7633_v0 = vld [vmem:[%s10033_s2 + $0x1c4] ss:$16 sps:$4 sm:$0xff]   ;;  %v7649_v2 = vld [vmem:[%s10033_s2 + $0x1ac] ss:$16 sps:$4 sm:$0xff]  }
  0xa8   :  { %971 = vmatprep.subr.bf16.mxu1 %v7600_v23  ;;  %v171_v51 = vcombine.high %v163_v48, %v163_v48  ;;  %v7635_v3 = vld [vmem:[%s10033_s2 + $0x1c0] ss:$16 sps:$4 sm:$0xff]   ;;  %v8985_v4 = vrot.slane %v156_v63, %v162_v42  ;;  %v7639_v5 = vld [vmem:[%s10033_s2 + $0x1e4] ss:$16 sps:$4 sm:$0xff]   ;;  %v7651_v6 = vld [vmem:[%s10033_s2 + $0x1a8] ss:$16 sps:$4 sm:$0xff]   ;;  %v177_v12 = vpack.c.bf16 %v163_v48, %v163_v48 }
  0xa9   :  { %v7655_v7 = vld [vmem:[%s10033_s2 + $0x1cc] ss:$16 sps:$4 sm:$0xff]   ;;  %v7641_v8 = vld [vmem:[%s10033_s2 + $0x1e0] ss:$16 sps:$4 sm:$0xff]   ;;  %v7648_v10 = vld [vmem:[%s10033_s2 + $0x204] ss:$16 sps:$4 sm:$0xff]  }
  0xaa   :  { %890 = vmatpush1.bf16.msra.mxu0 %v7581_v20  ;;  %v178_v54 = vpack.c.bf16 %v171_v51, %v171_v51  ;;  %v172_v9 = vcombine.high %v8985_v4, %v8985_v4  ;;  %v7657_v11 = vld [vmem:[%s10033_s2 + $0x1c8] ss:$16 sps:$4 sm:$0xff]   ;;  %v7661_v13 = vld [vmem:[%s10033_s2 + $0x1ec] ss:$16 sps:$4 sm:$0xff]   ;;  %v7646_v14 = vld [vmem:[%s10033_s2 + $0x200] ss:$16 sps:$4 sm:$0xff]   ;;  %v179_v63 = vpack.c.bf16 %v8985_v4, %v8985_v4 }
  0xab   :  { %891 = vmatprep.subr.bf16.mxu0 %v7585_v21  ;;  %972 = vmatpush1.bf16.msra.mxu1 %v7602_v26  ;;  %v7654_v16 = vld [vmem:[%s10033_s2 + $0x224] ss:$16 sps:$4 sm:$0xff]   ;;  %v7663_v17 = vld [vmem:[%s10033_s2 + $0x1e8] ss:$16 sps:$4 sm:$0xff]   ;;  %v7669_v18 = vld [vmem:[%s10033_s2 + $0x20c] ss:$16 sps:$4 sm:$0xff]  }
  0xac   :  { %973 = vmatprep.subr.bf16.mxu1 %v7606_v27  ;;  %911 = vmatprep.mubr.bf16.mxu0 %v178_v54  ;;  %v180_v15 = vpack.c.bf16 %v172_v9, %v172_v9  ;;  %v7652_v19 = vld [vmem:[%s10033_s2 + $0x220] ss:$16 sps:$4 sm:$0xff]   ;;  %v7660_v20 = vld [vmem:[%s10033_s2 + $0x244] ss:$16 sps:$4 sm:$0xff]   ;;  %v7667_v21 = vld [vmem:[%s10033_s2 + $0x208] ss:$16 sps:$4 sm:$0xff]  }
  0xad   :  { %993 = vmatprep.mubr.bf16.mxu1 %v178_v54  ;;  %v7675_v22 = vld [vmem:[%s10033_s2 + $0x22c] ss:$16 sps:$4 sm:$0xff]   ;;  %v7658_v23 = vld [vmem:[%s10033_s2 + $0x240] ss:$16 sps:$4 sm:$0xff]   ;;  %v7679_v29 = vld [vmem:[%s10033_s2 + $0x248] ss:$16 sps:$4 sm:$0xff]  }
  0xae   :  { %892 = vmatpush1.bf16.msra.mxu0 %v7587_v24  ;;  %v7666_v24 = vld [vmem:[%s10033_s2 + $0x264] ss:$16 sps:$4 sm:$0xff]   ;;  %v7681_v26 = vld [vmem:[%s10033_s2 + $0x24c] ss:$16 sps:$4 sm:$0xff]   ;;  %v7664_v27 = vld [vmem:[%s10033_s2 + $0x260] ss:$16 sps:$4 sm:$0xff]  }
  0xaf   :  { %893 = vmatprep.subr.bf16.mxu0 %v7591_v25  ;;  %974 = vmatpush1.bf16.msra.mxu1 %v7608_v33  ;;  %v7673_v25 = vld [vmem:[%s10033_s2 + $0x228] ss:$16 sps:$4 sm:$0xff]   ;;  %v7687_v30 = vld [vmem:[%s10033_s2 + $0x26c] ss:$16 sps:$4 sm:$0xff]   ;;  %v7670_v31 = vld [vmem:[%s10033_s2 + $0x280] ss:$16 sps:$4 sm:$0xff]  }
  0xb0   :  { %975 = vmatprep.subr.bf16.mxu1 %v7612_v34  ;;  %v7685_v33 = vld [vmem:[%s10033_s2 + $0x268] ss:$16 sps:$4 sm:$0xff]   ;;  %v7693_v34 = vld [vmem:[%s10033_s2 + $0x28c] ss:$16 sps:$4 sm:$0xff]   ;;  %v7684_v36 = vld [vmem:[%s10033_s2 + $0x2c4] ss:$16 sps:$4 sm:$0xff]  }
  0xb1   :  { %v7697_v42 = vld [vmem:[%s10033_s2 + $0x2a8] ss:$16 sps:$4 sm:$0xff]   ;;  %v7694_v48 = vld [vmem:[%s10033_s2 + $0x300] ss:$16 sps:$4 sm:$0xff]   ;;  %v7717_v51 = vld [vmem:[%s10033_s2 + $0x30c] ss:$16 sps:$4 sm:$0xff]  }
  0xb2   :  { %894 = vmatpush1.bf16.msra.mxu0 %v7593_v28  ;;  %v7672_v28 = vld [vmem:[%s10033_s2 + $0x284] ss:$16 sps:$4 sm:$0xff]   ;;  %v7703_v46 = vld [vmem:[%s10033_s2 + $0x2c8] ss:$16 sps:$4 sm:$0xff]   ;;  %v7739_v9 = vld [vmem:[#allocation2 + $0x40] ss:$16 sps:$4 sm:$0xff]  }
  0xb3   :  { %895 = vmatprep.subr.bf16.mxu0 %v7597_v32  ;;  %976 = vmatpush1.bf16.msra.mxu1 %v7614_v39  ;;  %v7678_v32 = vld [vmem:[%s10033_s2 + $0x2a4] ss:$16 sps:$4 sm:$0xff]   ;;  %v7699_v39 = vld [vmem:[%s10033_s2 + $0x2ac] ss:$16 sps:$4 sm:$0xff]   ;;  %v7715_v54 = vld [vmem:[%s10033_s2 + $0x308] ss:$16 sps:$4 sm:$0xff]  }
  0xb4   :  { %977 = vmatprep.subr.bf16.mxu1 %v7618_v40  ;;  %v7682_v40 = vld [vmem:[%s10033_s2 + $0x2c0] ss:$16 sps:$4 sm:$0xff]   ;;  %v7730_v4 = vld [vmem:[#allocation2 + $0x8] ss:$16 sps:$4 sm:$0xff]   ;;  %vm5621_vm1 = vcmask 1043456   ;;  %vm8611_vm2 = vmmov 0  }
  0xb5   :  { %vm5617_vm3 = vcmask 64512   ;;  %vm5985_vm4 = vcmask 123904  }
  0xb6   :  { %896 = vmatpush1.bf16.msra.mxu0 %v7599_v35  ;;  %v7676_v35 = vld [vmem:[%s10033_s2 + $0x2a0] ss:$16 sps:$4 sm:$0xff]  }
  0xb7   :  { %897 = vmatprep.subr.bf16.mxu0 %v7603_v38  ;;  %978 = vmatpush1.bf16.msra.mxu1 %v7620_v44  ;;  %v7691_v38 = vld [vmem:[%s10033_s2 + $0x288] ss:$16 sps:$4 sm:$0xff]   ;;  %v7688_v44 = vld [vmem:[%s10033_s2 + $0x2e0] ss:$16 sps:$4 sm:$0xff]  }
  0xb8   :  { %979 = vmatprep.subr.bf16.mxu1 %v7624_v45  ;;  %v7696_v45 = vld [vmem:[%s10033_s2 + $0x304] ss:$16 sps:$4 sm:$0xff]  }
  0xba   :  { %898 = vmatpush1.bf16.msra.mxu0 %v7605_v41  ;;  %v7690_v41 = vld [vmem:[%s10033_s2 + $0x2e4] ss:$16 sps:$4 sm:$0xff]  }
  0xbb   :  { %899 = vmatprep.subr.bf16.mxu0 %v7609_v43  ;;  %980 = vmatpush1.bf16.msra.mxu1 %v7626_v50  ;;  %v7705_v43 = vld [vmem:[%s10033_s2 + $0x2cc] ss:$16 sps:$4 sm:$0xff]   ;;  %v7709_v50 = vld [vmem:[%s10033_s2 + $0x2e8] ss:$16 sps:$4 sm:$0xff]  }
  0xbc   :  { %981 = vmatprep.subr.bf16.mxu1 %v7630_v52  ;;  %v7700_v52 = vld [vmem:[%s10033_s2 + $0x320] ss:$16 sps:$4 sm:$0xff]  }
  0xbe   :  { %900 = vmatpush1.bf16.msra.mxu0 %v7611_v47  ;;  %v7711_v47 = vld [vmem:[%s10033_s2 + $0x2ec] ss:$16 sps:$4 sm:$0xff]  }
  0xbf   :  { %901 = vmatprep.subr.bf16.mxu0 %v7615_v49  ;;  %982 = vmatpush1.bf16.msra.mxu1 %v7632_v56  ;;  %v7702_v49 = vld [vmem:[%s10033_s2 + $0x324] ss:$16 sps:$4 sm:$0xff]   ;;  %v7706_v56 = vld [vmem:[%s10033_s2 + $0x340] ss:$16 sps:$4 sm:$0xff]  }
  0xc0   :  { %983 = vmatprep.subr.bf16.mxu1 %v7636_v57  ;;  %v7714_v57 = vld [vmem:[%s10033_s2 + $0x364] ss:$16 sps:$4 sm:$0xff]  }
  0xc2   :  { %902 = vmatpush1.bf16.msra.mxu0 %v7617_v53  ;;  %v7708_v53 = vld [vmem:[%s10033_s2 + $0x344] ss:$16 sps:$4 sm:$0xff]  }
  0xc3   :  { %903 = vmatprep.subr.bf16.mxu0 %v7621_v55  ;;  %984 = vmatpush1.bf16.msra.mxu1 %v7638_v60  ;;  %v7720_v55 = vld [vmem:[%s10033_s2 + $0x32c] ss:$16 sps:$4 sm:$0xff]   ;;  %v7712_v60 = vld [vmem:[%s10033_s2 + $0x360] ss:$16 sps:$4 sm:$0xff]  }
  0xc4   :  { %985 = vmatprep.subr.bf16.mxu1 %v7642_v61  ;;  %v7729_v61 = vld [vmem:[#allocation2 + $0x4] ss:$16 sps:$4 sm:$0xff]  }
  0xc6   :  { %904 = vmatpush1.bf16.msra.mxu0 %v7623_v58  ;;  %v7718_v58 = vld [vmem:[%s10033_s2 + $0x328] ss:$16 sps:$4 sm:$0xff]  }
  0xc7   :  { %905 = vmatprep.subr.bf16.mxu0 %v7627_v59  ;;  %986 = vmatpush1.bf16.msra.mxu1 %v7644_v1  ;;  %v7723_v59 = vld [vmem:[%s10033_s2 + $0x34c] ss:$16 sps:$4 sm:$0xff]   ;;  %v7724_v1 = vld [vmem:[%s10033_s2 + $0x368] ss:$16 sps:$4 sm:$0xff]  }
  0xc8   :  { %987 = vmatprep.subr.bf16.mxu1 %v7649_v2  ;;  %v7727_v2 = vld [vmem:[#allocation2] ss:$16 sps:$4 sm:$0xff]  }
  0xca   :  { %906 = vmatpush1.bf16.msra.mxu0 %v7629_v62  ;;  %v7721_v62 = vld [vmem:[%s10033_s2 + $0x348] ss:$16 sps:$4 sm:$0xff]  }
  0xcb   :  { %907 = vmatprep.subr.bf16.mxu0 %v7633_v0  ;;  %988 = vmatpush1.bf16.msra.mxu1 %v7651_v6  ;;  %v7726_v0 = vld [vmem:[%s10033_s2 + $0x36c] ss:$16 sps:$4 sm:$0xff]   ;;  %v7733_v6 = vld [vmem:[#allocation2 + $0x20] ss:$16 sps:$4 sm:$0xff]  }
  0xcc   :  { %989 = vmatprep.subr.bf16.mxu1 %v7655_v7  ;;  %v7741_v7 = vld [vmem:[#allocation2 + $0x44] ss:$16 sps:$4 sm:$0xff]  }
  0xce   :  { %908 = vmatpush1.bf16.msra.mxu0 %v7635_v3  ;;  %v7732_v3 = vld [vmem:[#allocation2 + $0xc] ss:$16 sps:$4 sm:$0xff]  }
  0xcf   :  { %909 = vmatprep.subr.bf16.mxu0 %v7639_v5  ;;  %990 = vmatpush1.bf16.msra.mxu1 %v7657_v11  ;;  %v7735_v5 = vld [vmem:[#allocation2 + $0x24] ss:$16 sps:$4 sm:$0xff]   ;;  %v7736_v11 = vld [vmem:[#allocation2 + $0x28] ss:$16 sps:$4 sm:$0xff]  }
  0xd0   :  { %991 = vmatprep.subr.bf16.mxu1 %v7661_v13  ;;  %v7745_v13 = vld [vmem:[#allocation2 + $0x60] ss:$16 sps:$4 sm:$0xff]  }
  0xd2   :  { %910 = vmatpush1.bf16.msra.mxu0 %v7641_v8  ;;  %v7738_v8 = vld [vmem:[#allocation2 + $0x2c] ss:$16 sps:$4 sm:$0xff]  }
  0xd3   :  { %920 = vmatprep.subr.bf16.mxu0 %v7648_v10  ;;  %992 = vmatpush1.bf16.msra.mxu1 %v7663_v17  ;;  %v7747_v10 = vld [vmem:[#allocation2 + $0x64] ss:$16 sps:$4 sm:$0xff]   ;;  %v7751_v17 = vld [vmem:[#allocation2 + $0x80] ss:$16 sps:$4 sm:$0xff]  }
  0xd4   :  { %1002 = vmatprep.subr.bf16.mxu1 %v7669_v18  ;;  %v7759_v18 = vld [vmem:[#allocation2 + $0xa4] ss:$16 sps:$4 sm:$0xff]  }
  0xd5   :  { %912 = vmatmul.mubr.bf16.vlgmr.msra.gmra.mrb[0].mxu0 %v177_v12 }
  0xd6   :  { %921 = vmatpush1.bf16.msra.mxu0 %v7646_v14  ;;  %6118 = vmatprep.mubr.msk.bf16.mxu0 %vm875_vm0, %v180_v15  ;;  %v7753_v14 = vld [vmem:[#allocation2 + $0x84] ss:$16 sps:$4 sm:$0xff]  }
  0xd7   :  { %922 = vmatprep.subr.bf16.mxu0 %v7654_v16  ;;  %994 = vmatmul.mubr.bf16.vlgmr.msra.gmra.mrb[0].mxu1 %v177_v12  ;;  %v7744_v12 = vld [vmem:[#allocation2 + $0x4c] ss:$16 sps:$4 sm:$0xff]  }
  0xd8   :  { %1003 = vmatpush1.bf16.msra.mxu1 %v7667_v21  ;;  %6119 = vmatprep.mubr.msk.bf16.mxu1 %vm875_vm0, %v180_v15  ;;  %v7742_v15 = vld [vmem:[#allocation2 + $0x48] ss:$16 sps:$4 sm:$0xff]   ;;  %v7750_v16 = vld [vmem:[#allocation2 + $0x6c] ss:$16 sps:$4 sm:$0xff]   ;;  %v7757_v21 = vld [vmem:[#allocation2 + $0xa0] ss:$16 sps:$4 sm:$0xff]  }
  0xd9   :  { %1004 = vmatprep.subr.bf16.mxu1 %v7675_v22  ;;  %v7765_v22 = vld [vmem:[#allocation2 + $0xc4] ss:$16 sps:$4 sm:$0xff]  }
  0xda   :  { %923 = vmatpush1.bf16.msra.mxu0 %v7652_v19  ;;  %v7748_v19 = vld [vmem:[#allocation2 + $0x68] ss:$16 sps:$4 sm:$0xff]  }
  0xdb   :  { %924 = vmatprep.subr.bf16.mxu0 %v7660_v20  ;;  %v7756_v20 = vld [vmem:[#allocation2 + $0x8c] ss:$16 sps:$4 sm:$0xff]  }
  0xdc   :  { %1005 = vmatpush1.bf16.msra.mxu1 %v7673_v25  ;;  %v7763_v25 = vld [vmem:[#allocation2 + $0xc0] ss:$16 sps:$4 sm:$0xff]  }
  0xdd   :  { %1006 = vmatprep.subr.bf16.mxu1 %v7681_v26  ;;  %v7771_v26 = vld [vmem:[#allocation2 + $0xe4] ss:$16 sps:$4 sm:$0xff]  }
  0xde   :  { %925 = vmatpush1.bf16.msra.mxu0 %v7658_v23  ;;  %v7754_v23 = vld [vmem:[#allocation2 + $0x88] ss:$16 sps:$4 sm:$0xff]  }
  0xdf   :  { %926 = vmatprep.subr.bf16.mxu0 %v7666_v24  ;;  %v7762_v24 = vld [vmem:[#allocation2 + $0xac] ss:$16 sps:$4 sm:$0xff]  }
  0xe0   :  { %1007 = vmatpush1.bf16.msra.mxu1 %v7679_v29  ;;  %v7769_v29 = vld [vmem:[#allocation2 + $0xe0] ss:$16 sps:$4 sm:$0xff]  }
  0xe1   :  { %1008 = vmatprep.subr.bf16.mxu1 %v7687_v30  ;;  %v7777_v30 = vld [vmem:[#allocation2 + $0x104] ss:$16 sps:$4 sm:$0xff]  }
  0xe2   :  { %927 = vmatpush1.bf16.msra.mxu0 %v7664_v27  ;;  %v7760_v27 = vld [vmem:[#allocation2 + $0xa8] ss:$16 sps:$4 sm:$0xff]  }
  0xe3   :  { %928 = vmatprep.subr.bf16.mxu0 %v7672_v28  ;;  %v7768_v28 = vld [vmem:[#allocation2 + $0xcc] ss:$16 sps:$4 sm:$0xff]  }
  0xe4   :  { %1009 = vmatpush1.bf16.msra.mxu1 %v7685_v33  ;;  %v7775_v33 = vld [vmem:[#allocation2 + $0x100] ss:$16 sps:$4 sm:$0xff]  }
  0xe5   :  { %1010 = vmatprep.subr.bf16.mxu1 %v7693_v34  ;;  %v7783_v34 = vld [vmem:[#allocation2 + $0x124] ss:$16 sps:$4 sm:$0xff]  }
  0xe6   :  { %929 = vmatpush1.bf16.msra.mxu0 %v7670_v31  ;;  %v7766_v31 = vld [vmem:[#allocation2 + $0xc8] ss:$16 sps:$4 sm:$0xff]  }
  0xe7   :  { %930 = vmatprep.subr.bf16.mxu0 %v7678_v32  ;;  %v7774_v32 = vld [vmem:[#allocation2 + $0xec] ss:$16 sps:$4 sm:$0xff]  }
  0xe8   :  { %1011 = vmatpush1.bf16.msra.mxu1 %v7691_v38  ;;  %v7781_v38 = vld [vmem:[#allocation2 + $0x120] ss:$16 sps:$4 sm:$0xff]  }
  0xe9   :  { %1012 = vmatprep.subr.bf16.mxu1 %v7699_v39  ;;  %v7789_v39 = vld [vmem:[#allocation2 + $0x144] ss:$16 sps:$4 sm:$0xff]  }
  0xea   :  { %931 = vmatpush1.bf16.msra.mxu0 %v7676_v35  ;;  %v7772_v35 = vld [vmem:[#allocation2 + $0xe8] ss:$16 sps:$4 sm:$0xff]  }
  0xeb   :  { %932 = vmatprep.subr.bf16.mxu0 %v7684_v36  ;;  %v7780_v36 = vld [vmem:[#allocation2 + $0x10c] ss:$16 sps:$4 sm:$0xff]  }
  0xec   :  { %1013 = vmatpush1.bf16.msra.mxu1 %v7697_v42  ;;  %v7787_v42 = vld [vmem:[#allocation2 + $0x140] ss:$16 sps:$4 sm:$0xff]  }
  0xed   :  { %1014 = vmatprep.subr.bf16.mxu1 %v7705_v43  ;;  %v7795_v43 = vld [vmem:[#allocation2 + $0x164] ss:$16 sps:$4 sm:$0xff]  }
  0xee   :  { %933 = vmatpush1.bf16.msra.mxu0 %v7682_v40  ;;  %v7778_v40 = vld [vmem:[#allocation2 + $0x108] ss:$16 sps:$4 sm:$0xff]  }
  0xef   :  { %934 = vmatprep.subr.bf16.mxu0 %v7690_v41  ;;  %v7786_v41 = vld [vmem:[#allocation2 + $0x12c] ss:$16 sps:$4 sm:$0xff]  }
  0xf0   :  { %1015 = vmatpush1.bf16.msra.mxu1 %v7703_v46  ;;  %v7793_v46 = vld [vmem:[#allocation2 + $0x160] ss:$16 sps:$4 sm:$0xff]  }
  0xf1   :  { %1016 = vmatprep.subr.bf16.mxu1 %v7711_v47  ;;  %v7801_v47 = vld [vmem:[#allocation2 + $0x184] ss:$16 sps:$4 sm:$0xff]  }
  0xf2   :  { %935 = vmatpush1.bf16.msra.mxu0 %v7688_v44  ;;  %v7784_v44 = vld [vmem:[#allocation2 + $0x128] ss:$16 sps:$4 sm:$0xff]  }
  0xf3   :  { %936 = vmatprep.subr.bf16.mxu0 %v7696_v45  ;;  %v7792_v45 = vld [vmem:[#allocation2 + $0x14c] ss:$16 sps:$4 sm:$0xff]  }
  0xf4   :  { %1017 = vmatpush1.bf16.msra.mxu1 %v7709_v50  ;;  %v7799_v50 = vld [vmem:[#allocation2 + $0x180] ss:$16 sps:$4 sm:$0xff]  }
  0xf5   :  { %1018 = vmatprep.subr.bf16.mxu1 %v7717_v51  ;;  %v7807_v51 = vld [vmem:[#allocation2 + $0x1a4] ss:$16 sps:$4 sm:$0xff]  }
  0xf6   :  { %937 = vmatpush1.bf16.msra.mxu0 %v7694_v48  ;;  %v7790_v48 = vld [vmem:[#allocation2 + $0x148] ss:$16 sps:$4 sm:$0xff]  }
  0xf7   :  { %938 = vmatprep.subr.bf16.mxu0 %v7702_v49  ;;  %v7798_v49 = vld [vmem:[#allocation2 + $0x16c] ss:$16 sps:$4 sm:$0xff]  }
  0xf8   :  { %1019 = vmatpush1.bf16.msra.mxu1 %v7715_v54  ;;  %v7805_v54 = vld [vmem:[#allocation2 + $0x1a0] ss:$16 sps:$4 sm:$0xff]  }
  0xf9   :  { %1020 = vmatprep.subr.bf16.mxu1 %v7720_v55  ;;  %v7802_v55 = vld [vmem:[#allocation2 + $0x188] ss:$16 sps:$4 sm:$0xff]  }
  0xfa   :  { %939 = vmatpush1.bf16.msra.mxu0 %v7700_v52  ;;  %v7796_v52 = vld [vmem:[#allocation2 + $0x168] ss:$16 sps:$4 sm:$0xff]  }
  0xfb   :  { %940 = vmatprep.subr.bf16.mxu0 %v7708_v53  ;;  %v7804_v53 = vld [vmem:[#allocation2 + $0x18c] ss:$16 sps:$4 sm:$0xff]  }
  0xfc   :  { %1021 = vmatpush1.bf16.msra.mxu1 %v7718_v58  ;;  %v7813_v58 = vld [vmem:[#allocation2 + $0x1c4] ss:$16 sps:$4 sm:$0xff]  }
  0xfd   :  { %1022 = vmatprep.subr.bf16.mxu1 %v7723_v59  ;;  %v7816_v59 = vld [vmem:[#allocation2 + $0x1cc] ss:$16 sps:$4 sm:$0xff]  }
  0xfe   :  { %941 = vmatpush1.bf16.msra.mxu0 %v7706_v56  ;;  %v7810_v56 = vld [vmem:[#allocation2 + $0x1ac] ss:$16 sps:$4 sm:$0xff]  }
  0xff   :  { %942 = vmatprep.subr.bf16.mxu0 %v7714_v57  ;;  %v7808_v57 = vld [vmem:[#allocation2 + $0x1a8] ss:$16 sps:$4 sm:$0xff]  }
 0x100   :  { %1023 = vmatpush1.bf16.msra.mxu1 %v7721_v62  ;;  %v7819_v62 = vld [vmem:[#allocation2 + $0x1e4] ss:$16 sps:$4 sm:$0xff]  }
 0x101   :  { %1024 = vmatprep.subr.bf16.mxu1 %v7726_v0  ;;  %v7817_v0 = vld [vmem:[#allocation2 + $0x1e0] ss:$16 sps:$4 sm:$0xff]  }
 0x102   :  { %943 = vmatpush1.bf16.msra.mxu0 %v7712_v60  ;;  %v7811_v60 = vld [vmem:[#allocation2 + $0x1c0] ss:$16 sps:$4 sm:$0xff]  }
 0x103   :  { %1841 = vmatprep.subr.bf16.mxu0 %v7729_v61  ;;  %v7814_v61 = vld [vmem:[#allocation2 + $0x1c8] ss:$16 sps:$4 sm:$0xff]  }
 0x104   :  { %1025 = vmatpush1.bf16.msra.mxu1 %v7724_v1  ;;  %v7820_v1 = vld [vmem:[#allocation2 + $0x1e8] ss:$16 sps:$4 sm:$0xff]  }
 0x105   :  { %953 = vmatmul.mubr.bf16.vlgmr.msra.gmra.mrb[0].mxu0 %v179_v63  ;;  %1923 = vmatprep.subr.bf16.mxu1 %v7732_v3  ;;  %v7828_v3 = vld [vmem:[#allocation2 + $0x20c] ss:$16 sps:$4 sm:$0xff]  }
 0x106   :  { %1842 = vmatpush1.bf16.msra.mxu0 %v7727_v2  ;;  %v7825_v2 = vld [vmem:[#allocation2 + $0x204] ss:$16 sps:$4 sm:$0xff]  }
 0x107   :  { %1843 = vmatprep.subr.bf16.mxu0 %v7735_v5  ;;  %1035 = vmatmul.mubr.bf16.vlgmr.msra.gmra.mrb[0].mxu1 %v179_v63  ;;  %v7822_v63 = vld [vmem:[#allocation2 + $0x1ec] ss:$16 sps:$4 sm:$0xff]   ;;  %v9159_v5 = vsub.s32 0, %v8907_v37 }
 0x108   :  { %1924 = vmatpush1.bf16.msra.mxu1 %v7730_v4 }
 0x109   :  { %1925 = vmatprep.subr.bf16.mxu1 %v7738_v8 }
 0x10a   :  { %1844 = vmatpush1.bf16.msra.mxu0 %v7733_v6  ;;  %v9164_v6 = vld [vmem:[%s10034_s3] sm:$0xf] }
 0x10b   :  { %1845 = vmatprep.subr.bf16.mxu0 %v7741_v7  ;;  %v9167_v7 = vsub.s32 1, %v8907_v37  ;;  %v298_v4 = vrot.slane %v9164_v6, %v9159_v5 }
 0x10c   :  { %1926 = vmatpush1.bf16.msra.mxu1 %v7736_v11 }
 0x10d   :  { %1927 = vmatprep.subr.bf16.mxu1 %v7744_v12  ;;  %v302_v8 = vrot.slane %v9164_v6, %v9167_v7 }
 0x10e   :  { %1846 = vmatpush1.bf16.msra.mxu0 %v7739_v9 }
 0x10f   :  { %1847 = vmatprep.subr.bf16.mxu0 %v7747_v10  ;;  %v9174_v10 = vsub.s32 3, %v8907_v37 }
 0x110   :  { %1928 = vmatpush1.bf16.msra.mxu1 %v7742_v15 }
 0x111   :  { %1929 = vmatprep.subr.bf16.mxu1 %v7750_v16 }
 0x112   :  { %1848 = vmatpush1.bf16.msra.mxu0 %v7745_v13 }
 0x113   :  { %1849 = vmatprep.subr.bf16.mxu0 %v7753_v14 }
 0x114   :  { %1930 = vmatpush1.bf16.msra.mxu1 %v7748_v19 }
 0x115   :  { %1931 = vmatprep.subr.bf16.mxu1 %v7756_v20  ;;  %v7823_v20 = vld [vmem:[#allocation2 + $0x200] ss:$16 sps:$4 sm:$0xff]  }
 0x116   :  { %1850 = vmatpush1.bf16.msra.mxu0 %v7751_v17 }
 0x117   :  { %1851 = vmatprep.subr.bf16.mxu0 %v7759_v18  ;;  %v310_v18 = vrot.slane %v9164_v6, %v9174_v10 }
 0x118   :  { %1932 = vmatpush1.bf16.msra.mxu1 %v7754_v23 }
 0x119   :  { %1933 = vmatprep.subr.bf16.mxu1 %v7762_v24  ;;  %v7831_v24 = vld [vmem:[#allocation2 + $0x224] ss:$16 sps:$4 sm:$0xff]  }
 0x11a   :  { %1852 = vmatpush1.bf16.msra.mxu0 %v7757_v21  ;;  %v7826_v21 = vld [vmem:[#allocation2 + $0x208] ss:$16 sps:$4 sm:$0xff]  }
 0x11b   :  { %1853 = vmatprep.subr.bf16.mxu0 %v7765_v22 }
 0x11c   :  { %1934 = vmatpush1.bf16.msra.mxu1 %v7760_v27 }
 0x11d   :  { %1935 = vmatprep.subr.bf16.mxu1 %v7768_v28 }
 0x11e   :  { %1854 = vmatpush1.bf16.msra.mxu0 %v7763_v25  ;;  %v7834_v25 = vld [vmem:[#allocation2 + $0x22c] ss:$16 sps:$4 sm:$0xff]  }
 0x11f   :  { %1855 = vmatprep.subr.bf16.mxu0 %v7771_v26 }
 0x120   :  { %1936 = vmatpush1.bf16.msra.mxu1 %v7766_v31  ;;  %v7832_v31 = vld [vmem:[#allocation2 + $0x228] ss:$16 sps:$4 sm:$0xff]  }
 0x121   :  { %1937 = vmatprep.subr.bf16.mxu1 %v7774_v32 }
 0x122   :  { %1856 = vmatpush1.bf16.msra.mxu0 %v7769_v29 }
 0x123   :  { %1857 = vmatprep.subr.bf16.mxu0 %v7777_v30  ;;  %v7829_v30 = vld [vmem:[#allocation2 + $0x220] ss:$16 sps:$4 sm:$0xff]  }
 0x124   :  { %1938 = vmatpush1.bf16.msra.mxu1 %v7772_v35 }
 0x125   :  { %1939 = vmatprep.subr.bf16.mxu1 %v7780_v36  ;;  %v7835_v36 = vld [vmem:[#allocation2 + $0x240] ss:$16 sps:$4 sm:$0xff]  }
 0x126   :  { %1858 = vmatpush1.bf16.msra.mxu0 %v7775_v33  ;;  %v7837_v33 = vld [vmem:[#allocation2 + $0x244] ss:$16 sps:$4 sm:$0xff]  }
 0x127   :  { %1859 = vmatprep.subr.bf16.mxu0 %v7783_v34  ;;  %v7840_v34 = vld [vmem:[#allocation2 + $0x24c] ss:$16 sps:$4 sm:$0xff]  }
 0x128   :  { %1940 = vmatpush1.bf16.msra.mxu1 %v7778_v40  ;;  %v7846_v40 = vld [vmem:[#allocation2 + $0x26c] ss:$16 sps:$4 sm:$0xff]  }
 0x129   :  { %1941 = vmatprep.subr.bf16.mxu1 %v7786_v41  ;;  %v7841_v41 = vld [vmem:[#allocation2 + $0x260] ss:$16 sps:$4 sm:$0xff]  }
 0x12a   :  { %1860 = vmatpush1.bf16.msra.mxu0 %v7781_v38  ;;  %v7838_v38 = vld [vmem:[#allocation2 + $0x248] ss:$16 sps:$4 sm:$0xff]  }
 0x12b   :  { %1861 = vmatprep.subr.bf16.mxu0 %v7789_v39  ;;  %v7843_v39 = vld [vmem:[#allocation2 + $0x264] ss:$16 sps:$4 sm:$0xff]  }
 0x12c   :  { %1942 = vmatpush1.bf16.msra.mxu1 %v7784_v44  ;;  %v7852_v44 = vld [vmem:[#allocation2 + $0x28c] ss:$16 sps:$4 sm:$0xff]  }
 0x12d   :  { %1943 = vmatprep.subr.bf16.mxu1 %v7792_v45  ;;  %v7847_v45 = vld [vmem:[#allocation2 + $0x280] ss:$16 sps:$4 sm:$0xff]  }
 0x12e   :  { %1862 = vmatpush1.bf16.msra.mxu0 %v7787_v42  ;;  %v7844_v42 = vld [vmem:[#allocation2 + $0x268] ss:$16 sps:$4 sm:$0xff]  }
 0x12f   :  { %1863 = vmatprep.subr.bf16.mxu0 %v7795_v43  ;;  %v7849_v43 = vld [vmem:[#allocation2 + $0x284] ss:$16 sps:$4 sm:$0xff]  }
 0x130   :  { %1944 = vmatpush1.bf16.msra.mxu1 %v7790_v48  ;;  %v7858_v48 = vld [vmem:[#allocation2 + $0x2ac] ss:$16 sps:$4 sm:$0xff]  }
 0x131   :  { %1945 = vmatprep.subr.bf16.mxu1 %v7798_v49  ;;  %v7853_v49 = vld [vmem:[#allocation2 + $0x2a0] ss:$16 sps:$4 sm:$0xff]  }
 0x132   :  { %1864 = vmatpush1.bf16.msra.mxu0 %v7793_v46  ;;  %v7850_v46 = vld [vmem:[#allocation2 + $0x288] ss:$16 sps:$4 sm:$0xff]  }
 0x133   :  { %1865 = vmatprep.subr.bf16.mxu0 %v7801_v47  ;;  %v7855_v47 = vld [vmem:[#allocation2 + $0x2a4] ss:$16 sps:$4 sm:$0xff]  }
 0x134   :  { %1946 = vmatpush1.bf16.msra.mxu1 %v7796_v52  ;;  %v7864_v52 = vld [vmem:[#allocation2 + $0x2cc] ss:$16 sps:$4 sm:$0xff]  }
 0x135   :  { %1947 = vmatprep.subr.bf16.mxu1 %v7804_v53  ;;  %v7859_v53 = vld [vmem:[#allocation2 + $0x2c0] ss:$16 sps:$4 sm:$0xff]  }
 0x136   :  { %1866 = vmatpush1.bf16.msra.mxu0 %v7799_v50  ;;  %v7856_v50 = vld [vmem:[#allocation2 + $0x2a8] ss:$16 sps:$4 sm:$0xff]  }
 0x137   :  { %1867 = vmatprep.subr.bf16.mxu0 %v7807_v51  ;;  %v7861_v51 = vld [vmem:[#allocation2 + $0x2c4] ss:$16 sps:$4 sm:$0xff]  }
 0x138   :  { %1948 = vmatpush1.bf16.msra.mxu1 %v7802_v55  ;;  %v7867_v55 = vld [vmem:[#allocation2 + $0x2e4] ss:$16 sps:$4 sm:$0xff]  }
 0x139   :  { %1949 = vmatprep.subr.bf16.mxu1 %v7810_v56  ;;  %v7870_v56 = vld [vmem:[#allocation2 + $0x2ec] ss:$16 sps:$4 sm:$0xff]  }
 0x13a   :  { %1868 = vmatpush1.bf16.msra.mxu0 %v7805_v54  ;;  %v7862_v54 = vld [vmem:[#allocation2 + $0x2c8] ss:$16 sps:$4 sm:$0xff]  }
 0x13b   :  { %1869 = vmatprep.subr.bf16.mxu0 %v7813_v58  ;;  %v7868_v58 = vld [vmem:[#allocation2 + $0x2e8] ss:$16 sps:$4 sm:$0xff]  }
 0x13c   :  { %1950 = vmatpush1.bf16.msra.mxu1 %v7808_v57  ;;  %v7865_v57 = vld [vmem:[#allocation2 + $0x2e0] ss:$16 sps:$4 sm:$0xff]  }
 0x13d   :  { %1951 = vmatprep.subr.bf16.mxu1 %v7816_v59  ;;  %v7873_v59 = vld [vmem:[#allocation2 + $0x304] ss:$16 sps:$4 sm:$0xff]  }
 0x13e   :  { %1870 = vmatpush1.bf16.msra.mxu0 %v7811_v60  ;;  %v7876_v60 = vld [vmem:[#allocation2 + $0x30c] ss:$16 sps:$4 sm:$0xff]  }
 0x13f   :  { %1871 = vmatprep.subr.bf16.mxu0 %v7819_v62  ;;  %v7874_v62 = vld [vmem:[#allocation2 + $0x308] ss:$16 sps:$4 sm:$0xff]  }
 0x140   :  { %1952 = vmatpush1.bf16.msra.mxu1 %v7814_v61  ;;  %v7871_v61 = vld [vmem:[#allocation2 + $0x300] ss:$16 sps:$4 sm:$0xff]  }
 0x141   :  { %1953 = vmatprep.subr.bf16.mxu1 %v7822_v63  ;;  %v7879_v63 = vld [vmem:[#allocation2 + $0x324] ss:$16 sps:$4 sm:$0xff]  }
 0x142   :  { %1872 = vmatpush1.bf16.msra.mxu0 %v7817_v0  ;;  %v7882_v0 = vld [vmem:[#allocation2 + $0x32c] ss:$16 sps:$4 sm:$0xff]  }
 0x143   :  { %1882 = vmatprep.subr.bf16.mxu0 %v7825_v2  ;;  %v7880_v2 = vld [vmem:[#allocation2 + $0x328] ss:$16 sps:$4 sm:$0xff]  }
 0x144   :  { %1954 = vmatpush1.bf16.msra.mxu1 %v7820_v1  ;;  %v7877_v1 = vld [vmem:[#allocation2 + $0x320] ss:$16 sps:$4 sm:$0xff]  }
 0x145   :  { %1964 = vmatprep.subr.bf16.mxu1 %v7828_v3  ;;  %v7885_v3 = vld [vmem:[#allocation2 + $0x344] ss:$16 sps:$4 sm:$0xff]  }
 0x1d8   :  { %v954_v9 = vpop.f32.mrb[0].mxu0 }
 0x1d9   :  { %v7506_v11 = vadd.f32 %v954_v9, %v298_v4  ;;  %v956_v12 = vpop.f32.mrb[1].mxu0  ;;  %v7888_v4 = vld [vmem:[#allocation2 + $0x34c] ss:$16 sps:$4 sm:$0xff]   ;;  %v7886_v9 = vld [vmem:[#allocation2 + $0x348] ss:$16 sps:$4 sm:$0xff]  }
 0x1da   :  { %v7507_v13 = vadd.f32 %v956_v12, %v302_v8  ;;  %v958_v14 = vpop.f32.mrb[2].mxu0  ;;  %v9178_v22 = vpop.f32.mrb[0].mxu1  ;;  %v7883_v8 = vld [vmem:[#allocation2 + $0x340] ss:$16 sps:$4 sm:$0xff]   ;;  %v7894_v12 = vld [vmem:[#allocation2 + $0x36c] ss:$16 sps:$4 sm:$0xff]  }
 0x1db   :  { %v1043_v15 = vmax.f32 %v7506_v11, 0.0  ;;  %v959_v16 = vpop.f32.mrb[3].mxu0  ;;  %v1038_v26 = vpop.f32.mrb[1].mxu1  ;;  %v7891_v11 = vld [vmem:[#allocation2 + $0x364] ss:$16 sps:$4 sm:$0xff]  }
 0x1dc   :  { %v1044_v17 = vmax.f32 %v7507_v13, 0.0  ;;  %v7509_v27 = vadd.f32 %v1038_v26, %v310_v18  ;;  %v1040_v28 = vpop.f32.mrb[2].mxu1  ;;  %v7889_v13 = vld [vmem:[#allocation2 + $0x360] ss:$16 sps:$4 sm:$0xff]   ;;  %v7892_v14 = vld [vmem:[#allocation2 + $0x368] ss:$16 sps:$4 sm:$0xff]  }
 0x1dd   :  { %v1047_v23 = vpack.c.bf16 %v1043_v15, %v1043_v15  ;;  %v1041_v29 = vpop.f32.mrb[3].mxu1  ;;  %v7897_v15 = vld [vmem:[#allocation2 + $0x384] ss:$16 sps:$4 sm:$0xff]   ;;  %v7900_v16 = vld [vmem:[#allocation2 + $0x38c] ss:$16 sps:$4 sm:$0xff]  }
 0x1de   :  { %v1048_v19 = vpack.c.bf16 %v1044_v17, %v1044_v17  ;;  %v1046_v32 = vmax.f32 %v7509_v27, 0.0  ;;  %v7895_v17 = vld [vmem:[#allocation2 + $0x380] ss:$16 sps:$4 sm:$0xff]   ;;  %v7898_v18 = vld [vmem:[#allocation2 + $0x388] ss:$16 sps:$4 sm:$0xff]  }
 0x1df   :  { %v7909_v26 = vld [vmem:[#allocation2 + $0x3c4] ss:$16 sps:$4 sm:$0xff]   ;;  %v7912_v27 = vld [vmem:[#allocation2 + $0x3cc] ss:$16 sps:$4 sm:$0xff]   ;;  %v7907_v28 = vld [vmem:[#allocation2 + $0x3c0] ss:$16 sps:$4 sm:$0xff]  }
 0x1e0   :  { %1873 = vmatprep.mubr.bf16.mxu0 %v1048_v19  ;;  %1955 = vmatprep.mubr.bf16.mxu1 %v1048_v19  ;;  %v1050_v35 = vpack.c.bf16 %v1046_v32, %v1046_v32  ;;  %v9181_v19 = vsub.s32 2, %v8907_v37  ;;  %v7910_v37 = vld [vmem:[#allocation2 + $0x3c8] ss:$16 sps:$4 sm:$0xff]   ;;  %v7913_v32 = vld [vmem:[#allocation2 + $0x3e0] ss:$16 sps:$4 sm:$0xff]  }
 0x1e1   :  { %1874 = vmatmul.mubr.bf16.vlgmr.msra.gmra.mrb[4].mxu0 %v1047_v23  ;;  %1956 = vmatmul.mubr.bf16.vlgmr.msra.gmra.mrb[4].mxu1 %v1047_v23  ;;  %v7901_v23 = vld [vmem:[#allocation2 + $0x3a0] ss:$16 sps:$4 sm:$0xff]  }
 0x1e2   :  { %1883 = vmatpush1.bf16.msra.mxu0 %v7823_v20  ;;  %1965 = vmatpush1.bf16.msra.mxu1 %v7826_v21  ;;  %v7903_v20 = vld [vmem:[#allocation2 + $0x3a4] ss:$16 sps:$4 sm:$0xff]   ;;  %v7906_v21 = vld [vmem:[#allocation2 + $0x3ac] ss:$16 sps:$4 sm:$0xff]  }
 0x1e3   :  { %1884 = vmatprep.subr.bf16.mxu0 %v7831_v24  ;;  %1966 = vmatprep.subr.bf16.mxu1 %v7834_v25  ;;  %v7904_v24 = vld [vmem:[#allocation2 + $0x3a8] ss:$16 sps:$4 sm:$0xff]   ;;  %v306_v25 = vrot.slane %v9164_v6, %v9181_v19 }
 0x1e4   :  { %1914 = vmatprep.mubr.bf16.mxu0 %v1050_v35  ;;  %1996 = vmatprep.mubr.bf16.mxu1 %v1050_v35  ;;  %v7921_v6 = vld [vmem:[#allocation7 + $0x4] ss:$16 sps:$4 sm:$0xff]   ;;  %v7924_v35 = vld [vmem:[#allocation7 + $0xc] ss:$16 sps:$4 sm:$0xff]  }
 0x1e5   :  { %v7508_v29 = vadd.f32 %v9178_v22, %v306_v25  ;;  %v7927_v22 = vld [vmem:[#allocation7 + $0x24] ss:$16 sps:$4 sm:$0xff]  }
 0x1e6   :  { %1885 = vmatpush1.bf16.msra.mxu0 %v7829_v30  ;;  %1967 = vmatpush1.bf16.msra.mxu1 %v7832_v31  ;;  %v7915_v30 = vld [vmem:[#allocation2 + $0x3e4] ss:$16 sps:$4 sm:$0xff]   ;;  %v7918_v31 = vld [vmem:[#allocation2 + $0x3ec] ss:$16 sps:$4 sm:$0xff]   ;;  %v7993_v25 = vld [vmem:[#allocation7 + $0x184] ss:$16 sps:$4 sm:$0xff]  }
 0x1e7   :  { %1886 = vmatprep.subr.bf16.mxu0 %v7837_v33  ;;  %1968 = vmatprep.subr.bf16.mxu1 %v7840_v34  ;;  %v7916_v33 = vld [vmem:[#allocation2 + $0x3e8] ss:$16 sps:$4 sm:$0xff]   ;;  %v1045_v34 = vmax.f32 %v7508_v29, 0.0  ;;  %v8002_v29 = vld [vmem:[#allocation7 + $0x1ac] ss:$16 sps:$4 sm:$0xff]  }
 0x1ea   :  { %1887 = vmatpush1.bf16.msra.mxu0 %v7835_v36  ;;  %1969 = vmatpush1.bf16.msra.mxu1 %v7838_v38  ;;  %v7919_v36 = vld [vmem:[#allocation7] ss:$16 sps:$4 sm:$0xff]   ;;  %v7922_v38 = vld [vmem:[#allocation7 + $0x8] ss:$16 sps:$4 sm:$0xff]  }
 0x1eb   :  { %1888 = vmatprep.subr.bf16.mxu0 %v7843_v39  ;;  %1970 = vmatprep.subr.bf16.mxu1 %v7846_v40  ;;  %v1049_v39 = vpack.c.bf16 %v1045_v34, %v1045_v34  ;;  %v7930_v40 = vld [vmem:[#allocation7 + $0x2c] ss:$16 sps:$4 sm:$0xff]   ;;  %v8003_v34 = vld [vmem:[#allocation7 + $0x1c0] ss:$16 sps:$4 sm:$0xff]  }
 0x1ee   :  { %1889 = vmatpush1.bf16.msra.mxu0 %v7841_v41  ;;  %1971 = vmatpush1.bf16.msra.mxu1 %v7844_v42  ;;  %v7925_v41 = vld [vmem:[#allocation7 + $0x20] ss:$16 sps:$4 sm:$0xff]   ;;  %v7928_v42 = vld [vmem:[#allocation7 + $0x28] ss:$16 sps:$4 sm:$0xff]  }
 0x1ef   :  { %1890 = vmatprep.subr.bf16.mxu0 %v7849_v43  ;;  %1972 = vmatprep.subr.bf16.mxu1 %v7852_v44  ;;  %v7933_v43 = vld [vmem:[#allocation7 + $0x44] ss:$16 sps:$4 sm:$0xff]   ;;  %v7936_v44 = vld [vmem:[#allocation7 + $0x4c] ss:$16 sps:$4 sm:$0xff]  }
 0x1f2   :  { %1891 = vmatpush1.bf16.msra.mxu0 %v7847_v45  ;;  %1973 = vmatpush1.bf16.msra.mxu1 %v7850_v46  ;;  %v7931_v45 = vld [vmem:[#allocation7 + $0x40] ss:$16 sps:$4 sm:$0xff]   ;;  %v7934_v46 = vld [vmem:[#allocation7 + $0x48] ss:$16 sps:$4 sm:$0xff]  }
 0x1f3   :  { %1892 = vmatprep.subr.bf16.mxu0 %v7855_v47  ;;  %1974 = vmatprep.subr.bf16.mxu1 %v7858_v48  ;;  %v7939_v47 = vld [vmem:[#allocation7 + $0x64] ss:$16 sps:$4 sm:$0xff]   ;;  %v7942_v48 = vld [vmem:[#allocation7 + $0x6c] ss:$16 sps:$4 sm:$0xff]  }
 0x1f6   :  { %1893 = vmatpush1.bf16.msra.mxu0 %v7853_v49  ;;  %1975 = vmatpush1.bf16.msra.mxu1 %v7856_v50  ;;  %v7937_v49 = vld [vmem:[#allocation7 + $0x60] ss:$16 sps:$4 sm:$0xff]   ;;  %v7940_v50 = vld [vmem:[#allocation7 + $0x68] ss:$16 sps:$4 sm:$0xff]  }
 0x1f7   :  { %1894 = vmatprep.subr.bf16.mxu0 %v7861_v51  ;;  %1976 = vmatprep.subr.bf16.mxu1 %v7864_v52  ;;  %v7945_v51 = vld [vmem:[#allocation7 + $0x84] ss:$16 sps:$4 sm:$0xff]   ;;  %v7948_v52 = vld [vmem:[#allocation7 + $0x8c] ss:$16 sps:$4 sm:$0xff]  }
 0x1fa   :  { %1895 = vmatpush1.bf16.msra.mxu0 %v7859_v53  ;;  %1977 = vmatpush1.bf16.msra.mxu1 %v7862_v54  ;;  %v7943_v53 = vld [vmem:[#allocation7 + $0x80] ss:$16 sps:$4 sm:$0xff]   ;;  %v7946_v54 = vld [vmem:[#allocation7 + $0x88] ss:$16 sps:$4 sm:$0xff]  }
 0x1fb   :  { %1896 = vmatprep.subr.bf16.mxu0 %v7867_v55  ;;  %1978 = vmatprep.subr.bf16.mxu1 %v7870_v56  ;;  %v7951_v55 = vld [vmem:[#allocation7 + $0xa4] ss:$16 sps:$4 sm:$0xff]   ;;  %v7954_v56 = vld [vmem:[#allocation7 + $0xac] ss:$16 sps:$4 sm:$0xff]  }
 0x1fe   :  { %1897 = vmatpush1.bf16.msra.mxu0 %v7865_v57  ;;  %1979 = vmatpush1.bf16.msra.mxu1 %v7868_v58  ;;  %v7949_v57 = vld [vmem:[#allocation7 + $0xa0] ss:$16 sps:$4 sm:$0xff]   ;;  %v7952_v58 = vld [vmem:[#allocation7 + $0xa8] ss:$16 sps:$4 sm:$0xff]  }
 0x1ff   :  { %1898 = vmatprep.subr.bf16.mxu0 %v7873_v59  ;;  %1980 = vmatprep.subr.bf16.mxu1 %v7876_v60  ;;  %v7957_v59 = vld [vmem:[#allocation7 + $0xc4] ss:$16 sps:$4 sm:$0xff]   ;;  %v7960_v60 = vld [vmem:[#allocation7 + $0xcc] ss:$16 sps:$4 sm:$0xff]  }
 0x202   :  { %1899 = vmatpush1.bf16.msra.mxu0 %v7871_v61  ;;  %1981 = vmatpush1.bf16.msra.mxu1 %v7874_v62  ;;  %v7955_v61 = vld [vmem:[#allocation7 + $0xc0] ss:$16 sps:$4 sm:$0xff]   ;;  %v7958_v62 = vld [vmem:[#allocation7 + $0xc8] ss:$16 sps:$4 sm:$0xff]  }
 0x203   :  { %1900 = vmatprep.subr.bf16.mxu0 %v7879_v63  ;;  %1982 = vmatprep.subr.bf16.mxu1 %v7882_v0  ;;  %v7963_v63 = vld [vmem:[#allocation7 + $0xe4] ss:$16 sps:$4 sm:$0xff]   ;;  %v7966_v0 = vld [vmem:[#allocation7 + $0xec] ss:$16 sps:$4 sm:$0xff]  }
 0x206   :  { %1901 = vmatpush1.bf16.msra.mxu0 %v7877_v1  ;;  %1983 = vmatpush1.bf16.msra.mxu1 %v7880_v2  ;;  %v7961_v1 = vld [vmem:[#allocation7 + $0xe0] ss:$16 sps:$4 sm:$0xff]   ;;  %v7964_v2 = vld [vmem:[#allocation7 + $0xe8] ss:$16 sps:$4 sm:$0xff]  }
 0x207   :  { %1902 = vmatprep.subr.bf16.mxu0 %v7885_v3  ;;  %1984 = vmatprep.subr.bf16.mxu1 %v7888_v4  ;;  %v7969_v3 = vld [vmem:[#allocation7 + $0x104] ss:$16 sps:$4 sm:$0xff]   ;;  %v7972_v4 = vld [vmem:[#allocation7 + $0x10c] ss:$16 sps:$4 sm:$0xff]  }
 0x20a   :  { %1903 = vmatpush1.bf16.msra.mxu0 %v7883_v8  ;;  %1985 = vmatpush1.bf16.msra.mxu1 %v7886_v9  ;;  %v7967_v8 = vld [vmem:[#allocation7 + $0x100] ss:$16 sps:$4 sm:$0xff]   ;;  %v7970_v9 = vld [vmem:[#allocation7 + $0x108] ss:$16 sps:$4 sm:$0xff]  }
 0x20b   :  { %1904 = vmatprep.subr.bf16.mxu0 %v7891_v11  ;;  %1986 = vmatprep.subr.bf16.mxu1 %v7894_v12  ;;  %v7975_v11 = vld [vmem:[#allocation7 + $0x124] ss:$16 sps:$4 sm:$0xff]   ;;  %v7978_v12 = vld [vmem:[#allocation7 + $0x12c] ss:$16 sps:$4 sm:$0xff]  }
 0x20e   :  { %1905 = vmatpush1.bf16.msra.mxu0 %v7889_v13  ;;  %1987 = vmatpush1.bf16.msra.mxu1 %v7892_v14  ;;  %v7973_v13 = vld [vmem:[#allocation7 + $0x120] ss:$16 sps:$4 sm:$0xff]   ;;  %v7976_v14 = vld [vmem:[#allocation7 + $0x128] ss:$16 sps:$4 sm:$0xff]  }
 0x20f   :  { %1906 = vmatprep.subr.bf16.mxu0 %v7897_v15  ;;  %1988 = vmatprep.subr.bf16.mxu1 %v7900_v16  ;;  %v7981_v15 = vld [vmem:[#allocation7 + $0x144] ss:$16 sps:$4 sm:$0xff]   ;;  %v7984_v16 = vld [vmem:[#allocation7 + $0x14c] ss:$16 sps:$4 sm:$0xff]  }
 0x212   :  { %1907 = vmatpush1.bf16.msra.mxu0 %v7895_v17  ;;  %1989 = vmatpush1.bf16.msra.mxu1 %v7898_v18  ;;  %v7979_v17 = vld [vmem:[#allocation7 + $0x140] ss:$16 sps:$4 sm:$0xff]   ;;  %v7982_v18 = vld [vmem:[#allocation7 + $0x148] ss:$16 sps:$4 sm:$0xff]  }
 0x213   :  { %1908 = vmatprep.subr.bf16.mxu0 %v7903_v20  ;;  %1990 = vmatprep.subr.bf16.mxu1 %v7906_v21  ;;  %v7987_v20 = vld [vmem:[#allocation7 + $0x164] ss:$16 sps:$4 sm:$0xff]   ;;  %v7990_v21 = vld [vmem:[#allocation7 + $0x16c] ss:$16 sps:$4 sm:$0xff]  }
 0x216   :  { %1909 = vmatpush1.bf16.msra.mxu0 %v7901_v23  ;;  %1991 = vmatpush1.bf16.msra.mxu1 %v7904_v24  ;;  %v7985_v23 = vld [vmem:[#allocation7 + $0x160] ss:$16 sps:$4 sm:$0xff]   ;;  %v7988_v24 = vld [vmem:[#allocation7 + $0x168] ss:$16 sps:$4 sm:$0xff]  }
 0x217   :  { %1910 = vmatprep.subr.bf16.mxu0 %v7909_v26  ;;  %1992 = vmatprep.subr.bf16.mxu1 %v7912_v27  ;;  %v7996_v26 = vld [vmem:[#allocation7 + $0x18c] ss:$16 sps:$4 sm:$0xff]   ;;  %v7991_v27 = vld [vmem:[#allocation7 + $0x180] ss:$16 sps:$4 sm:$0xff]  }
 0x21a   :  { %1911 = vmatpush1.bf16.msra.mxu0 %v7907_v28  ;;  %1993 = vmatpush1.bf16.msra.mxu1 %v7910_v37  ;;  %v7994_v28 = vld [vmem:[#allocation7 + $0x188] ss:$16 sps:$4 sm:$0xff]   ;;  %v7999_v37 = vld [vmem:[#allocation7 + $0x1a4] ss:$16 sps:$4 sm:$0xff]  }
 0x21b   :  { %1912 = vmatprep.subr.bf16.mxu0 %v7915_v30  ;;  %1994 = vmatprep.subr.bf16.mxu1 %v7918_v31  ;;  %v7997_v30 = vld [vmem:[#allocation7 + $0x1a0] ss:$16 sps:$4 sm:$0xff]   ;;  %v8000_v31 = vld [vmem:[#allocation7 + $0x1a8] ss:$16 sps:$4 sm:$0xff]  }
 0x21e   :  { %1913 = vmatpush1.bf16.msra.mxu0 %v7913_v32  ;;  %1995 = vmatpush1.bf16.msra.mxu1 %v7916_v33  ;;  %v8005_v32 = vld [vmem:[#allocation7 + $0x1c4] ss:$16 sps:$4 sm:$0xff]   ;;  %v8008_v33 = vld [vmem:[#allocation7 + $0x1cc] ss:$16 sps:$4 sm:$0xff]  }
 0x21f   :  { %2803 = vmatprep.subr.bf16.mxu0 %v7921_v6  ;;  %2885 = vmatprep.subr.bf16.mxu1 %v7924_v35  ;;  %v8006_v6 = vld [vmem:[#allocation7 + $0x1c8] ss:$16 sps:$4 sm:$0xff]   ;;  %v8011_v35 = vld [vmem:[#allocation7 + $0x1e4] ss:$16 sps:$4 sm:$0xff]  }
 0x221   :  { %1915 = vmatmul.mubr.bf16.vlgmr.msra.gmra.mrb[4].mxu0 %v1049_v39  ;;  %1997 = vmatmul.mubr.bf16.vlgmr.msra.gmra.mrb[4].mxu1 %v1049_v39  ;;  %v8012_v39 = vld [vmem:[#allocation7 + $0x1e8] ss:$16 sps:$4 sm:$0xff]  }
 0x222   :  { %2804 = vmatpush1.bf16.msra.mxu0 %v7919_v36  ;;  %2886 = vmatpush1.bf16.msra.mxu1 %v7922_v38  ;;  %v8014_v36 = vld [vmem:[#allocation7 + $0x1ec] ss:$16 sps:$4 sm:$0xff]   ;;  %v8009_v38 = vld [vmem:[#allocation7 + $0x1e0] ss:$16 sps:$4 sm:$0xff]  }
 0x223   :  { %2805 = vmatprep.subr.bf16.mxu0 %v7927_v22  ;;  %2887 = vmatprep.subr.bf16.mxu1 %v7930_v40  ;;  %v8017_v22 = vld [vmem:[#allocation7 + $0x204] ss:$16 sps:$4 sm:$0xff]   ;;  %v8020_v40 = vld [vmem:[#allocation7 + $0x20c] ss:$16 sps:$4 sm:$0xff]  }
 0x226   :  { %2806 = vmatpush1.bf16.msra.mxu0 %v7925_v41  ;;  %2888 = vmatpush1.bf16.msra.mxu1 %v7928_v42  ;;  %v9186_v41 = vld [vmem:[#allocation5] sm:$0xf] }
 0x227   :  { %2807 = vmatprep.subr.bf16.mxu0 %v7933_v43  ;;  %2889 = vmatprep.subr.bf16.mxu1 %v7936_v44  ;;  %v1184_v42 = vrot.slane %v9186_v41, %v9159_v5  ;;  %v1188_v43 = vrot.slane %v9186_v41, %v9167_v7  ;;  %v1196_v44 = vrot.slane %v9186_v41, %v9174_v10 }
 0x22a   :  { %2808 = vmatpush1.bf16.msra.mxu0 %v7931_v45  ;;  %2890 = vmatpush1.bf16.msra.mxu1 %v7934_v46 }
 0x22b   :  { %2809 = vmatprep.subr.bf16.mxu0 %v7939_v47  ;;  %2891 = vmatprep.subr.bf16.mxu1 %v7942_v48 }
 0x22e   :  { %2810 = vmatpush1.bf16.msra.mxu0 %v7937_v49  ;;  %2892 = vmatpush1.bf16.msra.mxu1 %v7940_v50 }
 0x22f   :  { %2811 = vmatprep.subr.bf16.mxu0 %v7945_v51  ;;  %2893 = vmatprep.subr.bf16.mxu1 %v7948_v52 }
 0x232   :  { %2812 = vmatpush1.bf16.msra.mxu0 %v7943_v53  ;;  %2894 = vmatpush1.bf16.msra.mxu1 %v7946_v54 }
 0x233   :  { %2813 = vmatprep.subr.bf16.mxu0 %v7951_v55  ;;  %2895 = vmatprep.subr.bf16.mxu1 %v7954_v56 }
 0x236   :  { %2814 = vmatpush1.bf16.msra.mxu0 %v7949_v57  ;;  %2896 = vmatpush1.bf16.msra.mxu1 %v7952_v58 }
 0x237   :  { %2815 = vmatprep.subr.bf16.mxu0 %v7957_v59  ;;  %2897 = vmatprep.subr.bf16.mxu1 %v7960_v60  ;;  %v8015_v60 = vld [vmem:[#allocation7 + $0x200] ss:$16 sps:$4 sm:$0xff]  }
 0x23a   :  { %2816 = vmatpush1.bf16.msra.mxu0 %v7955_v61  ;;  %2898 = vmatpush1.bf16.msra.mxu1 %v7958_v62  ;;  %v8018_v61 = vld [vmem:[#allocation7 + $0x208] ss:$16 sps:$4 sm:$0xff]  }
 0x23b   :  { %2817 = vmatprep.subr.bf16.mxu0 %v7963_v63  ;;  %2899 = vmatprep.subr.bf16.mxu1 %v7966_v0  ;;  %v8023_v63 = vld [vmem:[#allocation7 + $0x224] ss:$16 sps:$4 sm:$0xff]   ;;  %v8026_v0 = vld [vmem:[#allocation7 + $0x22c] ss:$16 sps:$4 sm:$0xff]  }
 0x23e   :  { %2818 = vmatpush1.bf16.msra.mxu0 %v7961_v1  ;;  %2900 = vmatpush1.bf16.msra.mxu1 %v7964_v2  ;;  %v8021_v2 = vld [vmem:[#allocation7 + $0x220] ss:$16 sps:$4 sm:$0xff]  }
 0x23f   :  { %2819 = vmatprep.subr.bf16.mxu0 %v7969_v3  ;;  %2901 = vmatprep.subr.bf16.mxu1 %v7972_v4  ;;  %v8024_v3 = vld [vmem:[#allocation7 + $0x228] ss:$16 sps:$4 sm:$0xff]   ;;  %v8029_v4 = vld [vmem:[#allocation7 + $0x244] ss:$16 sps:$4 sm:$0xff]  }
 0x242   :  { %2820 = vmatpush1.bf16.msra.mxu0 %v7967_v8  ;;  %2902 = vmatpush1.bf16.msra.mxu1 %v7970_v9  ;;  %v8032_v8 = vld [vmem:[#allocation7 + $0x24c] ss:$16 sps:$4 sm:$0xff]   ;;  %v8027_v9 = vld [vmem:[#allocation7 + $0x240] ss:$16 sps:$4 sm:$0xff]  }
 0x243   :  { %2821 = vmatprep.subr.bf16.mxu0 %v7975_v11  ;;  %2903 = vmatprep.subr.bf16.mxu1 %v7978_v12  ;;  %v8030_v11 = vld [vmem:[#allocation7 + $0x248] ss:$16 sps:$4 sm:$0xff]   ;;  %v8035_v12 = vld [vmem:[#allocation7 + $0x264] ss:$16 sps:$4 sm:$0xff]  }
 0x246   :  { %2822 = vmatpush1.bf16.msra.mxu0 %v7973_v13  ;;  %2904 = vmatpush1.bf16.msra.mxu1 %v7976_v14  ;;  %v8038_v13 = vld [vmem:[#allocation7 + $0x26c] ss:$16 sps:$4 sm:$0xff]   ;;  %v8033_v14 = vld [vmem:[#allocation7 + $0x260] ss:$16 sps:$4 sm:$0xff]  }
 0x247   :  { %2823 = vmatprep.subr.bf16.mxu0 %v7981_v15  ;;  %2905 = vmatprep.subr.bf16.mxu1 %v7984_v16  ;;  %v8036_v15 = vld [vmem:[#allocation7 + $0x268] ss:$16 sps:$4 sm:$0xff]   ;;  %v8041_v16 = vld [vmem:[#allocation7 + $0x284] ss:$16 sps:$4 sm:$0xff]  }
 0x24a   :  { %2824 = vmatpush1.bf16.msra.mxu0 %v7979_v17  ;;  %2906 = vmatpush1.bf16.msra.mxu1 %v7982_v18  ;;  %v8044_v17 = vld [vmem:[#allocation7 + $0x28c] ss:$16 sps:$4 sm:$0xff]   ;;  %v8039_v18 = vld [vmem:[#allocation7 + $0x280] ss:$16 sps:$4 sm:$0xff]  }
 0x24b   :  { %2825 = vmatprep.subr.bf16.mxu0 %v7987_v20  ;;  %2907 = vmatprep.subr.bf16.mxu1 %v7990_v21  ;;  %v8042_v20 = vld [vmem:[#allocation7 + $0x288] ss:$16 sps:$4 sm:$0xff]   ;;  %v8047_v21 = vld [vmem:[#allocation7 + $0x2a4] ss:$16 sps:$4 sm:$0xff]  }
 0x24e   :  { %2826 = vmatpush1.bf16.msra.mxu0 %v7985_v23  ;;  %2908 = vmatpush1.bf16.msra.mxu1 %v7988_v24  ;;  %v8050_v23 = vld [vmem:[#allocation7 + $0x2ac] ss:$16 sps:$4 sm:$0xff]   ;;  %v8045_v24 = vld [vmem:[#allocation7 + $0x2a0] ss:$16 sps:$4 sm:$0xff]  }
 0x24f   :  { %2827 = vmatprep.subr.bf16.mxu0 %v7993_v25  ;;  %2909 = vmatprep.subr.bf16.mxu1 %v7996_v26  ;;  %v8048_v25 = vld [vmem:[#allocation7 + $0x2a8] ss:$16 sps:$4 sm:$0xff]   ;;  %v8053_v26 = vld [vmem:[#allocation7 + $0x2c4] ss:$16 sps:$4 sm:$0xff]  }
 0x252   :  { %2828 = vmatpush1.bf16.msra.mxu0 %v7991_v27  ;;  %2910 = vmatpush1.bf16.msra.mxu1 %v7994_v28  ;;  %v8056_v27 = vld [vmem:[#allocation7 + $0x2cc] ss:$16 sps:$4 sm:$0xff]   ;;  %v8051_v28 = vld [vmem:[#allocation7 + $0x2c0] ss:$16 sps:$4 sm:$0xff]  }
 0x253   :  { %2829 = vmatprep.subr.bf16.mxu0 %v7999_v37  ;;  %2911 = vmatprep.subr.bf16.mxu1 %v8002_v29  ;;  %v8054_v37 = vld [vmem:[#allocation7 + $0x2c8] ss:$16 sps:$4 sm:$0xff]   ;;  %v8059_v29 = vld [vmem:[#allocation7 + $0x2e4] ss:$16 sps:$4 sm:$0xff]  }
 0x256   :  { %2830 = vmatpush1.bf16.msra.mxu0 %v7997_v30  ;;  %2912 = vmatpush1.bf16.msra.mxu1 %v8000_v31  ;;  %v8062_v30 = vld [vmem:[#allocation7 + $0x2ec] ss:$16 sps:$4 sm:$0xff]   ;;  %v8057_v31 = vld [vmem:[#allocation7 + $0x2e0] ss:$16 sps:$4 sm:$0xff]  }
 0x257   :  { %2831 = vmatprep.subr.bf16.mxu0 %v8005_v32  ;;  %2913 = vmatprep.subr.bf16.mxu1 %v8008_v33  ;;  %v8060_v32 = vld [vmem:[#allocation7 + $0x2e8] ss:$16 sps:$4 sm:$0xff]   ;;  %v8065_v33 = vld [vmem:[#allocation7 + $0x304] ss:$16 sps:$4 sm:$0xff]  }
 0x25a   :  { %2832 = vmatpush1.bf16.msra.mxu0 %v8003_v34  ;;  %2914 = vmatpush1.bf16.msra.mxu1 %v8006_v6  ;;  %v8068_v34 = vld [vmem:[#allocation7 + $0x30c] ss:$16 sps:$4 sm:$0xff]   ;;  %v8063_v6 = vld [vmem:[#allocation7 + $0x300] ss:$16 sps:$4 sm:$0xff]  }
 0x25b   :  { %2833 = vmatprep.subr.bf16.mxu0 %v8011_v35  ;;  %2915 = vmatprep.subr.bf16.mxu1 %v8014_v36  ;;  %v8066_v35 = vld [vmem:[#allocation7 + $0x308] ss:$16 sps:$4 sm:$0xff]   ;;  %v8071_v36 = vld [vmem:[#allocation7 + $0x324] ss:$16 sps:$4 sm:$0xff]  }
 0x25e   :  { %2834 = vmatpush1.bf16.msra.mxu0 %v8009_v38  ;;  %2916 = vmatpush1.bf16.msra.mxu1 %v8012_v39  ;;  %v8074_v38 = vld [vmem:[#allocation7 + $0x32c] ss:$16 sps:$4 sm:$0xff]   ;;  %v8069_v39 = vld [vmem:[#allocation7 + $0x320] ss:$16 sps:$4 sm:$0xff]  }
 0x25f   :  { %2844 = vmatprep.subr.bf16.mxu0 %v8017_v22  ;;  %2926 = vmatprep.subr.bf16.mxu1 %v8020_v40  ;;  %v8072_v22 = vld [vmem:[#allocation7 + $0x328] ss:$16 sps:$4 sm:$0xff]   ;;  %v8077_v40 = vld [vmem:[#allocation7 + $0x344] ss:$16 sps:$4 sm:$0xff]  }
 0x2f4   :  { %v1916_v45 = vpop.f32.mrb[4].mxu0  ;;  %v9194_v46 = vpop.f32.mrb[4].mxu1 }
 0x2f5   :  { %v7510_v47 = vadd.f32 %v1916_v45, %v1184_v42  ;;  %v1918_v48 = vpop.f32.mrb[5].mxu0  ;;  %v2000_v49 = vpop.f32.mrb[5].mxu1  ;;  %v8080_v42 = vld [vmem:[#allocation7 + $0x34c] ss:$16 sps:$4 sm:$0xff]   ;;  %v8083_v45 = vld [vmem:[#allocation7 + $0x364] ss:$16 sps:$4 sm:$0xff]  }
 0x2f6   :  { %v7511_v50 = vadd.f32 %v1918_v48, %v1188_v43  ;;  %v7513_v51 = vadd.f32 %v2000_v49, %v1196_v44  ;;  %v1920_v52 = vpop.f32.mrb[6].mxu0  ;;  %v2002_v53 = vpop.f32.mrb[6].mxu1  ;;  %v8075_v43 = vld [vmem:[#allocation7 + $0x340] ss:$16 sps:$4 sm:$0xff]   ;;  %v8078_v44 = vld [vmem:[#allocation7 + $0x348] ss:$16 sps:$4 sm:$0xff]  }
 0x2f7   :  { %v2005_v54 = vmax.f32 %v7510_v47, 0.0  ;;  %v1921_v55 = vpop.f32.mrb[7].mxu0  ;;  %v2003_v56 = vpop.f32.mrb[7].mxu1  ;;  %v8086_v47 = vld [vmem:[#allocation7 + $0x36c] ss:$16 sps:$4 sm:$0xff]  }
 0x2f8   :  { %v2006_v57 = vmax.f32 %v7511_v50, 0.0  ;;  %v2008_v58 = vmax.f32 %v7513_v51, 0.0  ;;  %v8081_v48 = vld [vmem:[#allocation7 + $0x360] ss:$16 sps:$4 sm:$0xff]   ;;  %v8084_v49 = vld [vmem:[#allocation7 + $0x368] ss:$16 sps:$4 sm:$0xff]  }
 0x2f9   :  { %v2009_v62 = vpack.c.bf16 %v2005_v54, %v2005_v54  ;;  %v8089_v50 = vld [vmem:[#allocation7 + $0x384] ss:$16 sps:$4 sm:$0xff]   ;;  %v8092_v51 = vld [vmem:[#allocation7 + $0x38c] ss:$16 sps:$4 sm:$0xff]   ;;  %v8087_v52 = vld [vmem:[#allocation7 + $0x380] ss:$16 sps:$4 sm:$0xff]  }
 0x2fa   :  { %v2010_v59 = vpack.c.bf16 %v2006_v57, %v2006_v57  ;;  %v2012_v1 = vpack.c.bf16 %v2008_v58, %v2008_v58  ;;  %v8090_v53 = vld [vmem:[#allocation7 + $0x388] ss:$16 sps:$4 sm:$0xff]   ;;  %v8095_v54 = vld [vmem:[#allocation7 + $0x3a4] ss:$16 sps:$4 sm:$0xff]   ;;  %v8098_v55 = vld [vmem:[#allocation7 + $0x3ac] ss:$16 sps:$4 sm:$0xff]   ;;  %v1192_v58 = vrot.slane %v9186_v41, %v9181_v19 }
 0x2fb   :  { %v8093_v56 = vld [vmem:[#allocation7 + $0x3a0] ss:$16 sps:$4 sm:$0xff]   ;;  %v8096_v57 = vld [vmem:[#allocation7 + $0x3a8] ss:$16 sps:$4 sm:$0xff]  }
 0x2fc   :  { %2835 = vmatprep.mubr.bf16.mxu0 %v2010_v59  ;;  %2917 = vmatprep.mubr.bf16.mxu1 %v2010_v59  ;;  %v8101_v59 = vld [vmem:[#allocation7 + $0x3c4] ss:$16 sps:$4 sm:$0xff]  }
 0x2fd   :  { %2836 = vmatmul.mubr.bf16.vlgmr.msra.gmra.mrb[8].mxu0 %v2009_v62  ;;  %2918 = vmatmul.mubr.bf16.vlgmr.msra.gmra.mrb[8].mxu1 %v2009_v62  ;;  %v8102_v62 = vld [vmem:[#allocation7 + $0x3c8] ss:$16 sps:$4 sm:$0xff]  }
 0x2fe   :  { %2845 = vmatpush1.bf16.msra.mxu0 %v8015_v60  ;;  %2927 = vmatpush1.bf16.msra.mxu1 %v8018_v61  ;;  %v8104_v60 = vld [vmem:[#allocation7 + $0x3cc] ss:$16 sps:$4 sm:$0xff]   ;;  %v8099_v61 = vld [vmem:[#allocation7 + $0x3c0] ss:$16 sps:$4 sm:$0xff]  }
 0x2ff   :  { %2876 = vmatprep.mubr.bf16.mxu0 %v2012_v1  ;;  %2958 = vmatprep.mubr.bf16.mxu1 %v2012_v1  ;;  %v8110_v1 = vld [vmem:[#allocation7 + $0x3ec] ss:$16 sps:$4 sm:$0xff]  }
 0x300   :  { %2846 = vmatprep.subr.bf16.mxu0 %v8023_v63  ;;  %2928 = vmatprep.subr.bf16.mxu1 %v8026_v0  ;;  %v7512_v63 = vadd.f32 %v9194_v46, %v1192_v58  ;;  %v8107_v0 = vld [vmem:[#allocation7 + $0x3e4] ss:$16 sps:$4 sm:$0xff]   ;;  %v3020_v58 = vld [vmem:[#allocation8 + $0x128] sm:$0xff] }
 0x302   :  { %2847 = vmatpush1.bf16.msra.mxu0 %v8021_v2  ;;  %2929 = vmatpush1.bf16.msra.mxu1 %v8024_v3  ;;  %v8105_v2 = vld [vmem:[#allocation7 + $0x3e0] ss:$16 sps:$4 sm:$0xff]   ;;  %v8108_v3 = vld [vmem:[#allocation7 + $0x3e8] ss:$16 sps:$4 sm:$0xff]  }
 0x303   :  { %2848 = vmatprep.subr.bf16.mxu0 %v8029_v4  ;;  %2930 = vmatprep.subr.bf16.mxu1 %v8032_v8  ;;  %v2007_v4 = vmax.f32 %v7512_v63, 0.0  ;;  %v2984_v8 = vld [vmem:[#allocation8 + $0x8] sm:$0xff] }
 0x305   :  { %v2011_v41 = vpack.c.bf16 %v2007_v4, %v2007_v4  ;;  %v3021_v4 = vld [vmem:[#allocation8 + $0x130] sm:$0xff] }
 0x306   :  { %2849 = vmatpush1.bf16.msra.mxu0 %v8027_v9  ;;  %2931 = vmatpush1.bf16.msra.mxu1 %v8030_v11  ;;  %v2988_v9 = vld [vmem:[#allocation8 + $0x28] sm:$0xff]  ;;  %v2986_v11 = vld [vmem:[#allocation8 + $0x18] sm:$0xff] }
 0x307   :  { %2850 = vmatprep.subr.bf16.mxu0 %v8035_v12  ;;  %2932 = vmatprep.subr.bf16.mxu1 %v8038_v13  ;;  %v9199_v46 = vpack.c.bf16 %v2988_v9, %v2984_v8  ;;  %v2990_v12 = vld [vmem:[#allocation8 + $0x38] sm:$0xff]  ;;  %v2983_v13 = vld [vmem:[#allocation8] sm:$0xff]  ;;  %v3028_v8 = vld [vmem:[#allocation8 + $0x168] sm:$0xff] }
 0x308   :  { %v3026_v9 = vld [vmem:[#allocation8 + $0x158] sm:$0xff] }
 0x30a   :  { %2851 = vmatpush1.bf16.msra.mxu0 %v8033_v14  ;;  %2933 = vmatpush1.bf16.msra.mxu1 %v8036_v15  ;;  %v2987_v14 = vld [vmem:[#allocation8 + $0x20] sm:$0xff]  ;;  %v8610_v15 = vmov 0.0  }
 0x30b   :  { %2852 = vmatprep.subr.bf16.mxu0 %v8041_v16  ;;  %2934 = vmatprep.subr.bf16.mxu1 %v8044_v17  ;;  %v9203_v16 = vpack.c.bf16 %v2990_v12, %v2986_v11  ;;  %v9205_v17 = vpack.c.bf16 %v2987_v14, %v2983_v13  ;;  %v3030_v11 = vld [vmem:[#allocation8 + $0x178] sm:$0xff] }
 0x30e   :  { %2853 = vmatpush1.bf16.msra.mxu0 %v8039_v18  ;;  %2935 = vmatpush1.bf16.msra.mxu1 %v8042_v20  ;;  %v2985_v18 = vld [vmem:[#allocation8 + $0x10] sm:$0xff] }
 0x30f   :  { %2854 = vmatprep.subr.bf16.mxu0 %v8047_v21  ;;  %2936 = vmatprep.subr.bf16.mxu1 %v8050_v23  ;;  %v2989_v20 = vld [vmem:[#allocation8 + $0x30] sm:$0xff]  ;;  %v2992_v21 = vld [vmem:[#allocation8 + $0x48] sm:$0xff] }
 0x310   :  { %v9208_v23 = vpack.c.bf16 %v2989_v20, %v2985_v18  ;;  %v3023_v18 = vld [vmem:[#allocation8 + $0x140] sm:$0xff] }
 0x311   :  { %v3027_v20 = vld [vmem:[#allocation8 + $0x160] sm:$0xff] }
 0x312   :  { %2855 = vmatpush1.bf16.msra.mxu0 %v8045_v24  ;;  %2937 = vmatpush1.bf16.msra.mxu1 %v8048_v25  ;;  %v2996_v24 = vld [vmem:[#allocation8 + $0x68] sm:$0xff]  ;;  %v2994_v25 = vld [vmem:[#allocation8 + $0x58] sm:$0xff] }
 0x313   :  { %2856 = vmatprep.subr.bf16.mxu0 %v8053_v26  ;;  %2938 = vmatprep.subr.bf16.mxu1 %v8056_v27  ;;  %v2998_v26 = vld [vmem:[#allocation8 + $0x78] sm:$0xff]  ;;  %v9212_v27 = vpack.c.bf16 %v2996_v24, %v2992_v21  ;;  %v3025_v21 = vld [vmem:[#allocation8 + $0x150] sm:$0xff]  ;;  %v9261_v24 = vpack.c.bf16 %v3030_v11, %v3026_v9 }
 0x316   :  { %2857 = vmatpush1.bf16.msra.mxu0 %v8051_v28  ;;  %2939 = vmatpush1.bf16.msra.mxu1 %v8054_v37  ;;  %v9214_v28 = vpack.c.bf16 %v2998_v26, %v2994_v25  ;;  %v2991_v37 = vld [vmem:[#allocation8 + $0x40] sm:$0xff]  ;;  %v3029_v25 = vld [vmem:[#allocation8 + $0x170] sm:$0xff]  ;;  %v3032_v26 = vld [vmem:[#allocation8 + $0x188] sm:$0xff] }
 0x317   :  { %2858 = vmatprep.subr.bf16.mxu0 %v8059_v29  ;;  %2940 = vmatprep.subr.bf16.mxu1 %v8062_v30  ;;  %v2995_v29 = vld [vmem:[#allocation8 + $0x60] sm:$0xff]  ;;  %v2993_v30 = vld [vmem:[#allocation8 + $0x50] sm:$0xff] }
 0x31a   :  { %2859 = vmatpush1.bf16.msra.mxu0 %v8057_v31  ;;  %2941 = vmatpush1.bf16.msra.mxu1 %v8060_v32  ;;  %v9217_v31 = vpack.c.bf16 %v2995_v29, %v2991_v37  ;;  %v2997_v32 = vld [vmem:[#allocation8 + $0x70] sm:$0xff]  ;;  %v3036_v37 = vld [vmem:[#allocation8 + $0x1a8] sm:$0xff]  ;;  %v3034_v29 = vld [vmem:[#allocation8 + $0x198] sm:$0xff] }
 0x31b   :  { %2860 = vmatprep.subr.bf16.mxu0 %v8065_v33  ;;  %2942 = vmatprep.subr.bf16.mxu1 %v8068_v34  ;;  %v3000_v33 = vld [vmem:[#allocation8 + $0x88] sm:$0xff] }
 0x31c   :  { %v3004_v34 = vld [vmem:[#allocation8 + $0xa8] sm:$0xff] }
 0x31e   :  { %2861 = vmatpush1.bf16.msra.mxu0 %v8063_v6  ;;  %2943 = vmatpush1.bf16.msra.mxu1 %v8066_v35  ;;  %v9221_v6 = vpack.c.bf16 %v2997_v32, %v2993_v30  ;;  %v9223_v35 = vpack.c.bf16 %v3004_v34, %v3000_v33  ;;  %v3038_v30 = vld [vmem:[#allocation8 + $0x1b8] sm:$0xff]  ;;  %v9264_v32 = vpack.c.bf16 %v3027_v20, %v3023_v18 }
 0x31f   :  { %2862 = vmatprep.subr.bf16.mxu0 %v8071_v36  ;;  %2944 = vmatprep.subr.bf16.mxu1 %v8074_v38  ;;  %v3002_v36 = vld [vmem:[#allocation8 + $0x98] sm:$0xff]  ;;  %v9268_v33 = vpack.c.bf16 %v3029_v25, %v3025_v21  ;;  %v9270_v34 = vpack.c.bf16 %v3036_v37, %v3032_v26 }
 0x320   :  { %v3006_v38 = vld [vmem:[#allocation8 + $0xb8] sm:$0xff] }
 0x322   :  { %2863 = vmatpush1.bf16.msra.mxu0 %v8069_v39  ;;  %2945 = vmatpush1.bf16.msra.mxu1 %v8072_v22  ;;  %v2999_v39 = vld [vmem:[#allocation8 + $0x80] sm:$0xff]  ;;  %v9225_v22 = vpack.c.bf16 %v3006_v38, %v3002_v36 }
 0x323   :  { %2864 = vmatprep.subr.bf16.mxu0 %v8077_v40  ;;  %2946 = vmatprep.subr.bf16.mxu1 %v8080_v42  ;;  %v3003_v40 = vld [vmem:[#allocation8 + $0xa0] sm:$0xff]  ;;  %v3001_v42 = vld [vmem:[#allocation8 + $0x90] sm:$0xff] }
 0x324   :  { %v3031_v36 = vld [vmem:[#allocation8 + $0x180] sm:$0xff] }
 0x325   :  { %v3035_v38 = vld [vmem:[#allocation8 + $0x1a0] sm:$0xff] }
 0x326   :  { %2865 = vmatpush1.bf16.msra.mxu0 %v8075_v43  ;;  %2947 = vmatpush1.bf16.msra.mxu1 %v8078_v44  ;;  %v3005_v43 = vld [vmem:[#allocation8 + $0xb0] sm:$0xff]  ;;  %v9228_v44 = vpack.c.bf16 %v3003_v40, %v2999_v39  ;;  %v9273_v40 = vpack.c.bf16 %v3038_v30, %v3034_v29 }
 0x327   :  { %2866 = vmatprep.subr.bf16.mxu0 %v8083_v45  ;;  %2948 = vmatprep.subr.bf16.mxu1 %v8086_v47  ;;  %v3008_v45 = vld [vmem:[#allocation8 + $0xc8] sm:$0xff]  ;;  %v3033_v39 = vld [vmem:[#allocation8 + $0x190] sm:$0xff] }
 0x328   :  { %v3012_v47 = vld [vmem:[#allocation8 + $0xe8] sm:$0xff] }
 0x32a   :  { %2867 = vmatpush1.bf16.msra.mxu0 %v8081_v48  ;;  %2949 = vmatpush1.bf16.msra.mxu1 %v8084_v49  ;;  %v3010_v48 = vld [vmem:[#allocation8 + $0xd8] sm:$0xff]  ;;  %v9232_v49 = vpack.c.bf16 %v3005_v43, %v3001_v42  ;;  %v3037_v42 = vld [vmem:[#allocation8 + $0x1b0] sm:$0xff]  ;;  %v3040_v43 = vld [vmem:[#allocation8 + $0x1c8] sm:$0xff] }
 0x32b   :  { %2868 = vmatprep.subr.bf16.mxu0 %v8089_v50  ;;  %2950 = vmatprep.subr.bf16.mxu1 %v8092_v51  ;;  %v9234_v50 = vpack.c.bf16 %v3012_v47, %v3008_v45  ;;  %v3014_v51 = vld [vmem:[#allocation8 + $0xf8] sm:$0xff]  ;;  %v3044_v45 = vld [vmem:[#allocation8 + $0x1e8] sm:$0xff] }
 0x32c   :  { %v3042_v47 = vld [vmem:[#allocation8 + $0x1d8] sm:$0xff] }
 0x32e   :  { %2869 = vmatpush1.bf16.msra.mxu0 %v8087_v52  ;;  %2951 = vmatpush1.bf16.msra.mxu1 %v8090_v53  ;;  %v3007_v52 = vld [vmem:[#allocation8 + $0xc0] sm:$0xff] }
 0x32f   :  { %2870 = vmatprep.subr.bf16.mxu0 %v8095_v54  ;;  %2952 = vmatprep.subr.bf16.mxu1 %v8098_v55  ;;  %v3011_v53 = vld [vmem:[#allocation8 + $0xe0] sm:$0xff]  ;;  %v9237_v54 = vpack.c.bf16 %v3014_v51, %v3010_v48  ;;  %v3009_v55 = vld [vmem:[#allocation8 + $0xd0] sm:$0xff]  ;;  %v3046_v48 = vld [vmem:[#allocation8 + $0x1f8] sm:$0xff]  ;;  %v9276_v51 = vpack.c.bf16 %v3035_v38, %v3031_v36 }
 0x332   :  { %2871 = vmatpush1.bf16.msra.mxu0 %v8093_v56  ;;  %2953 = vmatpush1.bf16.msra.mxu1 %v8096_v57  ;;  %v3013_v56 = vld [vmem:[#allocation8 + $0xf0] sm:$0xff]  ;;  %v3016_v57 = vld [vmem:[#allocation8 + $0x108] sm:$0xff] }
 0x333   :  { %2872 = vmatprep.subr.bf16.mxu0 %v8101_v59  ;;  %2954 = vmatprep.subr.bf16.mxu1 %v8104_v60  ;;  %v3018_v59 = vld [vmem:[#allocation8 + $0x118] sm:$0xff]  ;;  %v9246_v63 = vpack.c.bf16 %v3020_v58, %v3016_v57  ;;  %v9285_v57 = vpack.c.bf16 %v3046_v48, %v3042_v47  ;;  %v3041_v58 = vld [vmem:[#allocation8 + $0x1d0] sm:$0xff] }
 0x334   :  { %v3022_v60 = vld [vmem:[#allocation8 + $0x138] sm:$0xff] }
 0x336   :  { %2873 = vmatpush1.bf16.msra.mxu0 %v8099_v61  ;;  %2955 = vmatpush1.bf16.msra.mxu1 %v8102_v62  ;;  %v9240_v61 = vpack.c.bf16 %v3011_v53, %v3007_v52  ;;  %v9244_v62 = vpack.c.bf16 %v3013_v56, %v3009_v55  ;;  %v9280_v52 = vpack.c.bf16 %v3037_v42, %v3033_v39  ;;  %v3039_v55 = vld [vmem:[#allocation8 + $0x1c0] sm:$0xff] }
 0x337   :  { %2874 = vmatprep.subr.bf16.mxu0 %v8107_v0  ;;  %2956 = vmatprep.subr.bf16.mxu1 %v8110_v1  ;;  %v3015_v0 = vld [vmem:[#allocation8 + $0x100] sm:$0xff]  ;;  %v9282_v53 = vpack.c.bf16 %v3044_v45, %v3040_v43 }
 0x338   :  { %v3019_v1 = vld [vmem:[#allocation8 + $0x120] sm:$0xff] }
 0x339   :  { %v9252_v12 = vpack.c.bf16 %v3019_v1, %v3015_v0  ;;  %v3043_v56 = vld [vmem:[#allocation8 + $0x1e0] sm:$0xff] }
 0x33a   :  { %2875 = vmatpush1.bf16.msra.mxu0 %v8105_v2  ;;  %2957 = vmatpush1.bf16.msra.mxu1 %v8108_v3  ;;  %v3017_v2 = vld [vmem:[#allocation8 + $0x110] sm:$0xff]  ;;  %v9249_v3 = vpack.c.bf16 %v3022_v60, %v3018_v59  ;;  %v9288_v60 = vpack.c.bf16 %v3043_v56, %v3039_v55  ;;  %v2141_v1 = vld [vmem:[#allocation10] sm:$0xf] }
 0x33b   :  { %6547 = vmatprep.subr.bf16.mxu0 %v9199_v46  ;;  %6579 = vmatprep.subr.bf16.mxu1 %v9203_v16  ;;  %v9256_v13 = vpack.c.bf16 %v3021_v4, %v3017_v2  ;;  %v3045_v59 = vld [vmem:[#allocation8 + $0x1f0] sm:$0xff]  ;;  %v2146_v2 = vrot.slane %v2141_v1, %v9159_v5  ;;  %v2150_v4 = vrot.slane %v2141_v1, %v9167_v7 }
 0x33c   :  { %v9292_v0 = vpack.c.bf16 %v3045_v59, %v3041_v58  ;;  %v2158_v9 = vrot.slane %v2141_v1, %v9174_v10  ;;  %v2154_v5 = vrot.slane %v2141_v1, %v9181_v19 }
 0x33d   :  { %2877 = vmatmul.mubr.bf16.vlgmr.msra.gmra.mrb[8].mxu0 %v2011_v41  ;;  %2959 = vmatmul.mubr.bf16.vlgmr.msra.gmra.mrb[8].mxu1 %v2011_v41  ;;  %v3024_v41 = vld [vmem:[#allocation8 + $0x148] sm:$0xff] }
 0x33e   :  { %3111 = vmatprep.mubr.f32.mxu0 %v8610_v15  ;;  %3182 = vmatprep.mubr.f32.mxu1 %v8610_v15  ;;  %v9258_v14 = vpack.c.bf16 %v3028_v8, %v3024_v41 }
 0x33f   :  { %6549 = vmatpush1.bf16.msra.mxu0 %v9205_v17  ;;  %6581 = vmatpush1.bf16.msra.mxu1 %v9208_v23 }
 0x340   :  { %6551 = vmatprep.subr.bf16.mxu0 %v9212_v27  ;;  %6583 = vmatprep.subr.bf16.mxu1 %v9214_v28 }
 0x343   :  { %6553 = vmatpush1.bf16.msra.mxu0 %v9217_v31  ;;  %6585 = vmatpush1.bf16.msra.mxu1 %v9221_v6 }
 0x344   :  { %6555 = vmatprep.subr.bf16.mxu0 %v9223_v35  ;;  %6587 = vmatprep.subr.bf16.mxu1 %v9225_v22 }
 0x347   :  { %6557 = vmatpush1.bf16.msra.mxu0 %v9228_v44  ;;  %6589 = vmatpush1.bf16.msra.mxu1 %v9232_v49 }
 0x348   :  { %6559 = vmatprep.subr.bf16.mxu0 %v9234_v50  ;;  %6591 = vmatprep.subr.bf16.mxu1 %v9237_v54 }
 0x34b   :  { %6561 = vmatpush1.bf16.msra.mxu0 %v9240_v61  ;;  %6593 = vmatpush1.bf16.msra.mxu1 %v9244_v62 }
 0x34c   :  { %6563 = vmatprep.subr.bf16.mxu0 %v9246_v63  ;;  %6595 = vmatprep.subr.bf16.mxu1 %v9249_v3 }
 0x34f   :  { %6565 = vmatpush1.bf16.msra.mxu0 %v9252_v12  ;;  %6597 = vmatpush1.bf16.msra.mxu1 %v9256_v13 }
 0x350   :  { %6567 = vmatprep.subr.bf16.mxu0 %v9258_v14  ;;  %6599 = vmatprep.subr.bf16.mxu1 %v9261_v24 }
 0x353   :  { %6569 = vmatpush1.bf16.msra.mxu0 %v9264_v32  ;;  %6601 = vmatpush1.bf16.msra.mxu1 %v9268_v33 }
 0x354   :  { %6571 = vmatprep.subr.bf16.mxu0 %v9270_v34  ;;  %6603 = vmatprep.subr.bf16.mxu1 %v9273_v40 }
 0x357   :  { %6573 = vmatpush1.bf16.msra.mxu0 %v9276_v51  ;;  %6605 = vmatpush1.bf16.msra.mxu1 %v9280_v52 }
 0x358   :  { %6575 = vmatprep.subr.bf16.mxu0 %v9282_v53  ;;  %6607 = vmatprep.subr.bf16.mxu1 %v9285_v57 }
 0x35b   :  { %6577 = vmatpush1.bf16.msra.mxu0 %v9288_v60  ;;  %6609 = vmatpush1.bf16.msra.mxu1 %v9292_v0 }
 0x35c   :  { %6611 = vmatprep.subr.bf16.mxu0 %v9199_v46  ;;  %6643 = vmatprep.subr.bf16.mxu1 %v9203_v16 }
 0x410   :  { %v2878_v41 = vpop.f32.mrb[8].mxu0  ;;  %v2960_v8 = vpop.f32.mrb[8].mxu1 }
 0x411   :  { %v9302_v11 = vadd.f32 %v2878_v41, %v2146_v2  ;;  %v2880_v18 = vpop.f32.mrb[9].mxu0  ;;  %v2962_v20 = vpop.f32.mrb[9].mxu1  ;;  %v9311_v10 = vadd.f32 %v2960_v8, %v2154_v5 }
 0x412   :  { %v9304_v21 = vadd.f32 %v2880_v18, %v2150_v4  ;;  %v2882_v25 = vpop.f32.mrb[10].mxu0  ;;  %v2964_v26 = vpop.f32.mrb[10].mxu1  ;;  %v9307_v36 = vadd.f32 %v2962_v20, %v2158_v9 }
 0x413   :  { %v2883_v37 = vpop.f32.mrb[11].mxu0  ;;  %v2965_v29 = vpop.f32.mrb[11].mxu1  ;;  %v6376_v30 = vmul.f32 -1.442695, %v9302_v11 }
 0x414   :  { %v6377_v7 = vmul.f32 -1.442695, %v9307_v36 }
 0x415   :  { %8135 = vpow2.f32 %v6376_v30 }
 0x416   :  { %8137 = vpow2.f32 %v6377_v7 }
 0x417   :  { %8139 = vtanh.f32 %v9311_v10 }
 0x41f   :  { %v8136_v38 = vpop.eup %8135 }
 0x420   :  { %v2970_v39 = vadd.f32 1.0, %v8136_v38  ;;  %v8138_v42 = vpop.eup %8137 }
 0x421   :  { %v2977_v43 = vadd.f32 1.0, %v8138_v42  ;;  %v8140_v45 = vpop.eup %8139 }
 0x422   :  { %8141 = vrcp.f32 %v2970_v39 }
 0x423   :  { %8143 = vrcp.f32 %v2977_v43 }
 0x42c   :  { %v8142_v47 = vpop.eup %8141 }
 0x42d   :  { %v9314_v48 = vmul.f32 %v8142_v47, %v8140_v45  ;;  %v8144_v19 = vpop.eup %8143 }
 0x42f   :  { %8145 = vtanh.f32 %v9314_v48 }
 0x439   :  { %v8146_v55 = vpop.eup %8145 }
 0x43a   :  { %v2982_v56 = vmul.f32 %v8146_v55, %v8144_v19 }
 0x43c   :  { %3112 = vmatmul.mubr.f32.vlgmr.msra.gmra.mrb[12].mxu0 %v2982_v56  ;;  %3183 = vmatmul.mubr.f32.vlgmr.msra.gmra.mrb[12].mxu1 %v2982_v56 }
 0x43d   :  { %6613 = vmatpush1.bf16.msra.mxu0 %v9205_v17  ;;  %6645 = vmatpush1.bf16.msra.mxu1 %v9208_v23 }
 0x43e   :  { %6615 = vmatprep.subr.bf16.mxu0 %v9212_v27  ;;  %6647 = vmatprep.subr.bf16.mxu1 %v9214_v28 }
 0x43f   :  { %3281 = vmatprep.mubr.f32.mxu0 %v8610_v15  ;;  %3352 = vmatprep.mubr.f32.mxu1 %v8610_v15 }
 0x441   :  { %6617 = vmatpush1.bf16.msra.mxu0 %v9217_v31  ;;  %6649 = vmatpush1.bf16.msra.mxu1 %v9221_v6 }
 0x442   :  { %6619 = vmatprep.subr.bf16.mxu0 %v9223_v35  ;;  %6651 = vmatprep.subr.bf16.mxu1 %v9225_v22 }
 0x445   :  { %6621 = vmatpush1.bf16.msra.mxu0 %v9228_v44  ;;  %6653 = vmatpush1.bf16.msra.mxu1 %v9232_v49 }
 0x446   :  { %6623 = vmatprep.subr.bf16.mxu0 %v9234_v50  ;;  %6655 = vmatprep.subr.bf16.mxu1 %v9237_v54 }
 0x449   :  { %6625 = vmatpush1.bf16.msra.mxu0 %v9240_v61  ;;  %6657 = vmatpush1.bf16.msra.mxu1 %v9244_v62 }
 0x44a   :  { %6627 = vmatprep.subr.bf16.mxu0 %v9246_v63  ;;  %6659 = vmatprep.subr.bf16.mxu1 %v9249_v3 }
 0x44d   :  { %6629 = vmatpush1.bf16.msra.mxu0 %v9252_v12  ;;  %6661 = vmatpush1.bf16.msra.mxu1 %v9256_v13 }
 0x44e   :  { %6631 = vmatprep.subr.bf16.mxu0 %v9258_v14  ;;  %6663 = vmatprep.subr.bf16.mxu1 %v9261_v24 }
 0x451   :  { %6633 = vmatpush1.bf16.msra.mxu0 %v9264_v32  ;;  %6665 = vmatpush1.bf16.msra.mxu1 %v9268_v33 }
 0x452   :  { %6635 = vmatprep.subr.bf16.mxu0 %v9270_v34  ;;  %6667 = vmatprep.subr.bf16.mxu1 %v9273_v40 }
 0x455   :  { %6637 = vmatpush1.bf16.msra.mxu0 %v9276_v51  ;;  %6669 = vmatpush1.bf16.msra.mxu1 %v9280_v52 }
 0x456   :  { %6639 = vmatprep.subr.bf16.mxu0 %v9282_v53  ;;  %6671 = vmatprep.subr.bf16.mxu1 %v9285_v57 }
 0x459   :  { %6641 = vmatpush1.bf16.msra.mxu0 %v9288_v60  ;;  %6673 = vmatpush1.bf16.msra.mxu1 %v9292_v0 }
 0x45a   :  { %6675 = vmatprep.subr.bf16.mxu0 %v9199_v46  ;;  %6707 = vmatprep.subr.bf16.mxu1 %v9203_v16 }
 0x50f   :  { %v3113_v58 = vpop.f32.mrb[12].mxu0  ;;  %v3184_v59 = vpop.f32.mrb[12].mxu1 }
 0x510   :  { %v3189_v1 = vadd.f32 %v9302_v11, %v3113_v58  ;;  %v3115_v2 = vpop.f32.mrb[13].mxu0  ;;  %v3186_v4 = vpop.f32.mrb[13].mxu1  ;;  %v3191_v25 = vadd.f32 %v9311_v10, %v3184_v59 }
 0x511   :  { %v3190_v41 = vadd.f32 %v9304_v21, %v3115_v2  ;;  %v3192_v18 = vadd.f32 %v9307_v36, %v3186_v4 }
 0x512   :  { %v6378_v8 = vmul.f32 -1.442695, %v3189_v1 }
 0x513   :  { %v6379_v9 = vmul.f32 -1.442695, %v3190_v41  ;;  %v6380_v20 = vmul.f32 -1.442695, %v3192_v18 }
 0x514   :  { %8147 = vpow2.f32 %v6378_v8 }
 0x515   :  { %8149 = vpow2.f32 %v6379_v9 }
 0x516   :  { %8151 = vpow2.f32 %v6380_v20 }
 0x517   :  { %8153 = vtanh.f32 %v3191_v25 }
 0x51e   :  { %v8148_v26 = vpop.eup %8147 }
 0x51f   :  { %v8150_v37 = vpop.eup %8149  ;;  %v3196_v29 = vadd.f32 1.0, %v8148_v26 }
 0x520   :  { %v3202_v30 = vadd.f32 1.0, %v8150_v37  ;;  %v8152_v5 = vpop.eup %8151 }
 0x521   :  { %8155 = vrcp.f32 %v3196_v29  ;;  %v8154_v7 = vpop.eup %8153  ;;  %v3209_v43 = vadd.f32 1.0, %v8152_v5 }
 0x522   :  { %8157 = vrcp.f32 %v3202_v30 }
 0x523   :  { %8159 = vrcp.f32 %v3209_v43 }
 0x52b   :  { %v8156_v38 = vpop.eup %8155 }
 0x52c   :  { %v8158_v39 = vpop.eup %8157  ;;  %v3213_v42 = vmul.f32 %v8156_v38, %v8154_v7 }
 0x52d   :  { %v3212_v45 = vmul.f32 %v8158_v39, %v9314_v48  ;;  %v8160_v19 = vpop.eup %8159 }
 0x52f   :  { %v9356_v47 = vadd.f32 %v3213_v42, %v3212_v45 }
 0x531   :  { %8161 = vtanh.f32 %v9356_v47 }
 0x53b   :  { %v8162_v55 = vpop.eup %8161 }
 0x53c   :  { %v3216_v56 = vmul.f32 %v8162_v55, %v8160_v19 }
 0x53e   :  { %3282 = vmatmul.mubr.f32.vlgmr.msra.gmra.mrb[14].mxu0 %v3216_v56  ;;  %3353 = vmatmul.mubr.f32.vlgmr.msra.gmra.mrb[14].mxu1 %v3216_v56 }
 0x53f   :  { %6677 = vmatpush1.bf16.msra.mxu0 %v9205_v17  ;;  %6709 = vmatpush1.bf16.msra.mxu1 %v9208_v23 }
 0x540   :  { %6679 = vmatprep.subr.bf16.mxu0 %v9212_v27  ;;  %6711 = vmatprep.subr.bf16.mxu1 %v9214_v28 }
 0x541   :  { %3451 = vmatprep.mubr.f32.mxu0 %v8610_v15  ;;  %3522 = vmatprep.mubr.f32.mxu1 %v8610_v15 }
 0x543   :  { %6681 = vmatpush1.bf16.msra.mxu0 %v9217_v31  ;;  %6713 = vmatpush1.bf16.msra.mxu1 %v9221_v6 }
 0x544   :  { %6683 = vmatprep.subr.bf16.mxu0 %v9223_v35  ;;  %6715 = vmatprep.subr.bf16.mxu1 %v9225_v22 }
 0x547   :  { %6685 = vmatpush1.bf16.msra.mxu0 %v9228_v44  ;;  %6717 = vmatpush1.bf16.msra.mxu1 %v9232_v49 }
 0x548   :  { %6687 = vmatprep.subr.bf16.mxu0 %v9234_v50  ;;  %6719 = vmatprep.subr.bf16.mxu1 %v9237_v54 }
 0x54b   :  { %6689 = vmatpush1.bf16.msra.mxu0 %v9240_v61  ;;  %6721 = vmatpush1.bf16.msra.mxu1 %v9244_v62 }
 0x54c   :  { %6691 = vmatprep.subr.bf16.mxu0 %v9246_v63  ;;  %6723 = vmatprep.subr.bf16.mxu1 %v9249_v3 }
 0x54f   :  { %6693 = vmatpush1.bf16.msra.mxu0 %v9252_v12  ;;  %6725 = vmatpush1.bf16.msra.mxu1 %v9256_v13 }
 0x550   :  { %6695 = vmatprep.subr.bf16.mxu0 %v9258_v14  ;;  %6727 = vmatprep.subr.bf16.mxu1 %v9261_v24 }
 0x553   :  { %6697 = vmatpush1.bf16.msra.mxu0 %v9264_v32  ;;  %6729 = vmatpush1.bf16.msra.mxu1 %v9268_v33 }
 0x554   :  { %6699 = vmatprep.subr.bf16.mxu0 %v9270_v34  ;;  %6731 = vmatprep.subr.bf16.mxu1 %v9273_v40 }
 0x557   :  { %6701 = vmatpush1.bf16.msra.mxu0 %v9276_v51  ;;  %6733 = vmatpush1.bf16.msra.mxu1 %v9280_v52 }
 0x558   :  { %6703 = vmatprep.subr.bf16.mxu0 %v9282_v53  ;;  %6735 = vmatprep.subr.bf16.mxu1 %v9285_v57 }
 0x55b   :  { %6705 = vmatpush1.bf16.msra.mxu0 %v9288_v60  ;;  %6737 = vmatpush1.bf16.msra.mxu1 %v9292_v0 }
 0x55c   :  { %6739 = vmatprep.subr.bf16.mxu0 %v9199_v46  ;;  %6771 = vmatprep.subr.bf16.mxu1 %v9203_v16 }
 0x611   :  { %v3283_v48 = vpop.f32.mrb[14].mxu0  ;;  %v3354_v58 = vpop.f32.mrb[14].mxu1 }
 0x612   :  { %v3359_v59 = vadd.f32 %v9302_v11, %v3283_v48  ;;  %v3285_v1 = vpop.f32.mrb[15].mxu0  ;;  %v3356_v2 = vpop.f32.mrb[15].mxu1  ;;  %v3361_v20 = vadd.f32 %v9311_v10, %v3354_v58 }
 0x613   :  { %v3360_v4 = vadd.f32 %v9304_v21, %v3285_v1  ;;  %v3362_v9 = vadd.f32 %v9307_v36, %v3356_v2 }
 0x614   :  { %v6381_v41 = vmul.f32 -1.442695, %v3359_v59 }
 0x615   :  { %v6382_v8 = vmul.f32 -1.442695, %v3360_v4  ;;  %v6383_v18 = vmul.f32 -1.442695, %v3362_v9 }
 0x616   :  { %8163 = vpow2.f32 %v6381_v41 }
 0x617   :  { %8165 = vpow2.f32 %v6382_v8 }
 0x618   :  { %8167 = vpow2.f32 %v6383_v18 }
 0x619   :  { %8169 = vtanh.f32 %v3361_v20 }
 0x620   :  { %v8164_v25 = vpop.eup %8163 }
 0x621   :  { %v8166_v26 = vpop.eup %8165  ;;  %v3366_v37 = vadd.f32 1.0, %v8164_v25 }
 0x622   :  { %v3372_v29 = vadd.f32 1.0, %v8166_v26  ;;  %v8168_v30 = vpop.eup %8167 }
 0x623   :  { %8171 = vrcp.f32 %v3366_v37  ;;  %v8170_v5 = vpop.eup %8169  ;;  %v3379_v42 = vadd.f32 1.0, %v8168_v30 }
 0x624   :  { %8173 = vrcp.f32 %v3372_v29 }
 0x625   :  { %8175 = vrcp.f32 %v3379_v42 }
 0x62d   :  { %v8172_v7 = vpop.eup %8171 }
 0x62e   :  { %v8174_v38 = vpop.eup %8173  ;;  %v3383_v39 = vmul.f32 %v8172_v7, %v8170_v5 }
 0x62f   :  { %v3382_v43 = vmul.f32 %v8174_v38, %v9356_v47  ;;  %v8176_v19 = vpop.eup %8175 }
 0x631   :  { %v9398_v45 = vadd.f32 %v3383_v39, %v3382_v43 }
 0x633   :  { %8177 = vtanh.f32 %v9398_v45 }
 0x63d   :  { %v8178_v55 = vpop.eup %8177 }
 0x63e   :  { %v3386_v56 = vmul.f32 %v8178_v55, %v8176_v19 }
 0x640   :  { %3452 = vmatmul.mubr.f32.vlgmr.msra.gmra.mrb[16].mxu0 %v3386_v56  ;;  %3523 = vmatmul.mubr.f32.vlgmr.msra.gmra.mrb[16].mxu1 %v3386_v56 }
 0x641   :  { %6741 = vmatpush1.bf16.msra.mxu0 %v9205_v17  ;;  %6773 = vmatpush1.bf16.msra.mxu1 %v9208_v23 }
 0x642   :  { %6743 = vmatprep.subr.bf16.mxu0 %v9212_v27  ;;  %6775 = vmatprep.subr.bf16.mxu1 %v9214_v28 }
 0x643   :  { %3621 = vmatprep.mubr.f32.mxu0 %v8610_v15  ;;  %3692 = vmatprep.mubr.f32.mxu1 %v8610_v15 }
 0x645   :  { %6745 = vmatpush1.bf16.msra.mxu0 %v9217_v31  ;;  %6777 = vmatpush1.bf16.msra.mxu1 %v9221_v6 }
 0x646   :  { %6747 = vmatprep.subr.bf16.mxu0 %v9223_v35  ;;  %6779 = vmatprep.subr.bf16.mxu1 %v9225_v22 }
 0x649   :  { %6749 = vmatpush1.bf16.msra.mxu0 %v9228_v44  ;;  %6781 = vmatpush1.bf16.msra.mxu1 %v9232_v49 }
 0x64a   :  { %6751 = vmatprep.subr.bf16.mxu0 %v9234_v50  ;;  %6783 = vmatprep.subr.bf16.mxu1 %v9237_v54 }
 0x64d   :  { %6753 = vmatpush1.bf16.msra.mxu0 %v9240_v61  ;;  %6785 = vmatpush1.bf16.msra.mxu1 %v9244_v62 }
 0x64e   :  { %6755 = vmatprep.subr.bf16.mxu0 %v9246_v63  ;;  %6787 = vmatprep.subr.bf16.mxu1 %v9249_v3 }
 0x651   :  { %6757 = vmatpush1.bf16.msra.mxu0 %v9252_v12  ;;  %6789 = vmatpush1.bf16.msra.mxu1 %v9256_v13 }
 0x652   :  { %6759 = vmatprep.subr.bf16.mxu0 %v9258_v14  ;;  %6791 = vmatprep.subr.bf16.mxu1 %v9261_v24 }
 0x655   :  { %6761 = vmatpush1.bf16.msra.mxu0 %v9264_v32  ;;  %6793 = vmatpush1.bf16.msra.mxu1 %v9268_v33 }
 0x656   :  { %6763 = vmatprep.subr.bf16.mxu0 %v9270_v34  ;;  %6795 = vmatprep.subr.bf16.mxu1 %v9273_v40 }
 0x659   :  { %6765 = vmatpush1.bf16.msra.mxu0 %v9276_v51  ;;  %6797 = vmatpush1.bf16.msra.mxu1 %v9280_v52 }
 0x65a   :  { %6767 = vmatprep.subr.bf16.mxu0 %v9282_v53  ;;  %6799 = vmatprep.subr.bf16.mxu1 %v9285_v57 }
 0x65d   :  { %6769 = vmatpush1.bf16.msra.mxu0 %v9288_v60  ;;  %6801 = vmatpush1.bf16.msra.mxu1 %v9292_v0 }
 0x65e   :  { %6803 = vmatprep.subr.bf16.mxu0 %v9199_v46  ;;  %6835 = vmatprep.subr.bf16.mxu1 %v9203_v16 }
 0x713   :  { %v3453_v47 = vpop.f32.mrb[16].mxu0  ;;  %v3524_v48 = vpop.f32.mrb[16].mxu1 }
 0x714   :  { %v3529_v58 = vadd.f32 %v9302_v11, %v3453_v47  ;;  %v3455_v59 = vpop.f32.mrb[17].mxu0  ;;  %v3526_v1 = vpop.f32.mrb[17].mxu1  ;;  %v3531_v18 = vadd.f32 %v9311_v10, %v3524_v48 }
 0x715   :  { %v3530_v2 = vadd.f32 %v9304_v21, %v3455_v59  ;;  %v3532_v8 = vadd.f32 %v9307_v36, %v3526_v1 }
 0x716   :  { %v6384_v4 = vmul.f32 -1.442695, %v3529_v58 }
 0x717   :  { %v6385_v41 = vmul.f32 -1.442695, %v3530_v2  ;;  %v6386_v9 = vmul.f32 -1.442695, %v3532_v8 }
 0x718   :  { %8179 = vpow2.f32 %v6384_v4 }
 0x719   :  { %8181 = vpow2.f32 %v6385_v41 }
 0x71a   :  { %8183 = vpow2.f32 %v6386_v9 }
 0x71b   :  { %8185 = vtanh.f32 %v3531_v18 }
 0x722   :  { %v8180_v20 = vpop.eup %8179 }
 0x723   :  { %v8182_v25 = vpop.eup %8181  ;;  %v3536_v26 = vadd.f32 1.0, %v8180_v20 }
 0x724   :  { %v3542_v37 = vadd.f32 1.0, %v8182_v25  ;;  %v8184_v29 = vpop.eup %8183 }
 0x725   :  { %8187 = vrcp.f32 %v3536_v26  ;;  %v8186_v30 = vpop.eup %8185  ;;  %v3549_v39 = vadd.f32 1.0, %v8184_v29 }
 0x726   :  { %8189 = vrcp.f32 %v3542_v37 }
 0x727   :  { %8191 = vrcp.f32 %v3549_v39 }
 0x72f   :  { %v8188_v5 = vpop.eup %8187 }
 0x730   :  { %v8190_v7 = vpop.eup %8189  ;;  %v3553_v38 = vmul.f32 %v8188_v5, %v8186_v30 }
 0x731   :  { %v3552_v42 = vmul.f32 %v8190_v7, %v9398_v45  ;;  %v8192_v19 = vpop.eup %8191 }
 0x733   :  { %v9440_v43 = vadd.f32 %v3553_v38, %v3552_v42 }
 0x735   :  { %8193 = vtanh.f32 %v9440_v43 }
 0x73f   :  { %v8194_v55 = vpop.eup %8193 }
 0x740   :  { %v3556_v56 = vmul.f32 %v8194_v55, %v8192_v19 }
 0x742   :  { %3622 = vmatmul.mubr.f32.vlgmr.msra.gmra.mrb[18].mxu0 %v3556_v56  ;;  %3693 = vmatmul.mubr.f32.vlgmr.msra.gmra.mrb[18].mxu1 %v3556_v56 }
 0x743   :  { %6805 = vmatpush1.bf16.msra.mxu0 %v9205_v17  ;;  %6837 = vmatpush1.bf16.msra.mxu1 %v9208_v23 }
 0x744   :  { %6807 = vmatprep.subr.bf16.mxu0 %v9212_v27  ;;  %6839 = vmatprep.subr.bf16.mxu1 %v9214_v28 }
 0x745   :  { %3791 = vmatprep.mubr.f32.mxu0 %v8610_v15  ;;  %3862 = vmatprep.mubr.f32.mxu1 %v8610_v15 }
 0x747   :  { %6809 = vmatpush1.bf16.msra.mxu0 %v9217_v31  ;;  %6841 = vmatpush1.bf16.msra.mxu1 %v9221_v6 }
 0x748   :  { %6811 = vmatprep.subr.bf16.mxu0 %v9223_v35  ;;  %6843 = vmatprep.subr.bf16.mxu1 %v9225_v22 }
 0x74b   :  { %6813 = vmatpush1.bf16.msra.mxu0 %v9228_v44  ;;  %6845 = vmatpush1.bf16.msra.mxu1 %v9232_v49 }
 0x74c   :  { %6815 = vmatprep.subr.bf16.mxu0 %v9234_v50  ;;  %6847 = vmatprep.subr.bf16.mxu1 %v9237_v54 }
 0x74f   :  { %6817 = vmatpush1.bf16.msra.mxu0 %v9240_v61  ;;  %6849 = vmatpush1.bf16.msra.mxu1 %v9244_v62 }
 0x750   :  { %6819 = vmatprep.subr.bf16.mxu0 %v9246_v63  ;;  %6851 = vmatprep.subr.bf16.mxu1 %v9249_v3 }
 0x753   :  { %6821 = vmatpush1.bf16.msra.mxu0 %v9252_v12  ;;  %6853 = vmatpush1.bf16.msra.mxu1 %v9256_v13 }
 0x754   :  { %6823 = vmatprep.subr.bf16.mxu0 %v9258_v14  ;;  %6855 = vmatprep.subr.bf16.mxu1 %v9261_v24 }
 0x757   :  { %6825 = vmatpush1.bf16.msra.mxu0 %v9264_v32  ;;  %6857 = vmatpush1.bf16.msra.mxu1 %v9268_v33 }
 0x758   :  { %6827 = vmatprep.subr.bf16.mxu0 %v9270_v34  ;;  %6859 = vmatprep.subr.bf16.mxu1 %v9273_v40 }
 0x75b   :  { %6829 = vmatpush1.bf16.msra.mxu0 %v9276_v51  ;;  %6861 = vmatpush1.bf16.msra.mxu1 %v9280_v52 }
 0x75c   :  { %6831 = vmatprep.subr.bf16.mxu0 %v9282_v53  ;;  %6863 = vmatprep.subr.bf16.mxu1 %v9285_v57 }
 0x75f   :  { %6833 = vmatpush1.bf16.msra.mxu0 %v9288_v60  ;;  %6865 = vmatpush1.bf16.msra.mxu1 %v9292_v0 }
 0x760   :  { %6867 = vmatprep.subr.bf16.mxu0 %v9199_v46  ;;  %6899 = vmatprep.subr.bf16.mxu1 %v9203_v16 }
 0x815   :  { %v3623_v45 = vpop.f32.mrb[18].mxu0  ;;  %v3694_v47 = vpop.f32.mrb[18].mxu1 }
 0x816   :  { %v3699_v48 = vadd.f32 %v9302_v11, %v3623_v45  ;;  %v3625_v58 = vpop.f32.mrb[19].mxu0  ;;  %v3696_v59 = vpop.f32.mrb[19].mxu1  ;;  %v3701_v9 = vadd.f32 %v9311_v10, %v3694_v47 }
 0x817   :  { %v3700_v1 = vadd.f32 %v9304_v21, %v3625_v58  ;;  %v3702_v41 = vadd.f32 %v9307_v36, %v3696_v59 }
 0x818   :  { %v6387_v2 = vmul.f32 -1.442695, %v3699_v48 }
 0x819   :  { %v6388_v4 = vmul.f32 -1.442695, %v3700_v1  ;;  %v6389_v8 = vmul.f32 -1.442695, %v3702_v41 }
 0x81a   :  { %8195 = vpow2.f32 %v6387_v2 }
 0x81b   :  { %8197 = vpow2.f32 %v6388_v4 }
 0x81c   :  { %8199 = vpow2.f32 %v6389_v8 }
 0x81d   :  { %8201 = vtanh.f32 %v3701_v9 }
 0x824   :  { %v8196_v18 = vpop.eup %8195 }
 0x825   :  { %v8198_v20 = vpop.eup %8197  ;;  %v3706_v25 = vadd.f32 1.0, %v8196_v18 }
 0x826   :  { %v3712_v26 = vadd.f32 1.0, %v8198_v20  ;;  %v8200_v37 = vpop.eup %8199 }
 0x827   :  { %8203 = vrcp.f32 %v3706_v25  ;;  %v8202_v29 = vpop.eup %8201  ;;  %v3719_v38 = vadd.f32 1.0, %v8200_v37 }
 0x828   :  { %8205 = vrcp.f32 %v3712_v26 }
 0x829   :  { %8207 = vrcp.f32 %v3719_v38 }
 0x831   :  { %v8204_v30 = vpop.eup %8203 }
 0x832   :  { %v8206_v5 = vpop.eup %8205  ;;  %v3723_v7 = vmul.f32 %v8204_v30, %v8202_v29 }
 0x833   :  { %v3722_v39 = vmul.f32 %v8206_v5, %v9440_v43  ;;  %v8208_v19 = vpop.eup %8207 }
 0x835   :  { %v9482_v42 = vadd.f32 %v3723_v7, %v3722_v39 }
 0x837   :  { %8209 = vtanh.f32 %v9482_v42 }
 0x841   :  { %v8210_v55 = vpop.eup %8209 }
 0x842   :  { %v3726_v56 = vmul.f32 %v8210_v55, %v8208_v19 }
 0x844   :  { %3792 = vmatmul.mubr.f32.vlgmr.msra.gmra.mrb[20].mxu0 %v3726_v56  ;;  %3863 = vmatmul.mubr.f32.vlgmr.msra.gmra.mrb[20].mxu1 %v3726_v56 }
 0x845   :  { %6869 = vmatpush1.bf16.msra.mxu0 %v9205_v17  ;;  %6901 = vmatpush1.bf16.msra.mxu1 %v9208_v23 }
 0x846   :  { %6871 = vmatprep.subr.bf16.mxu0 %v9212_v27  ;;  %6903 = vmatprep.subr.bf16.mxu1 %v9214_v28 }
 0x847   :  { %3961 = vmatprep.mubr.f32.mxu0 %v8610_v15  ;;  %4032 = vmatprep.mubr.f32.mxu1 %v8610_v15 }
 0x849   :  { %6873 = vmatpush1.bf16.msra.mxu0 %v9217_v31  ;;  %6905 = vmatpush1.bf16.msra.mxu1 %v9221_v6 }
 0x84a   :  { %6875 = vmatprep.subr.bf16.mxu0 %v9223_v35  ;;  %6907 = vmatprep.subr.bf16.mxu1 %v9225_v22 }
 0x84d   :  { %6877 = vmatpush1.bf16.msra.mxu0 %v9228_v44  ;;  %6909 = vmatpush1.bf16.msra.mxu1 %v9232_v49 }
 0x84e   :  { %6879 = vmatprep.subr.bf16.mxu0 %v9234_v50  ;;  %6911 = vmatprep.subr.bf16.mxu1 %v9237_v54 }
 0x851   :  { %6881 = vmatpush1.bf16.msra.mxu0 %v9240_v61  ;;  %6913 = vmatpush1.bf16.msra.mxu1 %v9244_v62 }
 0x852   :  { %6883 = vmatprep.subr.bf16.mxu0 %v9246_v63  ;;  %6915 = vmatprep.subr.bf16.mxu1 %v9249_v3 }
 0x855   :  { %6885 = vmatpush1.bf16.msra.mxu0 %v9252_v12  ;;  %6917 = vmatpush1.bf16.msra.mxu1 %v9256_v13 }
 0x856   :  { %6887 = vmatprep.subr.bf16.mxu0 %v9258_v14  ;;  %6919 = vmatprep.subr.bf16.mxu1 %v9261_v24 }
 0x859   :  { %6889 = vmatpush1.bf16.msra.mxu0 %v9264_v32  ;;  %6921 = vmatpush1.bf16.msra.mxu1 %v9268_v33 }
 0x85a   :  { %6891 = vmatprep.subr.bf16.mxu0 %v9270_v34  ;;  %6923 = vmatprep.subr.bf16.mxu1 %v9273_v40 }
 0x85d   :  { %6893 = vmatpush1.bf16.msra.mxu0 %v9276_v51  ;;  %6925 = vmatpush1.bf16.msra.mxu1 %v9280_v52 }
 0x85e   :  { %6895 = vmatprep.subr.bf16.mxu0 %v9282_v53  ;;  %6927 = vmatprep.subr.bf16.mxu1 %v9285_v57 }
 0x861   :  { %6897 = vmatpush1.bf16.msra.mxu0 %v9288_v60  ;;  %6929 = vmatpush1.bf16.msra.mxu1 %v9292_v0 }
 0x862   :  { %6931 = vmatprep.subr.bf16.mxu0 %v9199_v46  ;;  %6963 = vmatprep.subr.bf16.mxu1 %v9203_v16 }
 0x917   :  { %v3793_v43 = vpop.f32.mrb[20].mxu0  ;;  %v3864_v45 = vpop.f32.mrb[20].mxu1 }
 0x918   :  { %v3869_v47 = vadd.f32 %v9302_v11, %v3793_v43  ;;  %v3795_v48 = vpop.f32.mrb[21].mxu0  ;;  %v3866_v58 = vpop.f32.mrb[21].mxu1  ;;  %v3871_v8 = vadd.f32 %v9311_v10, %v3864_v45 }
 0x919   :  { %v3870_v59 = vadd.f32 %v9304_v21, %v3795_v48  ;;  %v3872_v4 = vadd.f32 %v9307_v36, %v3866_v58 }
 0x91a   :  { %v6390_v1 = vmul.f32 -1.442695, %v3869_v47 }
 0x91b   :  { %v6391_v2 = vmul.f32 -1.442695, %v3870_v59  ;;  %v6392_v41 = vmul.f32 -1.442695, %v3872_v4 }
 0x91c   :  { %8211 = vpow2.f32 %v6390_v1 }
 0x91d   :  { %8213 = vpow2.f32 %v6391_v2 }
 0x91e   :  { %8215 = vpow2.f32 %v6392_v41 }
 0x91f   :  { %8217 = vtanh.f32 %v3871_v8 }
 0x926   :  { %v8212_v9 = vpop.eup %8211 }
 0x927   :  { %v8214_v18 = vpop.eup %8213  ;;  %v3876_v20 = vadd.f32 1.0, %v8212_v9 }
 0x928   :  { %v3882_v25 = vadd.f32 1.0, %v8214_v18  ;;  %v8216_v26 = vpop.eup %8215 }
 0x929   :  { %8219 = vrcp.f32 %v3876_v20  ;;  %v8218_v37 = vpop.eup %8217  ;;  %v3889_v7 = vadd.f32 1.0, %v8216_v26 }
 0x92a   :  { %8221 = vrcp.f32 %v3882_v25 }
 0x92b   :  { %8223 = vrcp.f32 %v3889_v7 }
 0x933   :  { %v8220_v29 = vpop.eup %8219 }
 0x934   :  { %v8222_v30 = vpop.eup %8221  ;;  %v3893_v5 = vmul.f32 %v8220_v29, %v8218_v37 }
 0x935   :  { %v3892_v38 = vmul.f32 %v8222_v30, %v9482_v42  ;;  %v8224_v19 = vpop.eup %8223 }
 0x937   :  { %v9524_v39 = vadd.f32 %v3893_v5, %v3892_v38 }
 0x939   :  { %8225 = vtanh.f32 %v9524_v39 }
 0x943   :  { %v8226_v55 = vpop.eup %8225 }
 0x944   :  { %v3896_v56 = vmul.f32 %v8226_v55, %v8224_v19 }
 0x946   :  { %3962 = vmatmul.mubr.f32.vlgmr.msra.gmra.mrb[22].mxu0 %v3896_v56  ;;  %4033 = vmatmul.mubr.f32.vlgmr.msra.gmra.mrb[22].mxu1 %v3896_v56 }
 0x947   :  { %6933 = vmatpush1.bf16.msra.mxu0 %v9205_v17  ;;  %6965 = vmatpush1.bf16.msra.mxu1 %v9208_v23 }
 0x948   :  { %6935 = vmatprep.subr.bf16.mxu0 %v9212_v27  ;;  %6967 = vmatprep.subr.bf16.mxu1 %v9214_v28 }
 0x949   :  { %4131 = vmatprep.mubr.f32.mxu0 %v8610_v15  ;;  %4202 = vmatprep.mubr.f32.mxu1 %v8610_v15 }
 0x94b   :  { %6937 = vmatpush1.bf16.msra.mxu0 %v9217_v31  ;;  %6969 = vmatpush1.bf16.msra.mxu1 %v9221_v6 }
 0x94c   :  { %6939 = vmatprep.subr.bf16.mxu0 %v9223_v35  ;;  %6971 = vmatprep.subr.bf16.mxu1 %v9225_v22 }
 0x94f   :  { %6941 = vmatpush1.bf16.msra.mxu0 %v9228_v44  ;;  %6973 = vmatpush1.bf16.msra.mxu1 %v9232_v49 }
 0x950   :  { %6943 = vmatprep.subr.bf16.mxu0 %v9234_v50  ;;  %6975 = vmatprep.subr.bf16.mxu1 %v9237_v54 }
 0x953   :  { %6945 = vmatpush1.bf16.msra.mxu0 %v9240_v61  ;;  %6977 = vmatpush1.bf16.msra.mxu1 %v9244_v62 }
 0x954   :  { %6947 = vmatprep.subr.bf16.mxu0 %v9246_v63  ;;  %6979 = vmatprep.subr.bf16.mxu1 %v9249_v3 }
 0x957   :  { %6949 = vmatpush1.bf16.msra.mxu0 %v9252_v12  ;;  %6981 = vmatpush1.bf16.msra.mxu1 %v9256_v13 }
 0x958   :  { %6951 = vmatprep.subr.bf16.mxu0 %v9258_v14  ;;  %6983 = vmatprep.subr.bf16.mxu1 %v9261_v24 }
 0x95b   :  { %6953 = vmatpush1.bf16.msra.mxu0 %v9264_v32  ;;  %6985 = vmatpush1.bf16.msra.mxu1 %v9268_v33 }
 0x95c   :  { %6955 = vmatprep.subr.bf16.mxu0 %v9270_v34  ;;  %6987 = vmatprep.subr.bf16.mxu1 %v9273_v40 }
 0x95f   :  { %6957 = vmatpush1.bf16.msra.mxu0 %v9276_v51  ;;  %6989 = vmatpush1.bf16.msra.mxu1 %v9280_v52 }
 0x960   :  { %6959 = vmatprep.subr.bf16.mxu0 %v9282_v53  ;;  %6991 = vmatprep.subr.bf16.mxu1 %v9285_v57 }
 0x963   :  { %6961 = vmatpush1.bf16.msra.mxu0 %v9288_v60  ;;  %6993 = vmatpush1.bf16.msra.mxu1 %v9292_v0 }
 0x964   :  { %6995 = vmatprep.subr.bf16.mxu0 %v9199_v46  ;;  %7027 = vmatprep.subr.bf16.mxu1 %v9203_v16 }
 0xa19   :  { %v3963_v42 = vpop.f32.mrb[22].mxu0  ;;  %v4034_v43 = vpop.f32.mrb[22].mxu1 }
 0xa1a   :  { %v4039_v45 = vadd.f32 %v9302_v11, %v3963_v42  ;;  %v3965_v47 = vpop.f32.mrb[23].mxu0  ;;  %v4036_v48 = vpop.f32.mrb[23].mxu1  ;;  %v4041_v41 = vadd.f32 %v9311_v10, %v4034_v43 }
 0xa1b   :  { %v4040_v58 = vadd.f32 %v9304_v21, %v3965_v47  ;;  %v4042_v2 = vadd.f32 %v9307_v36, %v4036_v48 }
 0xa1c   :  { %v6393_v59 = vmul.f32 -1.442695, %v4039_v45 }
 0xa1d   :  { %v6394_v1 = vmul.f32 -1.442695, %v4040_v58  ;;  %v6395_v4 = vmul.f32 -1.442695, %v4042_v2 }
 0xa1e   :  { %8227 = vpow2.f32 %v6393_v59 }
 0xa1f   :  { %8229 = vpow2.f32 %v6394_v1 }
 0xa20   :  { %8231 = vpow2.f32 %v6395_v4 }
 0xa21   :  { %8233 = vtanh.f32 %v4041_v41 }
 0xa28   :  { %v8228_v8 = vpop.eup %8227 }
 0xa29   :  { %v8230_v9 = vpop.eup %8229  ;;  %v4046_v18 = vadd.f32 1.0, %v8228_v8 }
 0xa2a   :  { %v4052_v20 = vadd.f32 1.0, %v8230_v9  ;;  %v8232_v25 = vpop.eup %8231 }
 0xa2b   :  { %8235 = vrcp.f32 %v4046_v18  ;;  %v8234_v26 = vpop.eup %8233  ;;  %v4059_v5 = vadd.f32 1.0, %v8232_v25 }
 0xa2c   :  { %8237 = vrcp.f32 %v4052_v20 }
 0xa2d   :  { %8239 = vrcp.f32 %v4059_v5 }
 0xa35   :  { %v8236_v37 = vpop.eup %8235 }
 0xa36   :  { %v8238_v29 = vpop.eup %8237  ;;  %v4063_v30 = vmul.f32 %v8236_v37, %v8234_v26 }
 0xa37   :  { %v4062_v7 = vmul.f32 %v8238_v29, %v9524_v39  ;;  %v8240_v19 = vpop.eup %8239 }
 0xa39   :  { %v9566_v38 = vadd.f32 %v4063_v30, %v4062_v7 }
 0xa3b   :  { %8241 = vtanh.f32 %v9566_v38 }
 0xa45   :  { %v8242_v55 = vpop.eup %8241 }
 0xa46   :  { %v4066_v56 = vmul.f32 %v8242_v55, %v8240_v19 }
 0xa48   :  { %4132 = vmatmul.mubr.f32.vlgmr.msra.gmra.mrb[24].mxu0 %v4066_v56  ;;  %4203 = vmatmul.mubr.f32.vlgmr.msra.gmra.mrb[24].mxu1 %v4066_v56 }
 0xa49   :  { %6997 = vmatpush1.bf16.msra.mxu0 %v9205_v17  ;;  %7029 = vmatpush1.bf16.msra.mxu1 %v9208_v23 }
 0xa4a   :  { %6999 = vmatprep.subr.bf16.mxu0 %v9212_v27  ;;  %7031 = vmatprep.subr.bf16.mxu1 %v9214_v28 }
 0xa4b   :  { %4301 = vmatprep.mubr.f32.mxu0 %v8610_v15  ;;  %4372 = vmatprep.mubr.f32.mxu1 %v8610_v15 }
 0xa4d   :  { %7001 = vmatpush1.bf16.msra.mxu0 %v9217_v31  ;;  %7033 = vmatpush1.bf16.msra.mxu1 %v9221_v6 }
 0xa4e   :  { %7003 = vmatprep.subr.bf16.mxu0 %v9223_v35  ;;  %7035 = vmatprep.subr.bf16.mxu1 %v9225_v22 }
 0xa51   :  { %7005 = vmatpush1.bf16.msra.mxu0 %v9228_v44  ;;  %7037 = vmatpush1.bf16.msra.mxu1 %v9232_v49 }
 0xa52   :  { %7007 = vmatprep.subr.bf16.mxu0 %v9234_v50  ;;  %7039 = vmatprep.subr.bf16.mxu1 %v9237_v54 }
 0xa55   :  { %7009 = vmatpush1.bf16.msra.mxu0 %v9240_v61  ;;  %7041 = vmatpush1.bf16.msra.mxu1 %v9244_v62 }
 0xa56   :  { %7011 = vmatprep.subr.bf16.mxu0 %v9246_v63  ;;  %7043 = vmatprep.subr.bf16.mxu1 %v9249_v3 }
 0xa59   :  { %7013 = vmatpush1.bf16.msra.mxu0 %v9252_v12  ;;  %7045 = vmatpush1.bf16.msra.mxu1 %v9256_v13 }
 0xa5a   :  { %7015 = vmatprep.subr.bf16.mxu0 %v9258_v14  ;;  %7047 = vmatprep.subr.bf16.mxu1 %v9261_v24 }
 0xa5d   :  { %7017 = vmatpush1.bf16.msra.mxu0 %v9264_v32  ;;  %7049 = vmatpush1.bf16.msra.mxu1 %v9268_v33 }
 0xa5e   :  { %7019 = vmatprep.subr.bf16.mxu0 %v9270_v34  ;;  %7051 = vmatprep.subr.bf16.mxu1 %v9273_v40 }
 0xa61   :  { %7021 = vmatpush1.bf16.msra.mxu0 %v9276_v51  ;;  %7053 = vmatpush1.bf16.msra.mxu1 %v9280_v52 }
 0xa62   :  { %7023 = vmatprep.subr.bf16.mxu0 %v9282_v53  ;;  %7055 = vmatprep.subr.bf16.mxu1 %v9285_v57 }
 0xa65   :  { %7025 = vmatpush1.bf16.msra.mxu0 %v9288_v60  ;;  %7057 = vmatpush1.bf16.msra.mxu1 %v9292_v0 }
 0xa66   :  { %7059 = vmatprep.subr.bf16.mxu0 %v9199_v46  ;;  %7091 = vmatprep.subr.bf16.mxu1 %v9203_v16 }
 0xb1b   :  { %v4133_v39 = vpop.f32.mrb[24].mxu0  ;;  %v4204_v42 = vpop.f32.mrb[24].mxu1 }
 0xb1c   :  { %v4209_v43 = vadd.f32 %v9302_v11, %v4133_v39  ;;  %v4135_v45 = vpop.f32.mrb[25].mxu0  ;;  %v4206_v47 = vpop.f32.mrb[25].mxu1  ;;  %v4211_v4 = vadd.f32 %v9311_v10, %v4204_v42 }
 0xb1d   :  { %v4210_v48 = vadd.f32 %v9304_v21, %v4135_v45  ;;  %v4212_v1 = vadd.f32 %v9307_v36, %v4206_v47 }
 0xb1e   :  { %v6396_v58 = vmul.f32 -1.442695, %v4209_v43 }
 0xb1f   :  { %v6397_v59 = vmul.f32 -1.442695, %v4210_v48  ;;  %v6398_v2 = vmul.f32 -1.442695, %v4212_v1 }
 0xb20   :  { %8243 = vpow2.f32 %v6396_v58 }
 0xb21   :  { %8245 = vpow2.f32 %v6397_v59 }
 0xb22   :  { %8247 = vpow2.f32 %v6398_v2 }
 0xb23   :  { %8249 = vtanh.f32 %v4211_v4 }
 0xb2a   :  { %v8244_v41 = vpop.eup %8243 }
 0xb2b   :  { %v8246_v8 = vpop.eup %8245  ;;  %v4216_v9 = vadd.f32 1.0, %v8244_v41 }
 0xb2c   :  { %v4222_v18 = vadd.f32 1.0, %v8246_v8  ;;  %v8248_v20 = vpop.eup %8247 }
 0xb2d   :  { %8251 = vrcp.f32 %v4216_v9  ;;  %v8250_v25 = vpop.eup %8249  ;;  %v4229_v30 = vadd.f32 1.0, %v8248_v20 }
 0xb2e   :  { %8253 = vrcp.f32 %v4222_v18 }
 0xb2f   :  { %8255 = vrcp.f32 %v4229_v30 }
 0xb37   :  { %v8252_v26 = vpop.eup %8251 }
 0xb38   :  { %v8254_v37 = vpop.eup %8253  ;;  %v4233_v29 = vmul.f32 %v8252_v26, %v8250_v25 }
 0xb39   :  { %v4232_v5 = vmul.f32 %v8254_v37, %v9566_v38  ;;  %v8256_v19 = vpop.eup %8255 }
 0xb3b   :  { %v9608_v7 = vadd.f32 %v4233_v29, %v4232_v5 }
 0xb3d   :  { %8257 = vtanh.f32 %v9608_v7 }
 0xb47   :  { %v8258_v55 = vpop.eup %8257 }
 0xb48   :  { %v4236_v56 = vmul.f32 %v8258_v55, %v8256_v19 }
 0xb4a   :  { %4302 = vmatmul.mubr.f32.vlgmr.msra.gmra.mrb[26].mxu0 %v4236_v56  ;;  %4373 = vmatmul.mubr.f32.vlgmr.msra.gmra.mrb[26].mxu1 %v4236_v56 }
 0xb4b   :  { %7061 = vmatpush1.bf16.msra.mxu0 %v9205_v17  ;;  %7093 = vmatpush1.bf16.msra.mxu1 %v9208_v23 }
 0xb4c   :  { %7063 = vmatprep.subr.bf16.mxu0 %v9212_v27  ;;  %7095 = vmatprep.subr.bf16.mxu1 %v9214_v28 }
 0xb4d   :  { %4471 = vmatprep.mubr.f32.mxu0 %v8610_v15  ;;  %4542 = vmatprep.mubr.f32.mxu1 %v8610_v15 }
 0xb4f   :  { %7065 = vmatpush1.bf16.msra.mxu0 %v9217_v31  ;;  %7097 = vmatpush1.bf16.msra.mxu1 %v9221_v6 }
 0xb50   :  { %7067 = vmatprep.subr.bf16.mxu0 %v9223_v35  ;;  %7099 = vmatprep.subr.bf16.mxu1 %v9225_v22 }
 0xb53   :  { %7069 = vmatpush1.bf16.msra.mxu0 %v9228_v44  ;;  %7101 = vmatpush1.bf16.msra.mxu1 %v9232_v49 }
 0xb54   :  { %7071 = vmatprep.subr.bf16.mxu0 %v9234_v50  ;;  %7103 = vmatprep.subr.bf16.mxu1 %v9237_v54 }
 0xb57   :  { %7073 = vmatpush1.bf16.msra.mxu0 %v9240_v61  ;;  %7105 = vmatpush1.bf16.msra.mxu1 %v9244_v62 }
 0xb58   :  { %7075 = vmatprep.subr.bf16.mxu0 %v9246_v63  ;;  %7107 = vmatprep.subr.bf16.mxu1 %v9249_v3 }
 0xb5b   :  { %7077 = vmatpush1.bf16.msra.mxu0 %v9252_v12  ;;  %7109 = vmatpush1.bf16.msra.mxu1 %v9256_v13 }
 0xb5c   :  { %7079 = vmatprep.subr.bf16.mxu0 %v9258_v14  ;;  %7111 = vmatprep.subr.bf16.mxu1 %v9261_v24 }
 0xb5f   :  { %7081 = vmatpush1.bf16.msra.mxu0 %v9264_v32  ;;  %7113 = vmatpush1.bf16.msra.mxu1 %v9268_v33 }
 0xb60   :  { %7083 = vmatprep.subr.bf16.mxu0 %v9270_v34  ;;  %7115 = vmatprep.subr.bf16.mxu1 %v9273_v40 }
 0xb63   :  { %7085 = vmatpush1.bf16.msra.mxu0 %v9276_v51  ;;  %7117 = vmatpush1.bf16.msra.mxu1 %v9280_v52 }
 0xb64   :  { %7087 = vmatprep.subr.bf16.mxu0 %v9282_v53  ;;  %7119 = vmatprep.subr.bf16.mxu1 %v9285_v57 }
 0xb67   :  { %7089 = vmatpush1.bf16.msra.mxu0 %v9288_v60  ;;  %7121 = vmatpush1.bf16.msra.mxu1 %v9292_v0 }
 0xb68   :  { %7123 = vmatprep.subr.bf16.mxu0 %v9199_v46  ;;  %7155 = vmatprep.subr.bf16.mxu1 %v9203_v16 }
 0xc1d   :  { %v4303_v38 = vpop.f32.mrb[26].mxu0  ;;  %v4374_v39 = vpop.f32.mrb[26].mxu1 }
 0xc1e   :  { %v4379_v42 = vadd.f32 %v9302_v11, %v4303_v38  ;;  %v4305_v43 = vpop.f32.mrb[27].mxu0  ;;  %v4376_v45 = vpop.f32.mrb[27].mxu1  ;;  %v4381_v2 = vadd.f32 %v9311_v10, %v4374_v39 }
 0xc1f   :  { %v4380_v47 = vadd.f32 %v9304_v21, %v4305_v43  ;;  %v4382_v59 = vadd.f32 %v9307_v36, %v4376_v45 }
 0xc20   :  { %v6399_v48 = vmul.f32 -1.442695, %v4379_v42 }
 0xc21   :  { %v6400_v58 = vmul.f32 -1.442695, %v4380_v47  ;;  %v6401_v1 = vmul.f32 -1.442695, %v4382_v59 }
 0xc22   :  { %8259 = vpow2.f32 %v6399_v48 }
 0xc23   :  { %8261 = vpow2.f32 %v6400_v58 }
 0xc24   :  { %8263 = vpow2.f32 %v6401_v1 }
 0xc25   :  { %8265 = vtanh.f32 %v4381_v2 }
 0xc2c   :  { %v8260_v4 = vpop.eup %8259 }
 0xc2d   :  { %v8262_v41 = vpop.eup %8261  ;;  %v4386_v8 = vadd.f32 1.0, %v8260_v4 }
 0xc2e   :  { %v4392_v9 = vadd.f32 1.0, %v8262_v41  ;;  %v8264_v18 = vpop.eup %8263 }
 0xc2f   :  { %8267 = vrcp.f32 %v4386_v8  ;;  %v8266_v20 = vpop.eup %8265  ;;  %v4399_v29 = vadd.f32 1.0, %v8264_v18 }
 0xc30   :  { %8269 = vrcp.f32 %v4392_v9 }
 0xc31   :  { %8271 = vrcp.f32 %v4399_v29 }
 0xc39   :  { %v8268_v25 = vpop.eup %8267 }
 0xc3a   :  { %v8270_v26 = vpop.eup %8269  ;;  %v4403_v37 = vmul.f32 %v8268_v25, %v8266_v20 }
 0xc3b   :  { %v4402_v30 = vmul.f32 %v8270_v26, %v9608_v7  ;;  %v8272_v19 = vpop.eup %8271 }
 0xc3d   :  { %v9650_v5 = vadd.f32 %v4403_v37, %v4402_v30 }
 0xc3f   :  { %8273 = vtanh.f32 %v9650_v5 }
 0xc49   :  { %v8274_v55 = vpop.eup %8273 }
 0xc4a   :  { %v4406_v56 = vmul.f32 %v8274_v55, %v8272_v19 }
 0xc4c   :  { %4472 = vmatmul.mubr.f32.vlgmr.msra.gmra.mrb[28].mxu0 %v4406_v56  ;;  %4543 = vmatmul.mubr.f32.vlgmr.msra.gmra.mrb[28].mxu1 %v4406_v56 }
 0xc4d   :  { %7125 = vmatpush1.bf16.msra.mxu0 %v9205_v17  ;;  %7157 = vmatpush1.bf16.msra.mxu1 %v9208_v23 }
 0xc4e   :  { %7127 = vmatprep.subr.bf16.mxu0 %v9212_v27  ;;  %7159 = vmatprep.subr.bf16.mxu1 %v9214_v28 }
 0xc4f   :  { %4641 = vmatprep.mubr.f32.mxu0 %v8610_v15  ;;  %4712 = vmatprep.mubr.f32.mxu1 %v8610_v15 }
 0xc51   :  { %7129 = vmatpush1.bf16.msra.mxu0 %v9217_v31  ;;  %7161 = vmatpush1.bf16.msra.mxu1 %v9221_v6 }
 0xc52   :  { %7131 = vmatprep.subr.bf16.mxu0 %v9223_v35  ;;  %7163 = vmatprep.subr.bf16.mxu1 %v9225_v22 }
 0xc55   :  { %7133 = vmatpush1.bf16.msra.mxu0 %v9228_v44  ;;  %7165 = vmatpush1.bf16.msra.mxu1 %v9232_v49 }
 0xc56   :  { %7135 = vmatprep.subr.bf16.mxu0 %v9234_v50  ;;  %7167 = vmatprep.subr.bf16.mxu1 %v9237_v54 }
 0xc59   :  { %7137 = vmatpush1.bf16.msra.mxu0 %v9240_v61  ;;  %7169 = vmatpush1.bf16.msra.mxu1 %v9244_v62 }
 0xc5a   :  { %7139 = vmatprep.subr.bf16.mxu0 %v9246_v63  ;;  %7171 = vmatprep.subr.bf16.mxu1 %v9249_v3 }
 0xc5d   :  { %7141 = vmatpush1.bf16.msra.mxu0 %v9252_v12  ;;  %7173 = vmatpush1.bf16.msra.mxu1 %v9256_v13 }
 0xc5e   :  { %7143 = vmatprep.subr.bf16.mxu0 %v9258_v14  ;;  %7175 = vmatprep.subr.bf16.mxu1 %v9261_v24 }
 0xc61   :  { %7145 = vmatpush1.bf16.msra.mxu0 %v9264_v32  ;;  %7177 = vmatpush1.bf16.msra.mxu1 %v9268_v33 }
 0xc62   :  { %7147 = vmatprep.subr.bf16.mxu0 %v9270_v34  ;;  %7179 = vmatprep.subr.bf16.mxu1 %v9273_v40 }
 0xc65   :  { %7149 = vmatpush1.bf16.msra.mxu0 %v9276_v51  ;;  %7181 = vmatpush1.bf16.msra.mxu1 %v9280_v52 }
 0xc66   :  { %7151 = vmatprep.subr.bf16.mxu0 %v9282_v53  ;;  %7183 = vmatprep.subr.bf16.mxu1 %v9285_v57 }
 0xc69   :  { %7153 = vmatpush1.bf16.msra.mxu0 %v9288_v60  ;;  %7185 = vmatpush1.bf16.msra.mxu1 %v9292_v0 }
 0xc6a   :  { %7187 = vmatprep.subr.bf16.mxu0 %v9199_v46  ;;  %7219 = vmatprep.subr.bf16.mxu1 %v9203_v16 }
 0xd1f   :  { %v4473_v7 = vpop.f32.mrb[28].mxu0  ;;  %v4544_v38 = vpop.f32.mrb[28].mxu1 }
 0xd20   :  { %v4549_v39 = vadd.f32 %v9302_v11, %v4473_v7  ;;  %v4475_v42 = vpop.f32.mrb[29].mxu0  ;;  %v4546_v43 = vpop.f32.mrb[29].mxu1  ;;  %v4551_v1 = vadd.f32 %v9311_v10, %v4544_v38 }
 0xd21   :  { %v4550_v45 = vadd.f32 %v9304_v21, %v4475_v42  ;;  %v4552_v58 = vadd.f32 %v9307_v36, %v4546_v43 }
 0xd22   :  { %v6402_v47 = vmul.f32 -1.442695, %v4549_v39 }
 0xd23   :  { %v6403_v48 = vmul.f32 -1.442695, %v4550_v45  ;;  %v6404_v59 = vmul.f32 -1.442695, %v4552_v58 }
 0xd24   :  { %8275 = vpow2.f32 %v6402_v47 }
 0xd25   :  { %8277 = vpow2.f32 %v6403_v48 }
 0xd26   :  { %8279 = vpow2.f32 %v6404_v59 }
 0xd27   :  { %8281 = vtanh.f32 %v4551_v1 }
 0xd2e   :  { %v8276_v2 = vpop.eup %8275 }
 0xd2f   :  { %v8278_v4 = vpop.eup %8277  ;;  %v4556_v41 = vadd.f32 1.0, %v8276_v2 }
 0xd30   :  { %v4562_v8 = vadd.f32 1.0, %v8278_v4  ;;  %v8280_v9 = vpop.eup %8279 }
 0xd31   :  { %8283 = vrcp.f32 %v4556_v41  ;;  %v8282_v18 = vpop.eup %8281  ;;  %v4569_v37 = vadd.f32 1.0, %v8280_v9 }
 0xd32   :  { %8285 = vrcp.f32 %v4562_v8 }
 0xd33   :  { %8287 = vrcp.f32 %v4569_v37 }
 0xd3b   :  { %v8284_v20 = vpop.eup %8283 }
 0xd3c   :  { %v8286_v25 = vpop.eup %8285  ;;  %v4573_v26 = vmul.f32 %v8284_v20, %v8282_v18 }
 0xd3d   :  { %v4572_v29 = vmul.f32 %v8286_v25, %v9650_v5  ;;  %v8288_v19 = vpop.eup %8287 }
 0xd3f   :  { %v9692_v30 = vadd.f32 %v4573_v26, %v4572_v29 }
 0xd41   :  { %8289 = vtanh.f32 %v9692_v30 }
 0xd4b   :  { %v8290_v55 = vpop.eup %8289 }
 0xd4c   :  { %v4576_v56 = vmul.f32 %v8290_v55, %v8288_v19 }
 0xd4e   :  { %4642 = vmatmul.mubr.f32.vlgmr.msra.gmra.mrb[30].mxu0 %v4576_v56  ;;  %4713 = vmatmul.mubr.f32.vlgmr.msra.gmra.mrb[30].mxu1 %v4576_v56 }
 0xd4f   :  { %7189 = vmatpush1.bf16.msra.mxu0 %v9205_v17  ;;  %7221 = vmatpush1.bf16.msra.mxu1 %v9208_v23 }
 0xd50   :  { %7191 = vmatprep.subr.bf16.mxu0 %v9212_v27  ;;  %7223 = vmatprep.subr.bf16.mxu1 %v9214_v28 }
 0xd51   :  { %4811 = vmatprep.mubr.f32.mxu0 %v8610_v15  ;;  %4882 = vmatprep.mubr.f32.mxu1 %v8610_v15 }
 0xd53   :  { %7193 = vmatpush1.bf16.msra.mxu0 %v9217_v31  ;;  %7225 = vmatpush1.bf16.msra.mxu1 %v9221_v6 }
 0xd54   :  { %7195 = vmatprep.subr.bf16.mxu0 %v9223_v35  ;;  %7227 = vmatprep.subr.bf16.mxu1 %v9225_v22 }
 0xd57   :  { %7197 = vmatpush1.bf16.msra.mxu0 %v9228_v44  ;;  %7229 = vmatpush1.bf16.msra.mxu1 %v9232_v49 }
 0xd58   :  { %7199 = vmatprep.subr.bf16.mxu0 %v9234_v50  ;;  %7231 = vmatprep.subr.bf16.mxu1 %v9237_v54 }
 0xd5b   :  { %7201 = vmatpush1.bf16.msra.mxu0 %v9240_v61  ;;  %7233 = vmatpush1.bf16.msra.mxu1 %v9244_v62 }
 0xd5c   :  { %7203 = vmatprep.subr.bf16.mxu0 %v9246_v63  ;;  %7235 = vmatprep.subr.bf16.mxu1 %v9249_v3 }
 0xd5f   :  { %7205 = vmatpush1.bf16.msra.mxu0 %v9252_v12  ;;  %7237 = vmatpush1.bf16.msra.mxu1 %v9256_v13 }
 0xd60   :  { %7207 = vmatprep.subr.bf16.mxu0 %v9258_v14  ;;  %7239 = vmatprep.subr.bf16.mxu1 %v9261_v24 }
 0xd63   :  { %7209 = vmatpush1.bf16.msra.mxu0 %v9264_v32  ;;  %7241 = vmatpush1.bf16.msra.mxu1 %v9268_v33 }
 0xd64   :  { %7211 = vmatprep.subr.bf16.mxu0 %v9270_v34  ;;  %7243 = vmatprep.subr.bf16.mxu1 %v9273_v40 }
 0xd67   :  { %7213 = vmatpush1.bf16.msra.mxu0 %v9276_v51  ;;  %7245 = vmatpush1.bf16.msra.mxu1 %v9280_v52 }
 0xd68   :  { %7215 = vmatprep.subr.bf16.mxu0 %v9282_v53  ;;  %7247 = vmatprep.subr.bf16.mxu1 %v9285_v57 }
 0xd6b   :  { %7217 = vmatpush1.bf16.msra.mxu0 %v9288_v60  ;;  %7249 = vmatpush1.bf16.msra.mxu1 %v9292_v0 }
 0xd6c   :  { %7251 = vmatprep.subr.bf16.mxu0 %v9199_v46  ;;  %7283 = vmatprep.subr.bf16.mxu1 %v9203_v16 }
 0xe21   :  { %v4643_v5 = vpop.f32.mrb[30].mxu0  ;;  %v4714_v7 = vpop.f32.mrb[30].mxu1 }
 0xe22   :  { %v4719_v38 = vadd.f32 %v9302_v11, %v4643_v5  ;;  %v4645_v39 = vpop.f32.mrb[31].mxu0  ;;  %v4716_v42 = vpop.f32.mrb[31].mxu1  ;;  %v4721_v59 = vadd.f32 %v9311_v10, %v4714_v7 }
 0xe23   :  { %v4720_v43 = vadd.f32 %v9304_v21, %v4645_v39  ;;  %v4722_v48 = vadd.f32 %v9307_v36, %v4716_v42 }
 0xe24   :  { %v6405_v45 = vmul.f32 -1.442695, %v4719_v38 }
 0xe25   :  { %v6406_v47 = vmul.f32 -1.442695, %v4720_v43  ;;  %v6407_v58 = vmul.f32 -1.442695, %v4722_v48 }
 0xe26   :  { %8291 = vpow2.f32 %v6405_v45 }
 0xe27   :  { %8293 = vpow2.f32 %v6406_v47 }
 0xe28   :  { %8295 = vpow2.f32 %v6407_v58 }
 0xe29   :  { %8297 = vtanh.f32 %v4721_v59 }
 0xe30   :  { %v8292_v1 = vpop.eup %8291 }
 0xe31   :  { %v8294_v2 = vpop.eup %8293  ;;  %v4726_v4 = vadd.f32 1.0, %v8292_v1 }
 0xe32   :  { %v4732_v41 = vadd.f32 1.0, %v8294_v2  ;;  %v8296_v8 = vpop.eup %8295 }
 0xe33   :  { %8299 = vrcp.f32 %v4726_v4  ;;  %v8298_v9 = vpop.eup %8297  ;;  %v4739_v26 = vadd.f32 1.0, %v8296_v8 }
 0xe34   :  { %8301 = vrcp.f32 %v4732_v41 }
 0xe35   :  { %8303 = vrcp.f32 %v4739_v26 }
 0xe3d   :  { %v8300_v18 = vpop.eup %8299 }
 0xe3e   :  { %v8302_v20 = vpop.eup %8301  ;;  %v4743_v25 = vmul.f32 %v8300_v18, %v8298_v9 }
 0xe3f   :  { %v4742_v37 = vmul.f32 %v8302_v20, %v9692_v30  ;;  %v8304_v19 = vpop.eup %8303 }
 0xe41   :  { %v9734_v29 = vadd.f32 %v4743_v25, %v4742_v37 }
 0xe43   :  { %8305 = vtanh.f32 %v9734_v29 }
 0xe4d   :  { %v8306_v55 = vpop.eup %8305 }
 0xe4e   :  { %v4746_v56 = vmul.f32 %v8306_v55, %v8304_v19 }
 0xe50   :  { %4812 = vmatmul.mubr.f32.vlgmr.msra.gmra.mrb[32].mxu0 %v4746_v56  ;;  %4883 = vmatmul.mubr.f32.vlgmr.msra.gmra.mrb[32].mxu1 %v4746_v56 }
 0xe51   :  { %7253 = vmatpush1.bf16.msra.mxu0 %v9205_v17  ;;  %7285 = vmatpush1.bf16.msra.mxu1 %v9208_v23 }
 0xe52   :  { %7255 = vmatprep.subr.bf16.mxu0 %v9212_v27  ;;  %7287 = vmatprep.subr.bf16.mxu1 %v9214_v28 }
 0xe53   :  { %4981 = vmatprep.mubr.f32.mxu0 %v8610_v15  ;;  %5052 = vmatprep.mubr.f32.mxu1 %v8610_v15 }
 0xe55   :  { %7257 = vmatpush1.bf16.msra.mxu0 %v9217_v31  ;;  %7289 = vmatpush1.bf16.msra.mxu1 %v9221_v6 }
 0xe56   :  { %7259 = vmatprep.subr.bf16.mxu0 %v9223_v35  ;;  %7291 = vmatprep.subr.bf16.mxu1 %v9225_v22 }
 0xe59   :  { %7261 = vmatpush1.bf16.msra.mxu0 %v9228_v44  ;;  %7293 = vmatpush1.bf16.msra.mxu1 %v9232_v49 }
 0xe5a   :  { %7263 = vmatprep.subr.bf16.mxu0 %v9234_v50  ;;  %7295 = vmatprep.subr.bf16.mxu1 %v9237_v54 }
 0xe5d   :  { %7265 = vmatpush1.bf16.msra.mxu0 %v9240_v61  ;;  %7297 = vmatpush1.bf16.msra.mxu1 %v9244_v62 }
 0xe5e   :  { %7267 = vmatprep.subr.bf16.mxu0 %v9246_v63  ;;  %7299 = vmatprep.subr.bf16.mxu1 %v9249_v3 }
 0xe61   :  { %7269 = vmatpush1.bf16.msra.mxu0 %v9252_v12  ;;  %7301 = vmatpush1.bf16.msra.mxu1 %v9256_v13 }
 0xe62   :  { %7271 = vmatprep.subr.bf16.mxu0 %v9258_v14  ;;  %7303 = vmatprep.subr.bf16.mxu1 %v9261_v24 }
 0xe65   :  { %7273 = vmatpush1.bf16.msra.mxu0 %v9264_v32  ;;  %7305 = vmatpush1.bf16.msra.mxu1 %v9268_v33 }
 0xe66   :  { %7275 = vmatprep.subr.bf16.mxu0 %v9270_v34  ;;  %7307 = vmatprep.subr.bf16.mxu1 %v9273_v40 }
 0xe69   :  { %7277 = vmatpush1.bf16.msra.mxu0 %v9276_v51  ;;  %7309 = vmatpush1.bf16.msra.mxu1 %v9280_v52 }
 0xe6a   :  { %7279 = vmatprep.subr.bf16.mxu0 %v9282_v53  ;;  %7311 = vmatprep.subr.bf16.mxu1 %v9285_v57 }
 0xe6d   :  { %7281 = vmatpush1.bf16.msra.mxu0 %v9288_v60  ;;  %7313 = vmatpush1.bf16.msra.mxu1 %v9292_v0 }
 0xe6e   :  { %7315 = vmatprep.subr.bf16.mxu0 %v9199_v46  ;;  %7347 = vmatprep.subr.bf16.mxu1 %v9203_v16 }
 0xf23   :  { %v4813_v30 = vpop.f32.mrb[32].mxu0  ;;  %v4884_v5 = vpop.f32.mrb[32].mxu1 }
 0xf24   :  { %v4889_v7 = vadd.f32 %v9302_v11, %v4813_v30  ;;  %v4815_v38 = vpop.f32.mrb[33].mxu0  ;;  %v4886_v39 = vpop.f32.mrb[33].mxu1  ;;  %v4891_v58 = vadd.f32 %v9311_v10, %v4884_v5 }
 0xf25   :  { %v4890_v42 = vadd.f32 %v9304_v21, %v4815_v38  ;;  %v4892_v47 = vadd.f32 %v9307_v36, %v4886_v39 }
 0xf26   :  { %v6408_v43 = vmul.f32 -1.442695, %v4889_v7 }
 0xf27   :  { %v6409_v45 = vmul.f32 -1.442695, %v4890_v42  ;;  %v6410_v48 = vmul.f32 -1.442695, %v4892_v47 }
 0xf28   :  { %8307 = vpow2.f32 %v6408_v43 }
 0xf29   :  { %8309 = vpow2.f32 %v6409_v45 }
 0xf2a   :  { %8311 = vpow2.f32 %v6410_v48 }
 0xf2b   :  { %8313 = vtanh.f32 %v4891_v58 }
 0xf32   :  { %v8308_v59 = vpop.eup %8307 }
 0xf33   :  { %v8310_v1 = vpop.eup %8309  ;;  %v4896_v2 = vadd.f32 1.0, %v8308_v59 }
 0xf34   :  { %v4902_v4 = vadd.f32 1.0, %v8310_v1  ;;  %v8312_v41 = vpop.eup %8311 }
 0xf35   :  { %8315 = vrcp.f32 %v4896_v2  ;;  %v8314_v8 = vpop.eup %8313  ;;  %v4909_v25 = vadd.f32 1.0, %v8312_v41 }
 0xf36   :  { %8317 = vrcp.f32 %v4902_v4 }
 0xf37   :  { %8319 = vrcp.f32 %v4909_v25 }
 0xf3f   :  { %v8316_v9 = vpop.eup %8315 }
 0xf40   :  { %v8318_v18 = vpop.eup %8317  ;;  %v4913_v20 = vmul.f32 %v8316_v9, %v8314_v8 }
 0xf41   :  { %v4912_v26 = vmul.f32 %v8318_v18, %v9734_v29  ;;  %v8320_v19 = vpop.eup %8319 }
 0xf43   :  { %v9776_v37 = vadd.f32 %v4913_v20, %v4912_v26 }
 0xf45   :  { %8321 = vtanh.f32 %v9776_v37 }
 0xf4f   :  { %v8322_v55 = vpop.eup %8321 }
 0xf50   :  { %v4916_v56 = vmul.f32 %v8322_v55, %v8320_v19 }
 0xf52   :  { %4982 = vmatmul.mubr.f32.vlgmr.msra.gmra.mrb[34].mxu0 %v4916_v56  ;;  %5053 = vmatmul.mubr.f32.vlgmr.msra.gmra.mrb[34].mxu1 %v4916_v56 }
 0xf53   :  { %7317 = vmatpush1.bf16.msra.mxu0 %v9205_v17  ;;  %7349 = vmatpush1.bf16.msra.mxu1 %v9208_v23 }
 0xf54   :  { %7319 = vmatprep.subr.bf16.mxu0 %v9212_v27  ;;  %7351 = vmatprep.subr.bf16.mxu1 %v9214_v28 }
 0xf55   :  { %5151 = vmatprep.mubr.f32.mxu0 %v8610_v15  ;;  %5222 = vmatprep.mubr.f32.mxu1 %v8610_v15 }
 0xf57   :  { %7321 = vmatpush1.bf16.msra.mxu0 %v9217_v31  ;;  %7353 = vmatpush1.bf16.msra.mxu1 %v9221_v6 }
 0xf58   :  { %7323 = vmatprep.subr.bf16.mxu0 %v9223_v35  ;;  %7355 = vmatprep.subr.bf16.mxu1 %v9225_v22 }
 0xf5b   :  { %7325 = vmatpush1.bf16.msra.mxu0 %v9228_v44  ;;  %7357 = vmatpush1.bf16.msra.mxu1 %v9232_v49 }
 0xf5c   :  { %7327 = vmatprep.subr.bf16.mxu0 %v9234_v50  ;;  %7359 = vmatprep.subr.bf16.mxu1 %v9237_v54 }
 0xf5f   :  { %7329 = vmatpush1.bf16.msra.mxu0 %v9240_v61  ;;  %7361 = vmatpush1.bf16.msra.mxu1 %v9244_v62 }
 0xf60   :  { %7331 = vmatprep.subr.bf16.mxu0 %v9246_v63  ;;  %7363 = vmatprep.subr.bf16.mxu1 %v9249_v3 }
 0xf63   :  { %7333 = vmatpush1.bf16.msra.mxu0 %v9252_v12  ;;  %7365 = vmatpush1.bf16.msra.mxu1 %v9256_v13 }
 0xf64   :  { %7335 = vmatprep.subr.bf16.mxu0 %v9258_v14  ;;  %7367 = vmatprep.subr.bf16.mxu1 %v9261_v24 }
 0xf67   :  { %7337 = vmatpush1.bf16.msra.mxu0 %v9264_v32  ;;  %7369 = vmatpush1.bf16.msra.mxu1 %v9268_v33 }
 0xf68   :  { %7339 = vmatprep.subr.bf16.mxu0 %v9270_v34  ;;  %7371 = vmatprep.subr.bf16.mxu1 %v9273_v40 }
 0xf6b   :  { %7341 = vmatpush1.bf16.msra.mxu0 %v9276_v51  ;;  %7373 = vmatpush1.bf16.msra.mxu1 %v9280_v52 }
 0xf6c   :  { %7343 = vmatprep.subr.bf16.mxu0 %v9282_v53  ;;  %7375 = vmatprep.subr.bf16.mxu1 %v9285_v57 }
 0xf6f   :  { %7345 = vmatpush1.bf16.msra.mxu0 %v9288_v60  ;;  %7377 = vmatpush1.bf16.msra.mxu1 %v9292_v0 }
 0xf70   :  { %7379 = vmatprep.subr.bf16.mxu0 %v9199_v46  ;;  %7411 = vmatprep.subr.bf16.mxu1 %v9203_v16 }
0x1025   :  { %v4983_v29 = vpop.f32.mrb[34].mxu0  ;;  %v5054_v30 = vpop.f32.mrb[34].mxu1 }
0x1026   :  { %v5059_v5 = vadd.f32 %v9302_v11, %v4983_v29  ;;  %v4985_v7 = vpop.f32.mrb[35].mxu0  ;;  %v5056_v38 = vpop.f32.mrb[35].mxu1  ;;  %v5061_v48 = vadd.f32 %v9311_v10, %v5054_v30 }
0x1027   :  { %v5060_v39 = vadd.f32 %v9304_v21, %v4985_v7  ;;  %v5062_v45 = vadd.f32 %v9307_v36, %v5056_v38 }
0x1028   :  { %v6411_v42 = vmul.f32 -1.442695, %v5059_v5 }
0x1029   :  { %v6412_v43 = vmul.f32 -1.442695, %v5060_v39  ;;  %v6413_v47 = vmul.f32 -1.442695, %v5062_v45 }
0x102a   :  { %8323 = vpow2.f32 %v6411_v42 }
0x102b   :  { %8325 = vpow2.f32 %v6412_v43 }
0x102c   :  { %8327 = vpow2.f32 %v6413_v47 }
0x102d   :  { %8329 = vtanh.f32 %v5061_v48 }
0x1034   :  { %v8324_v58 = vpop.eup %8323 }
0x1035   :  { %v8326_v59 = vpop.eup %8325  ;;  %v5066_v1 = vadd.f32 1.0, %v8324_v58 }
0x1036   :  { %v5072_v2 = vadd.f32 1.0, %v8326_v59  ;;  %v8328_v4 = vpop.eup %8327 }
0x1037   :  { %8331 = vrcp.f32 %v5066_v1  ;;  %v8330_v41 = vpop.eup %8329  ;;  %v5079_v20 = vadd.f32 1.0, %v8328_v4 }
0x1038   :  { %8333 = vrcp.f32 %v5072_v2 }
0x1039   :  { %8335 = vrcp.f32 %v5079_v20 }
0x1041   :  { %v8332_v8 = vpop.eup %8331 }
0x1042   :  { %v8334_v9 = vpop.eup %8333  ;;  %v5083_v18 = vmul.f32 %v8332_v8, %v8330_v41 }
0x1043   :  { %v5082_v25 = vmul.f32 %v8334_v9, %v9776_v37  ;;  %v8336_v19 = vpop.eup %8335 }
0x1045   :  { %v9818_v26 = vadd.f32 %v5083_v18, %v5082_v25 }
0x1047   :  { %8337 = vtanh.f32 %v9818_v26 }
0x1051   :  { %v8338_v55 = vpop.eup %8337 }
0x1052   :  { %v5086_v56 = vmul.f32 %v8338_v55, %v8336_v19  ;;  %v5616_v55 = vld [vmem:[#allocation11] sm:$0xf] }
0x1054   :  { %5152 = vmatmul.mubr.f32.vlgmr.msra.gmra.mrb[36].mxu0 %v5086_v56  ;;  %5223 = vmatmul.mubr.f32.vlgmr.msra.gmra.mrb[36].mxu1 %v5086_v56  ;;  %v8116_v56 = vld [vmem:[%s10040_s9 + $0x28] sm:$0xff]  }
0x1055   :  { %7381 = vmatpush1.bf16.msra.mxu0 %v9205_v17  ;;  %7413 = vmatpush1.bf16.msra.mxu1 %v9208_v23 }
0x1056   :  { %7383 = vmatprep.subr.bf16.mxu0 %v9212_v27  ;;  %7415 = vmatprep.subr.bf16.mxu1 %v9214_v28 }
0x1057   :  { %5321 = vmatprep.mubr.f32.mxu0 %v8610_v15  ;;  %5392 = vmatprep.mubr.f32.mxu1 %v8610_v15 }
0x1059   :  { %7385 = vmatpush1.bf16.msra.mxu0 %v9217_v31  ;;  %7417 = vmatpush1.bf16.msra.mxu1 %v9221_v6 }
0x105a   :  { %7387 = vmatprep.subr.bf16.mxu0 %v9223_v35  ;;  %7419 = vmatprep.subr.bf16.mxu1 %v9225_v22 }
0x105d   :  { %7389 = vmatpush1.bf16.msra.mxu0 %v9228_v44  ;;  %7421 = vmatpush1.bf16.msra.mxu1 %v9232_v49 }
0x105e   :  { %7391 = vmatprep.subr.bf16.mxu0 %v9234_v50  ;;  %7423 = vmatprep.subr.bf16.mxu1 %v9237_v54 }
0x1061   :  { %7393 = vmatpush1.bf16.msra.mxu0 %v9240_v61  ;;  %7425 = vmatpush1.bf16.msra.mxu1 %v9244_v62 }
0x1062   :  { %7395 = vmatprep.subr.bf16.mxu0 %v9246_v63  ;;  %7427 = vmatprep.subr.bf16.mxu1 %v9249_v3 }
0x1065   :  { %7397 = vmatpush1.bf16.msra.mxu0 %v9252_v12  ;;  %7429 = vmatpush1.bf16.msra.mxu1 %v9256_v13 }
0x1066   :  { %7399 = vmatprep.subr.bf16.mxu0 %v9258_v14  ;;  %7431 = vmatprep.subr.bf16.mxu1 %v9261_v24 }
0x1069   :  { %7401 = vmatpush1.bf16.msra.mxu0 %v9264_v32  ;;  %7433 = vmatpush1.bf16.msra.mxu1 %v9268_v33 }
0x106a   :  { %7403 = vmatprep.subr.bf16.mxu0 %v9270_v34  ;;  %7435 = vmatprep.subr.bf16.mxu1 %v9273_v40 }
0x106d   :  { %7405 = vmatpush1.bf16.msra.mxu0 %v9276_v51  ;;  %7437 = vmatpush1.bf16.msra.mxu1 %v9280_v52 }
0x106e   :  { %7407 = vmatprep.subr.bf16.mxu0 %v9282_v53  ;;  %7439 = vmatprep.subr.bf16.mxu1 %v9285_v57 }
0x1071   :  { %7409 = vmatpush1.bf16.msra.mxu0 %v9288_v60  ;;  %7441 = vmatpush1.bf16.msra.mxu1 %v9292_v0 }
0x1072   :  { %7443 = vmatprep.subr.bf16.mxu0 %v9199_v46  ;;  %7475 = vmatprep.subr.bf16.mxu1 %v9203_v16 }
0x1127   :  { %v5153_v37 = vpop.f32.mrb[36].mxu0  ;;  %v5224_v29 = vpop.f32.mrb[36].mxu1 }
0x1128   :  { %v5229_v30 = vadd.f32 %v9302_v11, %v5153_v37  ;;  %v5155_v5 = vpop.f32.mrb[37].mxu0  ;;  %v5226_v7 = vpop.f32.mrb[37].mxu1  ;;  %v5231_v47 = vadd.f32 %v9311_v10, %v5224_v29  ;;  %v5623_v37 = vsel %vm5621_vm1, %v5616_v55, 0  ;;  %v5614_v29 = vld [vmem:[%s10032_s1] sm:$0x3] }
0x1129   :  { %v5230_v38 = vadd.f32 %v9304_v21, %v5155_v5  ;;  %v5232_v43 = vadd.f32 %v9307_v36, %v5226_v7  ;;  %v8117_v5 = vld [vmem:[%s10040_s9 + $0x30] sm:$0xff]   ;;  %v8118_v7 = vld [vmem:[%s10040_s9 + $0x38] sm:$0xff]  }
0x112a   :  { %v6414_v39 = vmul.f32 -1.442695, %v5229_v30  ;;  %v5615_v30 = vpack.c.bf16 %v5614_v29, %v5614_v29 }
0x112b   :  { %v6415_v42 = vmul.f32 -1.442695, %v5230_v38  ;;  %v6416_v45 = vmul.f32 -1.442695, %v5232_v43  ;;  %v8119_v38 = vld [vmem:[%s10043_s12] sm:$0xff]   ;;  %v8122_v43 = vld [vmem:[%s10043_s12 + $0x18] sm:$0xff]  }
0x112c   :  { %8339 = vpow2.f32 %v6414_v39  ;;  %v8120_v39 = vld [vmem:[%s10043_s12 + $0x8] sm:$0xff]  }
0x112d   :  { %8341 = vpow2.f32 %v6415_v42  ;;  %v8121_v42 = vld [vmem:[%s10043_s12 + $0x10] sm:$0xff]  }
0x112e   :  { %8343 = vpow2.f32 %v6416_v45  ;;  %v8123_v45 = vld [vmem:[%s10043_s12 + $0x20] sm:$0xff]  }
0x112f   :  { %8345 = vtanh.f32 %v5231_v47  ;;  %v8124_v47 = vld [vmem:[%s10043_s12 + $0x28] sm:$0xff]  }
0x1136   :  { %v8340_v46 = vpop.eup %8339 }
0x1137   :  { %v8342_v48 = vpop.eup %8341  ;;  %v5236_v16 = vadd.f32 1.0, %v8340_v46 }
0x1138   :  { %v5242_v58 = vadd.f32 1.0, %v8342_v48  ;;  %v8344_v59 = vpop.eup %8343 }
0x1139   :  { %8347 = vrcp.f32 %v5236_v16  ;;  %v8346_v1 = vpop.eup %8345  ;;  %v5249_v8 = vadd.f32 1.0, %v8344_v59 }
0x113a   :  { %8349 = vrcp.f32 %v5242_v58 }
0x113b   :  { %8351 = vrcp.f32 %v5249_v8 }
0x1143   :  { %v8348_v2 = vpop.eup %8347 }
0x1144   :  { %v8350_v4 = vpop.eup %8349  ;;  %v5253_v41 = vmul.f32 %v8348_v2, %v8346_v1 }
0x1145   :  { %v5252_v9 = vmul.f32 %v8350_v4, %v9818_v26  ;;  %v8352_v20 = vpop.eup %8351  ;;  %v8115_v26 = vld [vmem:[%s10040_s9 + $0x20] sm:$0xff]  }
0x1147   :  { %v9860_v18 = vadd.f32 %v5253_v41, %v5252_v9 }
0x1149   :  { %8353 = vtanh.f32 %v9860_v18 }
0x1153   :  { %v8354_v25 = vpop.eup %8353 }
0x1154   :  { %v5256_v19 = vmul.f32 %v8354_v25, %v8352_v20 }
0x1156   :  { %5322 = vmatmul.mubr.f32.vlgmr.msra.gmra.mrb[38].mxu0 %v5256_v19  ;;  %5393 = vmatmul.mubr.f32.vlgmr.msra.gmra.mrb[38].mxu1 %v5256_v19 }
0x1157   :  { %7445 = vmatpush1.bf16.msra.mxu0 %v9205_v17  ;;  %7477 = vmatpush1.bf16.msra.mxu1 %v9208_v23 }
0x1158   :  { %7447 = vmatprep.subr.bf16.mxu0 %v9212_v27  ;;  %7479 = vmatprep.subr.bf16.mxu1 %v9214_v28 }
0x1159   :  { %5491 = vmatprep.mubr.f32.mxu0 %v8610_v15  ;;  %5562 = vmatprep.mubr.f32.mxu1 %v8610_v15 }
0x115b   :  { %7449 = vmatpush1.bf16.msra.mxu0 %v9217_v31  ;;  %7481 = vmatpush1.bf16.msra.mxu1 %v9221_v6 }
0x115c   :  { %7451 = vmatprep.subr.bf16.mxu0 %v9223_v35  ;;  %7483 = vmatprep.subr.bf16.mxu1 %v9225_v22 }
0x115f   :  { %7453 = vmatpush1.bf16.msra.mxu0 %v9228_v44  ;;  %7485 = vmatpush1.bf16.msra.mxu1 %v9232_v49 }
0x1160   :  { %7455 = vmatprep.subr.bf16.mxu0 %v9234_v50  ;;  %7487 = vmatprep.subr.bf16.mxu1 %v9237_v54 }
0x1163   :  { %7457 = vmatpush1.bf16.msra.mxu0 %v9240_v61  ;;  %7489 = vmatpush1.bf16.msra.mxu1 %v9244_v62 }
0x1164   :  { %7459 = vmatprep.subr.bf16.mxu0 %v9246_v63  ;;  %7491 = vmatprep.subr.bf16.mxu1 %v9249_v3 }
0x1167   :  { %7461 = vmatpush1.bf16.msra.mxu0 %v9252_v12  ;;  %7493 = vmatpush1.bf16.msra.mxu1 %v9256_v13 }
0x1168   :  { %7463 = vmatprep.subr.bf16.mxu0 %v9258_v14  ;;  %7495 = vmatprep.subr.bf16.mxu1 %v9261_v24 }
0x116b   :  { %7465 = vmatpush1.bf16.msra.mxu0 %v9264_v32  ;;  %7497 = vmatpush1.bf16.msra.mxu1 %v9268_v33 }
0x116c   :  { %7467 = vmatprep.subr.bf16.mxu0 %v9270_v34  ;;  %7499 = vmatprep.subr.bf16.mxu1 %v9273_v40 }
0x116f   :  { %7469 = vmatpush1.bf16.msra.mxu0 %v9276_v51  ;;  %7501 = vmatpush1.bf16.msra.mxu1 %v9280_v52 }
0x1170   :  { %7471 = vmatprep.subr.bf16.mxu0 %v9282_v53  ;;  %7503 = vmatprep.subr.bf16.mxu1 %v9285_v57  ;;  %v8111_v53 = vld [vmem:[%s10040_s9] sm:$0xff]   ;;  %v8112_v57 = vld [vmem:[%s10040_s9 + $0x8] sm:$0xff]  }
0x1173   :  { %7473 = vmatpush1.bf16.msra.mxu0 %v9288_v60  ;;  %7505 = vmatpush1.bf16.msra.mxu1 %v9292_v0  ;;  %v8113_v60 = vld [vmem:[%s10040_s9 + $0x10] sm:$0xff]   ;;  %v8114_v0 = vld [vmem:[%s10040_s9 + $0x18] sm:$0xff]  }
0x1174   :  { %6486 = vmatprep.subr.bf16.mxu1 %v8610_v15  ;;  %6480 = vmatprep.subr.bf16.mxu0 %v8610_v15 }
0x1229   :  { %v5323_v17 = vpop.f32.mrb[38].mxu0  ;;  %v5394_v23 = vpop.f32.mrb[38].mxu1 }
0x122a   :  { %v5399_v27 = vadd.f32 %v9302_v11, %v5323_v17  ;;  %v5325_v28 = vpop.f32.mrb[39].mxu0  ;;  %v5396_v31 = vpop.f32.mrb[39].mxu1  ;;  %v5401_v50 = vadd.f32 %v9311_v10, %v5394_v23 }
0x122b   :  { %v5400_v6 = vadd.f32 %v9304_v21, %v5325_v28  ;;  %v5402_v44 = vadd.f32 %v9307_v36, %v5396_v31 }
0x122c   :  { %v6417_v35 = vmul.f32 -1.442695, %v5399_v27 }
0x122d   :  { %v6418_v22 = vmul.f32 -1.442695, %v5400_v6  ;;  %v6419_v49 = vmul.f32 -1.442695, %v5402_v44 }
0x122e   :  { %8355 = vpow2.f32 %v6417_v35 }
0x122f   :  { %8357 = vpow2.f32 %v6418_v22 }
0x1230   :  { %8359 = vpow2.f32 %v6419_v49 }
0x1231   :  { %8361 = vtanh.f32 %v5401_v50 }
0x1238   :  { %v8356_v54 = vpop.eup %8355 }
0x1239   :  { %v8358_v61 = vpop.eup %8357  ;;  %v5406_v62 = vadd.f32 1.0, %v8356_v54 }
0x123a   :  { %v5412_v63 = vadd.f32 1.0, %v8358_v61  ;;  %v8360_v3 = vpop.eup %8359  ;;  %v8125_v61 = vld [vmem:[%s10043_s12 + $0x30] sm:$0xff]  }
0x123b   :  { %8363 = vrcp.f32 %v5406_v62  ;;  %v8362_v12 = vpop.eup %8361  ;;  %v5419_v32 = vadd.f32 1.0, %v8360_v3  ;;  %v8126_v62 = vld [vmem:[%s10043_s12 + $0x38] sm:$0xff]   ;;  %v8128_v3 = vld [vmem:[%s10045_s14 + $0x8] sm:$0xff]  }
0x123c   :  { %8365 = vrcp.f32 %v5412_v63  ;;  %v8127_v63 = vld [vmem:[%s10045_s14] sm:$0xff]  }
0x123d   :  { %8367 = vrcp.f32 %v5419_v32  ;;  %v8133_v32 = vld [vmem:[%s10045_s14 + $0x30] sm:$0xff]  }
0x1245   :  { %v8364_v13 = vpop.eup %8363 }
0x1246   :  { %v8366_v14 = vpop.eup %8365  ;;  %v5423_v24 = vmul.f32 %v8364_v13, %v8362_v12  ;;  %v8129_v12 = vld [vmem:[%s10045_s14 + $0x10] sm:$0xff]   ;;  %v8130_v13 = vld [vmem:[%s10045_s14 + $0x18] sm:$0xff]  }
0x1247   :  { %v5422_v33 = vmul.f32 %v8366_v14, %v9860_v18  ;;  %v8368_v40 = vpop.eup %8367  ;;  %v8131_v14 = vld [vmem:[%s10045_s14 + $0x20] sm:$0xff]  }
0x1249   :  { %v9902_v34 = vadd.f32 %v5423_v24, %v5422_v33  ;;  %v8132_v24 = vld [vmem:[%s10045_s14 + $0x28] sm:$0xff]  }
0x124b   :  { %8369 = vtanh.f32 %v9902_v34 }
0x1255   :  { %v8370_v51 = vpop.eup %8369 }
0x1256   :  { %v5426_v52 = vmul.f32 %v8370_v51, %v8368_v40 }
0x1258   :  { %5492 = vmatmul.mubr.f32.vlgmr.msra.gmra.mrb[40].mxu0 %v5426_v52  ;;  %5563 = vmatmul.mubr.f32.vlgmr.msra.gmra.mrb[40].mxu1 %v5426_v52 }
0x1259   :  { %6487 = vmatpush3.bf16.msra.mxu1 %v8111_v53  ;;  %6482 = vmatprep.mubr.msk.bf16.mxu0 %vm8611_vm2, %v8610_v15 }
0x125a   :  { %6488 = vmatprep.subr.bf16.mxu1 %v8610_v15  ;;  %6481 = vmatpush3.bf16.msra.mxu0 %v5623_v37 }
0x125b   :  { %6502 = vmatprep.mubr.msk.bf16.mxu1 %vm8611_vm2, %v8610_v15  ;;  %6506 = vmatprep.subr.bf16.mxu0 %v8610_v15 }
0x125d   :  { %6489 = vmatpush3.bf16.msra.mxu1 %v8112_v57  ;;  %6483 = vmatmul.mubr.msk.bf16.vlgmr.msra.gmra.mrb[44].mxu0 %vm5617_vm3, %v5615_v30 }
0x125e   :  { %6490 = vmatprep.subr.bf16.mxu1 %v8610_v15  ;;  %6522 = vmatprep.mubr.msk.bf16.mxu0 %vm8611_vm2, %v8610_v15 }
0x125f   :  { %6507 = vmatpush3.bf16.msra.mxu0 %v8119_v38 }
0x1260   :  { %6508 = vmatprep.subr.bf16.mxu0 %v8610_v15 }
0x1261   :  { %6491 = vmatpush3.bf16.msra.mxu1 %v8113_v60 }
0x1262   :  { %6492 = vmatprep.subr.bf16.mxu1 %v8610_v15 }
0x1263   :  { %6509 = vmatpush3.bf16.msra.mxu0 %v8120_v39 }
0x1264   :  { %6510 = vmatprep.subr.bf16.mxu0 %v8610_v15 }
0x1265   :  { %6493 = vmatpush3.bf16.msra.mxu1 %v8114_v0  ;;  %v8134_v0 = vld [vmem:[%s10045_s14 + $0x38] sm:$0xff]  }
0x1266   :  { %6494 = vmatprep.subr.bf16.mxu1 %v8610_v15 }
0x1267   :  { %6511 = vmatpush3.bf16.msra.mxu0 %v8121_v42 }
0x1268   :  { %6512 = vmatprep.subr.bf16.mxu0 %v8610_v15 }
0x1269   :  { %6495 = vmatpush3.bf16.msra.mxu1 %v8115_v26  ;;  %v6433_v26 = vld [vmem:[#allocation13] ss:$0 sm:$0xff] }
0x126a   :  { %6496 = vmatprep.subr.bf16.mxu1 %v8610_v15 }
0x126b   :  { %6513 = vmatpush3.bf16.msra.mxu0 %v8122_v43 }
0x126c   :  { %6514 = vmatprep.subr.bf16.mxu0 %v8610_v15 }
0x126d   :  { %6497 = vmatpush3.bf16.msra.mxu1 %v8116_v56 }
0x126e   :  { %6498 = vmatprep.subr.bf16.mxu1 %v8610_v15 }
0x126f   :  { %6515 = vmatpush3.bf16.msra.mxu0 %v8123_v45 }
0x1270   :  { %6516 = vmatprep.subr.bf16.mxu0 %v8610_v15 }
0x1271   :  { %6499 = vmatpush3.bf16.msra.mxu1 %v8117_v5  ;;  %v6442_v5 = vld [vmem:[#allocation14] ss:$0 sm:$0xff] }
0x1272   :  { %6500 = vmatprep.subr.bf16.mxu1 %v8610_v15 }
0x1273   :  { %6517 = vmatpush3.bf16.msra.mxu0 %v8124_v47 }
0x1274   :  { %6518 = vmatprep.subr.bf16.mxu0 %v8610_v15 }
0x1275   :  { %6501 = vmatpush3.bf16.msra.mxu1 %v8118_v7 }
0x1276   :  { %6526 = vmatprep.subr.bf16.mxu1 %v8610_v15 }
0x1277   :  { %6519 = vmatpush3.bf16.msra.mxu0 %v8125_v61 }
0x1278   :  { %6520 = vmatprep.subr.bf16.mxu0 %v8610_v15 }
0x127b   :  { %6521 = vmatpush3.bf16.msra.mxu0 %v8126_v62 }
0x132b   :  { %v5493_v46 = vpop.f32.mrb[40].mxu0  ;;  %v5564_v48 = vpop.f32.mrb[40].mxu1 }
0x132c   :  { %v5569_v16 = vadd.f32 %v9302_v11, %v5493_v46  ;;  %v5495_v58 = vpop.f32.mrb[41].mxu0  ;;  %v5566_v59 = vpop.f32.mrb[41].mxu1  ;;  %v5571_v9 = vadd.f32 %v9311_v10, %v5564_v48 }
0x132d   :  { %v5570_v1 = vadd.f32 %v9304_v21, %v5495_v58  ;;  %v5572_v41 = vadd.f32 %v9307_v36, %v5566_v59 }
0x132e   :  { %v6420_v2 = vmul.f32 -1.442695, %v5569_v16 }
0x132f   :  { %v6421_v4 = vmul.f32 -1.442695, %v5570_v1  ;;  %v6422_v8 = vmul.f32 -1.442695, %v5572_v41 }
0x1330   :  { %8371 = vpow2.f32 %v6420_v2  ;;  %v5659_v44 = vpop.f32.mrb[44].mxu0 }
0x1331   :  { %8373 = vpow2.f32 %v6421_v4  ;;  %v6484_v49 = vpop.f32.mrb[45].mxu0 }
0x1332   :  { %8375 = vpow2.f32 %v6422_v8  ;;  %v5662_v50 = vpop.f32.mrb[46].mxu0 }
0x1333   :  { %8377 = vtanh.f32 %v5571_v9  ;;  %v6485_v54 = vpop.f32.mrb[47].mxu0 }
0x133a   :  { %v8372_v18 = vpop.eup %8371 }
0x133b   :  { %v8374_v20 = vpop.eup %8373  ;;  %v5576_v25 = vadd.f32 1.0, %v8372_v18 }
0x133c   :  { %v5582_v19 = vadd.f32 1.0, %v8374_v20  ;;  %v8376_v11 = vpop.eup %8375 }
0x133d   :  { %8379 = vrcp.f32 %v5576_v25  ;;  %v8378_v17 = vpop.eup %8377  ;;  %v5589_v28 = vadd.f32 1.0, %v8376_v11 }
0x133e   :  { %8381 = vrcp.f32 %v5582_v19 }
0x133f   :  { %8383 = vrcp.f32 %v5589_v28 }
0x1347   :  { %v8380_v21 = vpop.eup %8379 }
0x1348   :  { %v8382_v23 = vpop.eup %8381  ;;  %v5593_v27 = vmul.f32 %v8380_v21, %v8378_v17 }
0x1349   :  { %v5592_v31 = vmul.f32 %v8382_v23, %v9902_v34  ;;  %v8384_v10 = vpop.eup %8383  ;;  %v6432_v34 = vld [vmem:[%s10042_s11] ss:$0 sm:$0xff]  ;;  %s8612_s11 = smov [#allocation16]  }
0x134a   :  { %s5993_s9 = sshll.u32 %s8612_s11, 4  ;;  %s5994_s9 = int_to_ptr.vmem [resolvable:$true] %s5993_s9 }
0x134b   :  { %v5594_v36 = vadd.f32 %v5593_v27, %v5592_v31  ;;  %s8563_s14 = scalar_lea.vmem %s5994_s9, 32  ;;  %p8568_p9 = scmp.lt.s32.totalorder %s5994_s9, %s5994_s9 }
0x134c   :  { %p8564_p8 = scmp.ne.s32.totalorder %s5994_s9, %s8563_s14  ;;  %p8569_p10 = scmp.lt.s32.totalorder %s8563_s14, %s8563_s14 }
0x134d   :  { %8385 = vtanh.f32 %v5594_v36 }
0x134e   :  { %p8570_p11 = por %p8569_p10, %p8568_p9 }
0x1350   :  { %p8571_p12 = pnand %p8570_p11, %p8564_p8 }
0x1357   :  { %v8386_v6 = vpop.eup %8385 }
0x1358   :  { %v5596_v35 = vmul.f32 %v8386_v6, %v8384_v10 }
0x135a   :  { %v5597_v22 = vpack.c.bf16 %v5596_v35, %v5596_v35 }
0x135c   :  { %6503 = vmatmul.mubr.bf16.vlgmr.msra.gmra.mrb[44].mxu1 %v5597_v22 }
0x135d   :  { %6542 = vmatprep.mubr.msk.bf16.mxu1 %vm8611_vm2, %v8610_v15  ;;  %6527 = vmatpush3.bf16.msra.mxu1 %v8127_v63 }
0x135e   :  { %6528 = vmatprep.subr.bf16.mxu1 %v8610_v15 }
0x1361   :  { %6529 = vmatpush3.bf16.msra.mxu1 %v8128_v3 }
0x1362   :  { %6530 = vmatprep.subr.bf16.mxu1 %v8610_v15 }
0x1365   :  { %6531 = vmatpush3.bf16.msra.mxu1 %v8129_v12 }
0x1366   :  { %6532 = vmatprep.subr.bf16.mxu1 %v8610_v15 }
0x1369   :  { %6533 = vmatpush3.bf16.msra.mxu1 %v8130_v13 }
0x136a   :  { %6534 = vmatprep.subr.bf16.mxu1 %v8610_v15 }
0x136d   :  { %6535 = vmatpush3.bf16.msra.mxu1 %v8131_v14 }
0x136e   :  { %6536 = vmatprep.subr.bf16.mxu1 %v8610_v15 }
0x1371   :  { %6537 = vmatpush3.bf16.msra.mxu1 %v8132_v24 }
0x1372   :  { %6538 = vmatprep.subr.bf16.mxu1 %v8610_v15 }
0x1375   :  { %6539 = vmatpush3.bf16.msra.mxu1 %v8133_v32 }
0x1376   :  { %6540 = vmatprep.subr.bf16.mxu1 %v8610_v15 }
0x1379   :  { %6541 = vmatpush3.bf16.msra.mxu1 %v8134_v0 }
0x142f   :  { %v5747_v33 = vpop.f32.mrb[44].mxu1 }
0x1430   :  { %v5748_v40 = vadd.f32 %v5747_v33, %v5659_v44  ;;  %v6504_v51 = vpop.f32.mrb[45].mxu1 }
0x1431   :  { %v5750_v52 = vpop.f32.mrb[46].mxu1 }
0x1432   :  { %v5760_v53 = vadd.f32 %v6432_v34, %v5748_v40  ;;  %v6505_v57 = vpop.f32.mrb[47].mxu1 }
0x1434   :  { %v5761_v60 = vpack.c.bf16 %v5760_v53, %v5760_v53 }
0x1436   :  { %6523 = vmatmul.mubr.bf16.vlgmr.msra.gmra.mrb[48].mxu0 %v5761_v60 }
0x1509   :  { %v5867_v55 = vpop.f32.mrb[48].mxu0 }
0x150a   :  { %v5868_v15 = vadd.f32 %v6433_v26, %v5867_v55  ;;  %v6524_v56 = vpop.f32.mrb[49].mxu0 }
0x150b   :  { %v5870_v37 = vpop.f32.mrb[50].mxu0 }
0x150c   :  { %v5873_v29 = vpack.c.bf16 %v5868_v15, %v5868_v15  ;;  %v6525_v30 = vpop.f32.mrb[51].mxu0 }
0x150e   :  { %6543 = vmatmul.mubr.bf16.vlgmr.msra.gmra.mrb[48].mxu1 %v5873_v29 }
0x15e1   :  { %v5979_v7 = vpop.f32.mrb[48].mxu1 }
0x15e2   :  { %v5980_v38 = vadd.f32 %v6442_v5, %v5979_v7  ;;  %v6544_v39 = vpop.f32.mrb[49].mxu1 }
0x15e3   :  { %v5982_v42 = vpop.f32.mrb[50].mxu1 }
0x15e4   :  { %v6545_v43 = vpop.f32.mrb[51].mxu1  ;;  %5986 = vst.msk [vmem:[#allocation16] sm:$0x3] %vm5985_vm4, %v5980_v38 }
0x15e5   :  { %8574 = shalt.err (!%p8571_p12)
}
0x15e6   :  { %s8575_s3 = scalar_lea.hbm %s10047_s16, 32 }
0x15e7   :  { %p8576_p13 = scmp.ne.s32.totalorder %s10047_s16, %s8575_s3  ;;  %p8579_p0 = scmp.lt.u32.totalorder %s8575_s3, %s10047_s16 }
0x15e9   :  { %p8581_p1 = pnand %p8579_p0, %p8576_p13 }
0x15eb   :  { %8584 = shalt.err (!%p8581_p1)
}
0x15ec   :  { %5996 = dma.vmem_to_hbm [thread:$0]  %s5994_s9, 32, %s10047_s16, [#allocation4]  }
0x15ed   :  { %8595 = dma.done.wait [#allocation4], 32  }
0x15ee   :  { %8596 = vsyncadd [#allocation4], 4294967264 }
0x15ef   :  { %6000 = vsyncpa [#allocation3], 1 }
0x15f0   :  { %6001 = vsyncpa [#allocation6], 1 }
0x15f1   :  { %6002 = vsyncpa [#allocation9], 1 }
0x15f2   :  { %6003 = vsyncpa [#allocation12], 1 }
0x15f3   :  { %6004 = vsyncpa [#allocation15], 1 }
0x15f4   :  { %6005 = vsyncpa [#allocation4], 1 }

</bundles_post_ra>
